<compile_context>
chip_gen: v6e
topology: v6e:2x2x1
jax: 0.10.0
libtpu: 0.0.40
codegen_flags: <defaults>
</compile_context>

<pallas_src>
import functools

import numpy as np
import jax
import jax.numpy as jnp
from jax.experimental import pallas as pl
from jax.experimental.pallas import tpu as pltpu

F32 = jnp.float32
BF16 = jnp.bfloat16
CP = 128   # lane-dense padded channel width used for every activation / weight


# --------------------------------------------------------------------------- helpers
def _kaiming(rng, shape, fan_in):
    return (rng.standard_normal(shape) * np.sqrt(2.0 / fan_in)).astype(np.float32)


def _shift_taps(h, w):
    """taps[k] @ x_flat == zero-padded 3x3 tap k of the flattened (h*w, C) image."""
    m = h * w
    mats = np.zeros((9, m, m), np.float32)
    k = 0
    for dy in (-1, 0, 1):
        for dx in (-1, 0, 1):
            for i in range(h):
                for j in range(w):
                    si, sj = i + dy, j + dx
                    if 0 <= si < h and 0 <= sj < w:
                        mats[k, i * w + j, si * w + sj] = 1.0
            k += 1
    return mats


def _maxpool_select_stack(h, w):
    """Stacked 0/1 selection matrices for maxpool 3x3 stride 2 pad 1 -> (9*ho*wo, h*w)."""
    ho, wo = h // 2, w // 2
    mats = np.zeros((9, ho * wo, h * w), np.float32)
    k = 0
    for dy in (-1, 0, 1):
        for dx in (-1, 0, 1):
            for i in range(ho):
                for j in range(wo):
                    si, sj = 2 * i + dy, 2 * j + dx
                    if 0 <= si < h and 0 <= sj < w:
                        mats[k, i * wo + j, si * w + sj] = 1.0
            k += 1
    return mats.reshape(9 * ho * wo, h * w)


def _avgpool_matrix(h, w):
    ho, wo = h // 2, w // 2
    mat = np.zeros((ho * wo, h * w), np.float32)
    for i in range(ho):
        for j in range(wo):
            for a in range(2):
                for b in range(2):
                    mat[i * wo + j, (2 * i + a) * w + (2 * j + b)] = 0.25
    return mat


# --------------------------------------------------------------------------- kernel
def _densenet_kernel(patches_ref, conv0w_ref, vecs_ref, mats_ref, hmats_ref,
                     poolsel_ref, shift1_ref, avgp_ref, shift2_ref, spat_ref,
                     o_ref, *, hw1, hw2, layers1, layers2):
    """Whole forward pass for ONE image (grid step)."""
    off_tail = 2 + 15 * (layers1 + layers2)   # packed-vector row layout (see make_params)

    def vrow(i):                               # one packed (1, CP) parameter row
        return vecs_ref[i:i + 1, :]

    # ---------------- stem: conv0 (im2col matmul) + norm0 + relu0 ------------------
    y0 = jnp.dot(patches_ref[...], conv0w_ref[...], preferred_element_type=F32)
    y0 = jnp.maximum(y0 * vrow(0) + vrow(1), 0.0)                         # (hw0, CP)

    # ---------------- pool0: maxpool 3x3 s2 p1 as one stacked selection matmul -----
    # exact: y0 >= 0 after relu, so max with the zero-padded taps equals the true max
    taps0 = jnp.dot(poolsel_ref[...], y0.astype(poolsel_ref.dtype),
                    preferred_element_type=F32)                           # (9*hw1, CP)
    feat = taps0[0:hw1, :]
    for k in range(1, 9):
        feat = jnp.maximum(feat, taps0[k * hw1:(k + 1) * hw1, :])

    # ---------------- one _DenseLayer (all intermediates stay in vregs/VMEM) --------
    def dense_layer(feat, hw, shift_ref, l):
        base = 2 + 15 * l
        y = jnp.maximum(feat * vrow(base) + vrow(base + 1), 0.0)          # norm1+relu1
        y = jnp.dot(y.astype(mats_ref.dtype), mats_ref[2 * l],
                    preferred_element_type=F32)                           # conv1 (1x1)
        y = jnp.maximum(y * vrow(base + 2) + vrow(base + 3), 0.0)         # norm2+relu2
        taps = jnp.dot(shift_ref[...], y.astype(shift_ref.dtype),
                       preferred_element_type=F32)                        # (9*hw, CP)
        acc = jnp.broadcast_to(vrow(base + 4), (hw, CP))                  # dw-conv bias
        for k in range(9):                                                # depthwise 3x3
            acc = acc + taps[k * hw:(k + 1) * hw, :] * vrow(base + 6 + k)
        new = jnp.dot(acc.astype(mats_ref.dtype), mats_ref[2 * l + 1],
                      preferred_element_type=F32) + vrow(base + 5)        # pointwise 1x1
        # pointwise weights/bias are column-placed at this layer's channel slot; those
        # channels of `feat` are still zero, so the dense-block concat is a plain add.
        return feat + new

    l = 0
    for _ in range(layers1):
        feat = dense_layer(feat, hw1, shift1_ref, l)
        l += 1

    # ---------------- transition: norm+relu -> 1x1 conv -> 2x2 avg pool -------------
    y = jnp.maximum(feat * vrow(off_tail) + vrow(off_tail + 1), 0.0)
    y = jnp.dot(y.astype(mats_ref.dtype), mats_ref[2 * (layers1 + layers2)],
                preferred_element_type=F32)
    feat = jnp.dot(avgp_ref[...], y, preferred_element_type=F32)          # (hw2, CP)

    for _ in range(layers2):
        feat = dense_layer(feat, hw2, shift2_ref, l)
        l += 1

    # ---------------- head: norm5 + CBAM + relu + global-avg-pool + classifier ------
    x = feat * vrow(off_tail + 2) + vrow(off_tail + 3)                    # norm5 (no relu)
    # channel attention (Linear biases are 0 per the reference init loop)
    mx = jnp.max(x, axis=0, keepdims=True)                                # AdaptiveMaxPool2d
    av = jnp.sum(x, axis=0, keepdims=True) * (1.0 / hw2)                  # AdaptiveAvgPool2d
    hm = jnp.maximum(jnp.dot(mx, hmats_ref[0], preferred_element_type=F32), 0.0)
    wm = jax.nn.sigmoid(jnp.dot(hm, hmats_ref[1], preferred_element_type=F32))
    ha = jnp.maximum(jnp.dot(av, hmats_ref[2], preferred_element_type=F32), 0.0)
    wa = jax.nn.sigmoid(jnp.dot(ha, hmats_ref[3], preferred_element_type=F32))
    wgt = jax.nn.sigmoid(wm + wa)                  # double sigmoid matches the reference
    xa = x * wgt
    # spatial attention: 3x3 conv on [max_c, mean_c] folded into precombined matrices
    mx_s = jnp.max(xa + vrow(off_tail + 4), axis=1, keepdims=True)        # cmask excludes pad
    av_s = jnp.sum(xa, axis=1, keepdims=True)                             # 1/C folded in spat
    bsa = vecs_ref[off_tail + 5:off_tail + 6, 0:1]
    s = (jnp.dot(spat_ref[0:hw2, :], mx_s, preferred_element_type=F32)
         + jnp.dot(spat_ref[hw2:2 * hw2, :], av_s, preferred_element_type=F32) + bsa)
    y = jnp.maximum(jax.nn.sigmoid(s) * xa, 0.0)                          # Ms * x, F.relu
    pooled = jnp.sum(y, axis=0, keepdims=True) * (1.0 / hw2)              # global avg pool
    logits = jnp.dot(pooled, hmats_ref[4], preferred_element_type=F32)    # (1, CP) lane-dense
    o_ref[...] = jnp.broadcast_to(logits, (8, CP))


# --------------------------------------------------------------------------- XLA glue
def im2col(x, kh, kw, stride, pad):
    # TODO(synk): conv0 patch extraction kept as XLA slice/stack glue (irregular gather).
    n, h, w, c = x.shape
    xp = jnp.pad(x, ((0, 0), (pad, pad), (pad, pad), (0, 0)))
    ho = (h + 2 * pad - kh) // stride + 1
    wo = (w + 2 * pad - kw) // stride + 1
    cols = []
    for dy in range(kh):
        for dx in range(kw):
            cols.append(xp[:, dy:dy + stride * ho:stride, dx:dx + stride * wo:stride, :])
    patches = jnp.stack(cols, axis=-2)                       # [N,Ho,Wo,kh*kw,C]
    return patches.reshape(n * ho * wo, kh * kw * c), ho, wo


# --------------------------------------------------------------------------- wrapper
def densenet_forward(x_nhwc, params, cfg):
    n = cfg["n_batch"]
    hw0, hw1, hw2, kpad = cfg["hw0"], cfg["hw1"], cfg["hw2"], cfg["kpad"]

    patches, _, _ = im2col(x_nhwc, 7, 7, 2, 3)
    patches = jnp.pad(patches, ((0, 0), (0, kpad - patches.shape[1]))).astype(BF16)

    kern = functools.partial(_densenet_kernel, hw1=hw1, hw2=hw2,
                             layers1=cfg["layers1"], layers2=cfg["layers2"])

    def _full(a):
        z = (0,) * a.ndim
        return pl.BlockSpec(a.shape, lambda i, z=z: z)

    out = pl.pallas_call(
        kern,
        out_shape=jax.ShapeDtypeStruct((n * 8, CP), F32),
        grid=(n,),
        in_specs=[pl.BlockSpec((hw0, kpad), lambda i: (i, 0)),   # per-image patches
                  _full(params["conv0_w"]), _full(params["vecs"]),
                  _full(params["mats"]), _full(params["hmats"]),
                  _full(params["poolsel"]), _full(params["shift1"]),
                  _full(params["avgp"]), _full(params["shift2"]),
                  _full(params["spat"])],
        out_specs=pl.BlockSpec((8, CP), lambda i: (i, 0)),
        compiler_params=pltpu.CompilerParams(dimension_semantics=("parallel",)),
    )(patches, params["conv0_w"], params["vecs"], params["mats"], params["hmats"],
      params["poolsel"], params["shift1"], params["avgp"], params["shift2"],
      params["spat"])
    return out.reshape(n, 8, CP)[:, 0, :cfg["num_classes"]]


# --------------------------------------------------------------------------- params
def make_params(seed=0, growth=8, block_config=(2, 2), init_feat=16, bn_size=2,
                n_batch=2, input_hw=32, num_classes=5, eps=1e-5):
    assert len(block_config) == 2, "fused kernel is specialized to 2 dense blocks"
    rng = np.random.default_rng(seed)
    layers1, layers2 = block_config
    total_layers = layers1 + layers2
    h0 = input_hw // 2               # after stride-2 conv0
    h1 = h0 // 2                     # after stride-2 maxpool
    h2 = h1 // 2                     # after the transition's 2x2 avgpool
    hw0, hw1, hw2 = h0 * h0, h1 * h1, h2 * h2
    inter = bn_size * growth
    kraw = 7 * 7 * 3
    kpad = ((kraw + 127) // 128) * 128
    bn_scale = 1.0 / np.sqrt(1.0 + eps)          # gamma=1, var=1, mean=0, beta=0

    # ---- conv0 (im2col weight, K padded to 256, bf16) ----
    w0 = np.zeros((kpad, CP), np.float32)
    w0[:kraw, :init_feat] = _kaiming(rng, (kraw, init_feat), kraw)

    # ---- packed (row, CP) parameter vectors ----
    # row 0,1: bn0 scale/shift;  per layer l (15 rows starting at 2+15l):
    #   s1, t1, s2, t2, dw_bias, pw_bias, dw_weight[0..8]
    # tail (2+15*total_layers): trans_s, trans_t, s5, t5, cmask, bsa(lane 0)
    off_layer0 = 2
    off_tail = off_layer0 + 15 * total_layers
    vrows = ((off_tail + 6 + 7) // 8) * 8
    vecs = np.zeros((vrows, CP), np.float32)
    vecs[0, :init_feat] = bn_scale

    mats = np.zeros((2 * total_layers + 1, CP, CP), np.float32)

    def layer_params(l, c_in, off_ch):
        base = off_layer0 + 15 * l
        vecs[base + 0, :c_in] = bn_scale                                   # norm1
        vecs[base + 2, :inter] = bn_scale                                  # norm2
        b_dw = 1.0 / 3.0                                                   # fan_in = 9
        vecs[base + 4, :inter] = rng.uniform(-b_dw, b_dw, inter)           # dw-conv bias
        b_pw = 1.0 / np.sqrt(inter)
        vecs[base + 5, off_ch:off_ch + growth] = rng.uniform(-b_pw, b_pw, growth)
        vecs[base + 6:base + 15, :inter] = _kaiming(rng, (9, inter), 9)    # dw weights
        mats[2 * l, :c_in, :inter] = _kaiming(rng, (c_in, inter), c_in)    # conv1 1x1
        mats[2 * l + 1, :inter, off_ch:off_ch + growth] = _kaiming(rng, (inter, growth), inter)

    l = 0
    nf = init_feat
    for j in range(layers1):
        layer_params(l, nf + j * growth, nf + j * growth)
        l += 1
    nf += layers1 * growth
    vecs[off_tail + 0, :nf] = bn_scale                                     # transition norm
    mats[2 * total_layers, :nf, :nf // 2] = _kaiming(rng, (nf, nf // 2), nf)
    nf //= 2
    for j in range(layers2):
        layer_params(l, nf + j * growth, nf + j * growth)
        l += 1
    nf += layers2 * growth

    # ---- head ----
    vecs[off_tail + 2, :nf] = bn_scale                                     # norm5
    vecs[off_tail + 4, nf:] = -1e30                                        # cmask (pad chans)
    b_sa = 1.0 / np.sqrt(18.0)
    vecs[off_tail + 5, 0] = rng.uniform(-b_sa, b_sa)                       # spatial conv bias

    hidden = max(nf // 16, 1)
    hmats = np.zeros((5, CP, CP), np.float32)
    hmats[0, :nf, :hidden] = _kaiming(rng, (nf, hidden), nf)               # fc_MaxPool L1
    hmats[1, :hidden, :nf] = _kaiming(rng, (hidden, nf), hidden)           # fc_MaxPool L2
    hmats[2, :nf, :hidden] = _kaiming(rng, (nf, hidden), nf)               # fc_AvgPool L1
    hmats[3, :hidden, :nf] = _kaiming(rng, (hidden, nf), hidden)           # fc_AvgPool L2
    hmats[4, :nf, :num_classes] = _kaiming(rng, (nf, num_classes), nf)     # classifier (bias 0)

    # spatial-attention conv folded with the (h2,h2) taps; 1/C of the mean folded into savg
    sa_w = _kaiming(rng, (2, 9), 18)
    taps2 = _shift_taps(h2, h2)
    spat = np.concatenate([np.einsum("k,kij->ij", sa_w[0], taps2),
                           np.einsum("k,kij->ij", sa_w[1], taps2) / float(nf)], axis=0)

    params = dict(
        conv0_w=jnp.asarray(w0, dtype=BF16),
        vecs=jnp.asarray(vecs),
        mats=jnp.asarray(mats, dtype=BF16),
        hmats=jnp.asarray(hmats),
        poolsel=jnp.asarray(_maxpool_select_stack(h0, h0), dtype=BF16),
        shift1=jnp.asarray(_shift_taps(h1, h1).reshape(9 * hw1, hw1), dtype=BF16),
        avgp=jnp.asarray(_avgpool_matrix(h1, h1)),
        shift2=jnp.asarray(taps2.reshape(9 * hw2, hw2)),
        spat=jnp.asarray(spat),
    )
    cfg = dict(n_batch=n_batch, hw0=hw0, hw1=hw1, hw2=hw2, kpad=kpad,
               layers1=layers1, layers2=layers2, num_classes=num_classes)
    return cfg, params


# --------------------------------------------------------------------------- main
if __name__ == "__main__":
    key = jax.random.PRNGKey(0)
    # PyTorch-style NCHW input; small DenseNet config: growth=8, blocks=(2,2), init=16, bn_size=2
    x_nchw = jax.random.normal(key, (2, 3, 32, 32), F32)
    cfg, params = make_params(seed=0, growth=8, block_config=(2, 2), init_feat=16,
                              bn_size=2, n_batch=2, input_hw=32, num_classes=5)

    x_nhwc = jnp.transpose(x_nchw, (0, 2, 3, 1))
    fwd = jax.jit(lambda x, p: densenet_forward(x, p, cfg))
    out = jax.block_until_ready(fwd(x_nhwc, params))
    assert out.shape == (2, 5) and out.dtype == F32
    assert bool(jnp.all(jnp.isfinite(out)))
    print("KERNEL_OK")
</pallas_src>

<mosaic_0001>
module attributes {stable_mosaic.version = 11 : i64} {
  func.func @_densenet_kernel(%arg0: i32, %arg1: memref<256x256xbf16, #tpu.memory_space<vmem>>, %arg2: memref<256x128xbf16, #tpu.memory_space<vmem>>, %arg3: memref<72x128xf32, #tpu.memory_space<vmem>>, %arg4: memref<9x128x128xbf16, #tpu.memory_space<vmem>>, %arg5: memref<5x128x128xf32, #tpu.memory_space<vmem>>, %arg6: memref<576x256xbf16, #tpu.memory_space<vmem>>, %arg7: memref<576x64xbf16, #tpu.memory_space<vmem>>, %arg8: memref<16x64xf32, #tpu.memory_space<vmem>>, %arg9: memref<144x16xf32, #tpu.memory_space<vmem>>, %arg10: memref<32x16xf32, #tpu.memory_space<vmem>>, %arg11: memref<8x128xf32, #tpu.memory_space<vmem>>) attributes {dimension_semantics = [#tpu.dimension_semantics<parallel>], iteration_bounds = array<i64: 2>, scalar_prefetch = 0 : i64, scratch_operands = 0 : i64, tpu.core_type = #tpu.core_type<tc>, window_params = [{transform_indices = @transform_0, window_bounds = array<i64: 256, 256>}, {pipeline_mode = #tpu.pipeline_mode<synchronous>, transform_indices = @transform_1, window_bounds = array<i64: 256, 128>}, {pipeline_mode = #tpu.pipeline_mode<synchronous>, transform_indices = @transform_2, window_bounds = array<i64: 72, 128>}, {pipeline_mode = #tpu.pipeline_mode<synchronous>, transform_indices = @transform_3, window_bounds = array<i64: 9, 128, 128>}, {pipeline_mode = #tpu.pipeline_mode<synchronous>, transform_indices = @transform_4, window_bounds = array<i64: 5, 128, 128>}, {pipeline_mode = #tpu.pipeline_mode<synchronous>, transform_indices = @transform_5, window_bounds = array<i64: 576, 256>}, {pipeline_mode = #tpu.pipeline_mode<synchronous>, transform_indices = @transform_6, window_bounds = array<i64: 576, 64>}, {pipeline_mode = #tpu.pipeline_mode<synchronous>, transform_indices = @transform_7, window_bounds = array<i64: 16, 64>}, {pipeline_mode = #tpu.pipeline_mode<synchronous>, transform_indices = @transform_8, window_bounds = array<i64: 144, 16>}, {pipeline_mode = #tpu.pipeline_mode<synchronous>, transform_indices = @transform_9, window_bounds = array<i64: 32, 16>}, {transform_indices = @transform_10, window_bounds = array<i64: 8, 128>}]} {
    %c0 = arith.constant 0 : index
    %c0_0 = arith.constant 0 : index
    %0 = vector.load %arg1[%c0, %c0_0] : memref<256x256xbf16, #tpu.memory_space<vmem>>, vector<256x256xbf16>
    %c0_1 = arith.constant 0 : index
    %c0_2 = arith.constant 0 : index
    %1 = vector.load %arg2[%c0_1, %c0_2] : memref<256x128xbf16, #tpu.memory_space<vmem>>, vector<256x128xbf16>
    %cst = arith.constant dense<0.000000e+00> : vector<256x128xf32>
    %2 = tpu.matmul %0, %1, %cst {dimension_numbers = #tpu.dot_dimension_numbers<[1], [0], [0], [1], [0, 0, 1, 1], [], []>} : vector<256x256xbf16>, vector<256x128xbf16>, vector<256x128xf32> -> vector<256x128xf32>
    %c0_3 = arith.constant 0 : index
    %c0_4 = arith.constant 0 : index
    %3 = vector.load %arg3[%c0_3, %c0_4] : memref<72x128xf32, #tpu.memory_space<vmem>>, vector<1x128xf32>
    %4 = vector.broadcast %3 : vector<1x128xf32> to vector<256x128xf32>
    %5 = arith.mulf %2, %4 : vector<256x128xf32>
    %c1 = arith.constant 1 : index
    %c0_5 = arith.constant 0 : index
    %6 = vector.load %arg3[%c1, %c0_5] : memref<72x128xf32, #tpu.memory_space<vmem>>, vector<1x128xf32>
    %7 = vector.broadcast %6 : vector<1x128xf32> to vector<256x128xf32>
    %8 = arith.addf %5, %7 : vector<256x128xf32>
    %cst_6 = arith.constant 0.000000e+00 : f32
    %9 = vector.broadcast %cst_6 : f32 to vector<256x128xf32>
    %10 = arith.maximumf %8, %9 : vector<256x128xf32>
    %c0_7 = arith.constant 0 : index
    %c0_8 = arith.constant 0 : index
    %11 = vector.load %arg6[%c0_7, %c0_8] : memref<576x256xbf16, #tpu.memory_space<vmem>>, vector<576x256xbf16>
    %12 = arith.truncf %10 : vector<256x128xf32> to vector<256x128xbf16>
    %cst_9 = arith.constant dense<0.000000e+00> : vector<576x128xf32>
    %13 = tpu.matmul %11, %12, %cst_9 {dimension_numbers = #tpu.dot_dimension_numbers<[1], [0], [0], [1], [0, 0, 1, 1], [], []>} : vector<576x256xbf16>, vector<256x128xbf16>, vector<576x128xf32> -> vector<576x128xf32>
    %14 = vector.extract_strided_slice %13 {offsets = [0, 0], sizes = [64, 128], strides = [1, 1]} : vector<576x128xf32> to vector<64x128xf32>
    %15 = vector.extract_strided_slice %13 {offsets = [64, 0], sizes = [64, 128], strides = [1, 1]} : vector<576x128xf32> to vector<64x128xf32>
    %16 = arith.maximumf %14, %15 : vector<64x128xf32>
    %17 = vector.extract_strided_slice %13 {offsets = [128, 0], sizes = [64, 128], strides = [1, 1]} : vector<576x128xf32> to vector<64x128xf32>
    %18 = arith.maximumf %16, %17 : vector<64x128xf32>
    %19 = vector.extract_strided_slice %13 {offsets = [192, 0], sizes = [64, 128], strides = [1, 1]} : vector<576x128xf32> to vector<64x128xf32>
    %20 = arith.maximumf %18, %19 : vector<64x128xf32>
    %21 = vector.extract_strided_slice %13 {offsets = [256, 0], sizes = [64, 128], strides = [1, 1]} : vector<576x128xf32> to vector<64x128xf32>
    %22 = arith.maximumf %20, %21 : vector<64x128xf32>
    %23 = vector.extract_strided_slice %13 {offsets = [320, 0], sizes = [64, 128], strides = [1, 1]} : vector<576x128xf32> to vector<64x128xf32>
    %24 = arith.maximumf %22, %23 : vector<64x128xf32>
    %25 = vector.extract_strided_slice %13 {offsets = [384, 0], sizes = [64, 128], strides = [1, 1]} : vector<576x128xf32> to vector<64x128xf32>
    %26 = arith.maximumf %24, %25 : vector<64x128xf32>
    %27 = vector.extract_strided_slice %13 {offsets = [448, 0], sizes = [64, 128], strides = [1, 1]} : vector<576x128xf32> to vector<64x128xf32>
    %28 = arith.maximumf %26, %27 : vector<64x128xf32>
    %29 = vector.extract_strided_slice %13 {offsets = [512, 0], sizes = [64, 128], strides = [1, 1]} : vector<576x128xf32> to vector<64x128xf32>
    %30 = arith.maximumf %28, %29 : vector<64x128xf32>
    %c2 = arith.constant 2 : index
    %c0_10 = arith.constant 0 : index
    %31 = vector.load %arg3[%c2, %c0_10] : memref<72x128xf32, #tpu.memory_space<vmem>>, vector<1x128xf32>
    %32 = vector.broadcast %31 : vector<1x128xf32> to vector<64x128xf32>
    %33 = arith.mulf %30, %32 : vector<64x128xf32>
    %c3 = arith.constant 3 : index
    %c0_11 = arith.constant 0 : index
    %34 = vector.load %arg3[%c3, %c0_11] : memref<72x128xf32, #tpu.memory_space<vmem>>, vector<1x128xf32>
    %35 = vector.broadcast %34 : vector<1x128xf32> to vector<64x128xf32>
    %36 = arith.addf %33, %35 : vector<64x128xf32>
    %cst_12 = arith.constant 0.000000e+00 : f32
    %37 = vector.broadcast %cst_12 : f32 to vector<64x128xf32>
    %38 = arith.maximumf %36, %37 : vector<64x128xf32>
    %39 = arith.truncf %38 : vector<64x128xf32> to vector<64x128xbf16>
    %c0_13 = arith.constant 0 : index
    %c0_14 = arith.constant 0 : index
    %c0_15 = arith.constant 0 : index
    %40 = vector.load %arg4[%c0_13, %c0_14, %c0_15] : memref<9x128x128xbf16, #tpu.memory_space<vmem>>, vector<1x128x128xbf16>
    %41 = vector.shape_cast %40 : vector<1x128x128xbf16> to vector<128x128xbf16>
    %cst_16 = arith.constant dense<0.000000e+00> : vector<64x128xf32>
    %42 = tpu.matmul %39, %41, %cst_16 {dimension_numbers = #tpu.dot_dimension_numbers<[1], [0], [0], [1], [0, 0, 1, 1], [], []>} : vector<64x128xbf16>, vector<128x128xbf16>, vector<64x128xf32> -> vector<64x128xf32>
    %c4 = arith.constant 4 : index
    %c0_17 = arith.constant 0 : index
    %43 = vector.load %arg3[%c4, %c0_17] : memref<72x128xf32, #tpu.memory_space<vmem>>, vector<1x128xf32>
    %44 = vector.broadcast %43 : vector<1x128xf32> to vector<64x128xf32>
    %45 = arith.mulf %42, %44 : vector<64x128xf32>
    %c5 = arith.constant 5 : index
    %c0_18 = arith.constant 0 : index
    %46 = vector.load %arg3[%c5, %c0_18] : memref<72x128xf32, #tpu.memory_space<vmem>>, vector<1x128xf32>
    %47 = vector.broadcast %46 : vector<1x128xf32> to vector<64x128xf32>
    %48 = arith.addf %45, %47 : vector<64x128xf32>
    %cst_19 = arith.constant 0.000000e+00 : f32
    %49 = vector.broadcast %cst_19 : f32 to vector<64x128xf32>
    %50 = arith.maximumf %48, %49 : vector<64x128xf32>
    %c0_20 = arith.constant 0 : index
    %c0_21 = arith.constant 0 : index
    %51 = vector.load %arg7[%c0_20, %c0_21] : memref<576x64xbf16, #tpu.memory_space<vmem>>, vector<576x64xbf16>
    %52 = arith.truncf %50 : vector<64x128xf32> to vector<64x128xbf16>
    %cst_22 = arith.constant dense<0.000000e+00> : vector<576x128xf32>
    %53 = tpu.matmul %51, %52, %cst_22 {dimension_numbers = #tpu.dot_dimension_numbers<[1], [0], [0], [1], [0, 0, 1, 1], [], []>} : vector<576x64xbf16>, vector<64x128xbf16>, vector<576x128xf32> -> vector<576x128xf32>
    %c6 = arith.constant 6 : index
    %c0_23 = arith.constant 0 : index
    %54 = vector.load %arg3[%c6, %c0_23] : memref<72x128xf32, #tpu.memory_space<vmem>>, vector<1x128xf32>
    %55 = vector.shape_cast %54 : vector<1x128xf32> to vector<1x128xf32>
    %56 = vector.broadcast %55 : vector<1x128xf32> to vector<64x128xf32>
    %57 = vector.extract_strided_slice %53 {offsets = [0, 0], sizes = [64, 128], strides = [1, 1]} : vector<576x128xf32> to vector<64x128xf32>
    %c8 = arith.constant 8 : index
    %c0_24 = arith.constant 0 : index
    %58 = vector.load %arg3[%c8, %c0_24] : memref<72x128xf32, #tpu.memory_space<vmem>>, vector<1x128xf32>
    %59 = vector.broadcast %58 : vector<1x128xf32> to vector<64x128xf32>
    %60 = arith.mulf %57, %59 : vector<64x128xf32>
    %61 = arith.addf %56, %60 : vector<64x128xf32>
    %62 = vector.extract_strided_slice %53 {offsets = [64, 0], sizes = [64, 128], strides = [1, 1]} : vector<576x128xf32> to vector<64x128xf32>
    %c9 = arith.constant 9 : index
    %c0_25 = arith.constant 0 : index
    %63 = vector.load %arg3[%c9, %c0_25] : memref<72x128xf32, #tpu.memory_space<vmem>>, vector<1x128xf32>
    %64 = vector.broadcast %63 : vector<1x128xf32> to vector<64x128xf32>
    %65 = arith.mulf %62, %64 : vector<64x128xf32>
    %66 = arith.addf %61, %65 : vector<64x128xf32>
    %67 = vector.extract_strided_slice %53 {offsets = [128, 0], sizes = [64, 128], strides = [1, 1]} : vector<576x128xf32> to vector<64x128xf32>
    %c10 = arith.constant 10 : index
    %c0_26 = arith.constant 0 : index
    %68 = vector.load %arg3[%c10, %c0_26] : memref<72x128xf32, #tpu.memory_space<vmem>>, vector<1x128xf32>
    %69 = vector.broadcast %68 : vector<1x128xf32> to vector<64x128xf32>
    %70 = arith.mulf %67, %69 : vector<64x128xf32>
    %71 = arith.addf %66, %70 : vector<64x128xf32>
    %72 = vector.extract_strided_slice %53 {offsets = [192, 0], sizes = [64, 128], strides = [1, 1]} : vector<576x128xf32> to vector<64x128xf32>
    %c11 = arith.constant 11 : index
    %c0_27 = arith.constant 0 : index
    %73 = vector.load %arg3[%c11, %c0_27] : memref<72x128xf32, #tpu.memory_space<vmem>>, vector<1x128xf32>
    %74 = vector.broadcast %73 : vector<1x128xf32> to vector<64x128xf32>
    %75 = arith.mulf %72, %74 : vector<64x128xf32>
    %76 = arith.addf %71, %75 : vector<64x128xf32>
    %77 = vector.extract_strided_slice %53 {offsets = [256, 0], sizes = [64, 128], strides = [1, 1]} : vector<576x128xf32> to vector<64x128xf32>
    %c12 = arith.constant 12 : index
    %c0_28 = arith.constant 0 : index
    %78 = vector.load %arg3[%c12, %c0_28] : memref<72x128xf32, #tpu.memory_space<vmem>>, vector<1x128xf32>
    %79 = vector.broadcast %78 : vector<1x128xf32> to vector<64x128xf32>
    %80 = arith.mulf %77, %79 : vector<64x128xf32>
    %81 = arith.addf %76, %80 : vector<64x128xf32>
    %82 = vector.extract_strided_slice %53 {offsets = [320, 0], sizes = [64, 128], strides = [1, 1]} : vector<576x128xf32> to vector<64x128xf32>
    %c13 = arith.constant 13 : index
    %c0_29 = arith.constant 0 : index
    %83 = vector.load %arg3[%c13, %c0_29] : memref<72x128xf32, #tpu.memory_space<vmem>>, vector<1x128xf32>
    %84 = vector.broadcast %83 : vector<1x128xf32> to vector<64x128xf32>
    %85 = arith.mulf %82, %84 : vector<64x128xf32>
    %86 = arith.addf %81, %85 : vector<64x128xf32>
    %87 = vector.extract_strided_slice %53 {offsets = [384, 0], sizes = [64, 128], strides = [1, 1]} : vector<576x128xf32> to vector<64x128xf32>
    %c14 = arith.constant 14 : index
    %c0_30 = arith.constant 0 : index
    %88 = vector.load %arg3[%c14, %c0_30] : memref<72x128xf32, #tpu.memory_space<vmem>>, vector<1x128xf32>
    %89 = vector.broadcast %88 : vector<1x128xf32> to vector<64x128xf32>
    %90 = arith.mulf %87, %89 : vector<64x128xf32>
    %91 = arith.addf %86, %90 : vector<64x128xf32>
    %92 = vector.extract_strided_slice %53 {offsets = [448, 0], sizes = [64, 128], strides = [1, 1]} : vector<576x128xf32> to vector<64x128xf32>
    %c15 = arith.constant 15 : index
    %c0_31 = arith.constant 0 : index
    %93 = vector.load %arg3[%c15, %c0_31] : memref<72x128xf32, #tpu.memory_space<vmem>>, vector<1x128xf32>
    %94 = vector.broadcast %93 : vector<1x128xf32> to vector<64x128xf32>
    %95 = arith.mulf %92, %94 : vector<64x128xf32>
    %96 = arith.addf %91, %95 : vector<64x128xf32>
    %97 = vector.extract_strided_slice %53 {offsets = [512, 0], sizes = [64, 128], strides = [1, 1]} : vector<576x128xf32> to vector<64x128xf32>
    %c16 = arith.constant 16 : index
    %c0_32 = arith.constant 0 : index
    %98 = vector.load %arg3[%c16, %c0_32] : memref<72x128xf32, #tpu.memory_space<vmem>>, vector<1x128xf32>
    %99 = vector.broadcast %98 : vector<1x128xf32> to vector<64x128xf32>
    %100 = arith.mulf %97, %99 : vector<64x128xf32>
    %101 = arith.addf %96, %100 : vector<64x128xf32>
    %102 = arith.truncf %101 : vector<64x128xf32> to vector<64x128xbf16>
    %c1_33 = arith.constant 1 : index
    %c0_34 = arith.constant 0 : index
    %c0_35 = arith.constant 0 : index
    %103 = vector.load %arg4[%c1_33, %c0_34, %c0_35] : memref<9x128x128xbf16, #tpu.memory_space<vmem>>, vector<1x128x128xbf16>
    %104 = vector.shape_cast %103 : vector<1x128x128xbf16> to vector<128x128xbf16>
    %cst_36 = arith.constant dense<0.000000e+00> : vector<64x128xf32>
    %105 = tpu.matmul %102, %104, %cst_36 {dimension_numbers = #tpu.dot_dimension_numbers<[1], [0], [0], [1], [0, 0, 1, 1], [], []>} : vector<64x128xbf16>, vector<128x128xbf16>, vector<64x128xf32> -> vector<64x128xf32>
    %c7 = arith.constant 7 : index
    %c0_37 = arith.constant 0 : index
    %106 = vector.load %arg3[%c7, %c0_37] : memref<72x128xf32, #tpu.memory_space<vmem>>, vector<1x128xf32>
    %107 = vector.broadcast %106 : vector<1x128xf32> to vector<64x128xf32>
    %108 = arith.addf %105, %107 : vector<64x128xf32>
    %109 = arith.addf %30, %108 : vector<64x128xf32>
    %c17 = arith.constant 17 : index
    %c0_38 = arith.constant 0 : index
    %110 = vector.load %arg3[%c17, %c0_38] : memref<72x128xf32, #tpu.memory_space<vmem>>, vector<1x128xf32>
    %111 = vector.broadcast %110 : vector<1x128xf32> to vector<64x128xf32>
    %112 = arith.mulf %109, %111 : vector<64x128xf32>
    %c18 = arith.constant 18 : index
    %c0_39 = arith.constant 0 : index
    %113 = vector.load %arg3[%c18, %c0_39] : memref<72x128xf32, #tpu.memory_space<vmem>>, vector<1x128xf32>
    %114 = vector.broadcast %113 : vector<1x128xf32> to vector<64x128xf32>
    %115 = arith.addf %112, %114 : vector<64x128xf32>
    %cst_40 = arith.constant 0.000000e+00 : f32
    %116 = vector.broadcast %cst_40 : f32 to vector<64x128xf32>
    %117 = arith.maximumf %115, %116 : vector<64x128xf32>
    %118 = arith.truncf %117 : vector<64x128xf32> to vector<64x128xbf16>
    %c2_41 = arith.constant 2 : index
    %c0_42 = arith.constant 0 : index
    %c0_43 = arith.constant 0 : index
    %119 = vector.load %arg4[%c2_41, %c0_42, %c0_43] : memref<9x128x128xbf16, #tpu.memory_space<vmem>>, vector<1x128x128xbf16>
    %120 = vector.shape_cast %119 : vector<1x128x128xbf16> to vector<128x128xbf16>
    %cst_44 = arith.constant dense<0.000000e+00> : vector<64x128xf32>
    %121 = tpu.matmul %118, %120, %cst_44 {dimension_numbers = #tpu.dot_dimension_numbers<[1], [0], [0], [1], [0, 0, 1, 1], [], []>} : vector<64x128xbf16>, vector<128x128xbf16>, vector<64x128xf32> -> vector<64x128xf32>
    %c19 = arith.constant 19 : index
    %c0_45 = arith.constant 0 : index
    %122 = vector.load %arg3[%c19, %c0_45] : memref<72x128xf32, #tpu.memory_space<vmem>>, vector<1x128xf32>
    %123 = vector.broadcast %122 : vector<1x128xf32> to vector<64x128xf32>
    %124 = arith.mulf %121, %123 : vector<64x128xf32>
    %c20 = arith.constant 20 : index
    %c0_46 = arith.constant 0 : index
    %125 = vector.load %arg3[%c20, %c0_46] : memref<72x128xf32, #tpu.memory_space<vmem>>, vector<1x128xf32>
    %126 = vector.broadcast %125 : vector<1x128xf32> to vector<64x128xf32>
    %127 = arith.addf %124, %126 : vector<64x128xf32>
    %cst_47 = arith.constant 0.000000e+00 : f32
    %128 = vector.broadcast %cst_47 : f32 to vector<64x128xf32>
    %129 = arith.maximumf %127, %128 : vector<64x128xf32>
    %c0_48 = arith.constant 0 : index
    %c0_49 = arith.constant 0 : index
    %130 = vector.load %arg7[%c0_48, %c0_49] : memref<576x64xbf16, #tpu.memory_space<vmem>>, vector<576x64xbf16>
    %131 = arith.truncf %129 : vector<64x128xf32> to vector<64x128xbf16>
    %cst_50 = arith.constant dense<0.000000e+00> : vector<576x128xf32>
    %132 = tpu.matmul %130, %131, %cst_50 {dimension_numbers = #tpu.dot_dimension_numbers<[1], [0], [0], [1], [0, 0, 1, 1], [], []>} : vector<576x64xbf16>, vector<64x128xbf16>, vector<576x128xf32> -> vector<576x128xf32>
    %c21 = arith.constant 21 : index
    %c0_51 = arith.constant 0 : index
    %133 = vector.load %arg3[%c21, %c0_51] : memref<72x128xf32, #tpu.memory_space<vmem>>, vector<1x128xf32>
    %134 = vector.shape_cast %133 : vector<1x128xf32> to vector<1x128xf32>
    %135 = vector.broadcast %134 : vector<1x128xf32> to vector<64x128xf32>
    %136 = vector.extract_strided_slice %132 {offsets = [0, 0], sizes = [64, 128], strides = [1, 1]} : vector<576x128xf32> to vector<64x128xf32>
    %c23 = arith.constant 23 : index
    %c0_52 = arith.constant 0 : index
    %137 = vector.load %arg3[%c23, %c0_52] : memref<72x128xf32, #tpu.memory_space<vmem>>, vector<1x128xf32>
    %138 = vector.broadcast %137 : vector<1x128xf32> to vector<64x128xf32>
    %139 = arith.mulf %136, %138 : vector<64x128xf32>
    %140 = arith.addf %135, %139 : vector<64x128xf32>
    %141 = vector.extract_strided_slice %132 {offsets = [64, 0], sizes = [64, 128], strides = [1, 1]} : vector<576x128xf32> to vector<64x128xf32>
    %c24 = arith.constant 24 : index
    %c0_53 = arith.constant 0 : index
    %142 = vector.load %arg3[%c24, %c0_53] : memref<72x128xf32, #tpu.memory_space<vmem>>, vector<1x128xf32>
    %143 = vector.broadcast %142 : vector<1x128xf32> to vector<64x128xf32>
    %144 = arith.mulf %141, %143 : vector<64x128xf32>
    %145 = arith.addf %140, %144 : vector<64x128xf32>
    %146 = vector.extract_strided_slice %132 {offsets = [128, 0], sizes = [64, 128], strides = [1, 1]} : vector<576x128xf32> to vector<64x128xf32>
    %c25 = arith.constant 25 : index
    %c0_54 = arith.constant 0 : index
    %147 = vector.load %arg3[%c25, %c0_54] : memref<72x128xf32, #tpu.memory_space<vmem>>, vector<1x128xf32>
    %148 = vector.broadcast %147 : vector<1x128xf32> to vector<64x128xf32>
    %149 = arith.mulf %146, %148 : vector<64x128xf32>
    %150 = arith.addf %145, %149 : vector<64x128xf32>
    %151 = vector.extract_strided_slice %132 {offsets = [192, 0], sizes = [64, 128], strides = [1, 1]} : vector<576x128xf32> to vector<64x128xf32>
    %c26 = arith.constant 26 : index
    %c0_55 = arith.constant 0 : index
    %152 = vector.load %arg3[%c26, %c0_55] : memref<72x128xf32, #tpu.memory_space<vmem>>, vector<1x128xf32>
    %153 = vector.broadcast %152 : vector<1x128xf32> to vector<64x128xf32>
    %154 = arith.mulf %151, %153 : vector<64x128xf32>
    %155 = arith.addf %150, %154 : vector<64x128xf32>
    %156 = vector.extract_strided_slice %132 {offsets = [256, 0], sizes = [64, 128], strides = [1, 1]} : vector<576x128xf32> to vector<64x128xf32>
    %c27 = arith.constant 27 : index
    %c0_56 = arith.constant 0 : index
    %157 = vector.load %arg3[%c27, %c0_56] : memref<72x128xf32, #tpu.memory_space<vmem>>, vector<1x128xf32>
    %158 = vector.broadcast %157 : vector<1x128xf32> to vector<64x128xf32>
    %159 = arith.mulf %156, %158 : vector<64x128xf32>
    %160 = arith.addf %155, %159 : vector<64x128xf32>
    %161 = vector.extract_strided_slice %132 {offsets = [320, 0], sizes = [64, 128], strides = [1, 1]} : vector<576x128xf32> to vector<64x128xf32>
    %c28 = arith.constant 28 : index
    %c0_57 = arith.constant 0 : index
    %162 = vector.load %arg3[%c28, %c0_57] : memref<72x128xf32, #tpu.memory_space<vmem>>, vector<1x128xf32>
    %163 = vector.broadcast %162 : vector<1x128xf32> to vector<64x128xf32>
    %164 = arith.mulf %161, %163 : vector<64x128xf32>
    %165 = arith.addf %160, %164 : vector<64x128xf32>
    %166 = vector.extract_strided_slice %132 {offsets = [384, 0], sizes = [64, 128], strides = [1, 1]} : vector<576x128xf32> to vector<64x128xf32>
    %c29 = arith.constant 29 : index
    %c0_58 = arith.constant 0 : index
    %167 = vector.load %arg3[%c29, %c0_58] : memref<72x128xf32, #tpu.memory_space<vmem>>, vector<1x128xf32>
    %168 = vector.broadcast %167 : vector<1x128xf32> to vector<64x128xf32>
    %169 = arith.mulf %166, %168 : vector<64x128xf32>
    %170 = arith.addf %165, %169 : vector<64x128xf32>
    %171 = vector.extract_strided_slice %132 {offsets = [448, 0], sizes = [64, 128], strides = [1, 1]} : vector<576x128xf32> to vector<64x128xf32>
    %c30 = arith.constant 30 : index
    %c0_59 = arith.constant 0 : index
    %172 = vector.load %arg3[%c30, %c0_59] : memref<72x128xf32, #tpu.memory_space<vmem>>, vector<1x128xf32>
    %173 = vector.broadcast %172 : vector<1x128xf32> to vector<64x128xf32>
    %174 = arith.mulf %171, %173 : vector<64x128xf32>
    %175 = arith.addf %170, %174 : vector<64x128xf32>
    %176 = vector.extract_strided_slice %132 {offsets = [512, 0], sizes = [64, 128], strides = [1, 1]} : vector<576x128xf32> to vector<64x128xf32>
    %c31 = arith.constant 31 : index
    %c0_60 = arith.constant 0 : index
    %177 = vector.load %arg3[%c31, %c0_60] : memref<72x128xf32, #tpu.memory_space<vmem>>, vector<1x128xf32>
    %178 = vector.broadcast %177 : vector<1x128xf32> to vector<64x128xf32>
    %179 = arith.mulf %176, %178 : vector<64x128xf32>
    %180 = arith.addf %175, %179 : vector<64x128xf32>
    %181 = arith.truncf %180 : vector<64x128xf32> to vector<64x128xbf16>
    %c3_61 = arith.constant 3 : index
    %c0_62 = arith.constant 0 : index
    %c0_63 = arith.constant 0 : index
    %182 = vector.load %arg4[%c3_61, %c0_62, %c0_63] : memref<9x128x128xbf16, #tpu.memory_space<vmem>>, vector<1x128x128xbf16>
    %183 = vector.shape_cast %182 : vector<1x128x128xbf16> to vector<128x128xbf16>
    %cst_64 = arith.constant dense<0.000000e+00> : vector<64x128xf32>
    %184 = tpu.matmul %181, %183, %cst_64 {dimension_numbers = #tpu.dot_dimension_numbers<[1], [0], [0], [1], [0, 0, 1, 1], [], []>} : vector<64x128xbf16>, vector<128x128xbf16>, vector<64x128xf32> -> vector<64x128xf32>
    %c22 = arith.constant 22 : index
    %c0_65 = arith.constant 0 : index
    %185 = vector.load %arg3[%c22, %c0_65] : memref<72x128xf32, #tpu.memory_space<vmem>>, vector<1x128xf32>
    %186 = vector.broadcast %185 : vector<1x128xf32> to vector<64x128xf32>
    %187 = arith.addf %184, %186 : vector<64x128xf32>
    %188 = arith.addf %109, %187 : vector<64x128xf32>
    %c62 = arith.constant 62 : index
    %c0_66 = arith.constant 0 : index
    %189 = vector.load %arg3[%c62, %c0_66] : memref<72x128xf32, #tpu.memory_space<vmem>>, vector<1x128xf32>
    %190 = vector.broadcast %189 : vector<1x128xf32> to vector<64x128xf32>
    %191 = arith.mulf %188, %190 : vector<64x128xf32>
    %c63 = arith.constant 63 : index
    %c0_67 = arith.constant 0 : index
    %192 = vector.load %arg3[%c63, %c0_67] : memref<72x128xf32, #tpu.memory_space<vmem>>, vector<1x128xf32>
    %193 = vector.broadcast %192 : vector<1x128xf32> to vector<64x128xf32>
    %194 = arith.addf %191, %193 : vector<64x128xf32>
    %cst_68 = arith.constant 0.000000e+00 : f32
    %195 = vector.broadcast %cst_68 : f32 to vector<64x128xf32>
    %196 = arith.maximumf %194, %195 : vector<64x128xf32>
    %197 = arith.truncf %196 : vector<64x128xf32> to vector<64x128xbf16>
    %c8_69 = arith.constant 8 : index
    %c0_70 = arith.constant 0 : index
    %c0_71 = arith.constant 0 : index
    %198 = vector.load %arg4[%c8_69, %c0_70, %c0_71] : memref<9x128x128xbf16, #tpu.memory_space<vmem>>, vector<1x128x128xbf16>
    %199 = vector.shape_cast %198 : vector<1x128x128xbf16> to vector<128x128xbf16>
    %cst_72 = arith.constant dense<0.000000e+00> : vector<64x128xf32>
    %200 = tpu.matmul %197, %199, %cst_72 {dimension_numbers = #tpu.dot_dimension_numbers<[1], [0], [0], [1], [0, 0, 1, 1], [], []>} : vector<64x128xbf16>, vector<128x128xbf16>, vector<64x128xf32> -> vector<64x128xf32>
    %c0_73 = arith.constant 0 : index
    %c0_74 = arith.constant 0 : index
    %201 = vector.load %arg8[%c0_73, %c0_74] : memref<16x64xf32, #tpu.memory_space<vmem>>, vector<16x64xf32>
    %cst_75 = arith.constant dense<0.000000e+00> : vector<16x128xf32>
    %202 = tpu.matmul %201, %200, %cst_75 {dimension_numbers = #tpu.dot_dimension_numbers<[1], [0], [0], [1], [0, 0, 1, 1], [], []>} : vector<16x64xf32>, vector<64x128xf32>, vector<16x128xf32> -> vector<16x128xf32>
    %c32 = arith.constant 32 : index
    %c0_76 = arith.constant 0 : index
    %203 = vector.load %arg3[%c32, %c0_76] : memref<72x128xf32, #tpu.memory_space<vmem>>, vector<1x128xf32>
    %204 = vector.broadcast %203 : vector<1x128xf32> to vector<16x128xf32>
    %205 = arith.mulf %202, %204 : vector<16x128xf32>
    %c33 = arith.constant 33 : index
    %c0_77 = arith.constant 0 : index
    %206 = vector.load %arg3[%c33, %c0_77] : memref<72x128xf32, #tpu.memory_space<vmem>>, vector<1x128xf32>
    %207 = vector.broadcast %206 : vector<1x128xf32> to vector<16x128xf32>
    %208 = arith.addf %205, %207 : vector<16x128xf32>
    %cst_78 = arith.constant 0.000000e+00 : f32
    %209 = vector.broadcast %cst_78 : f32 to vector<16x128xf32>
    %210 = arith.maximumf %208, %209 : vector<16x128xf32>
    %211 = arith.truncf %210 : vector<16x128xf32> to vector<16x128xbf16>
    %c4_79 = arith.constant 4 : index
    %c0_80 = arith.constant 0 : index
    %c0_81 = arith.constant 0 : index
    %212 = vector.load %arg4[%c4_79, %c0_80, %c0_81] : memref<9x128x128xbf16, #tpu.memory_space<vmem>>, vector<1x128x128xbf16>
    %213 = vector.shape_cast %212 : vector<1x128x128xbf16> to vector<128x128xbf16>
    %cst_82 = arith.constant dense<0.000000e+00> : vector<16x128xf32>
    %214 = tpu.matmul %211, %213, %cst_82 {dimension_numbers = #tpu.dot_dimension_numbers<[1], [0], [0], [1], [0, 0, 1, 1], [], []>} : vector<16x128xbf16>, vector<128x128xbf16>, vector<16x128xf32> -> vector<16x128xf32>
    %c34 = arith.constant 34 : index
    %c0_83 = arith.constant 0 : index
    %215 = vector.load %arg3[%c34, %c0_83] : memref<72x128xf32, #tpu.memory_space<vmem>>, vector<1x128xf32>
    %216 = vector.broadcast %215 : vector<1x128xf32> to vector<16x128xf32>
    %217 = arith.mulf %214, %216 : vector<16x128xf32>
    %c35 = arith.constant 35 : index
    %c0_84 = arith.constant 0 : index
    %218 = vector.load %arg3[%c35, %c0_84] : memref<72x128xf32, #tpu.memory_space<vmem>>, vector<1x128xf32>
    %219 = vector.broadcast %218 : vector<1x128xf32> to vector<16x128xf32>
    %220 = arith.addf %217, %219 : vector<16x128xf32>
    %cst_85 = arith.constant 0.000000e+00 : f32
    %221 = vector.broadcast %cst_85 : f32 to vector<16x128xf32>
    %222 = arith.maximumf %220, %221 : vector<16x128xf32>
    %c0_86 = arith.constant 0 : index
    %c0_87 = arith.constant 0 : index
    %223 = vector.load %arg9[%c0_86, %c0_87] : memref<144x16xf32, #tpu.memory_space<vmem>>, vector<144x16xf32>
    %cst_88 = arith.constant dense<0.000000e+00> : vector<144x128xf32>
    %224 = tpu.matmul %223, %222, %cst_88 {dimension_numbers = #tpu.dot_dimension_numbers<[1], [0], [0], [1], [0, 0, 1, 1], [], []>} : vector<144x16xf32>, vector<16x128xf32>, vector<144x128xf32> -> vector<144x128xf32>
    %c36 = arith.constant 36 : index
    %c0_89 = arith.constant 0 : index
    %225 = vector.load %arg3[%c36, %c0_89] : memref<72x128xf32, #tpu.memory_space<vmem>>, vector<1x128xf32>
    %226 = vector.shape_cast %225 : vector<1x128xf32> to vector<1x128xf32>
    %227 = vector.broadcast %226 : vector<1x128xf32> to vector<16x128xf32>
    %228 = vector.extract_strided_slice %224 {offsets = [0, 0], sizes = [16, 128], strides = [1, 1]} : vector<144x128xf32> to vector<16x128xf32>
    %c38 = arith.constant 38 : index
    %c0_90 = arith.constant 0 : index
    %229 = vector.load %arg3[%c38, %c0_90] : memref<72x128xf32, #tpu.memory_space<vmem>>, vector<1x128xf32>
    %230 = vector.broadcast %229 : vector<1x128xf32> to vector<16x128xf32>
    %231 = arith.mulf %228, %230 : vector<16x128xf32>
    %232 = arith.addf %227, %231 : vector<16x128xf32>
    %233 = vector.extract_strided_slice %224 {offsets = [16, 0], sizes = [16, 128], strides = [1, 1]} : vector<144x128xf32> to vector<16x128xf32>
    %c39 = arith.constant 39 : index
    %c0_91 = arith.constant 0 : index
    %234 = vector.load %arg3[%c39, %c0_91] : memref<72x128xf32, #tpu.memory_space<vmem>>, vector<1x128xf32>
    %235 = vector.broadcast %234 : vector<1x128xf32> to vector<16x128xf32>
    %236 = arith.mulf %233, %235 : vector<16x128xf32>
    %237 = arith.addf %232, %236 : vector<16x128xf32>
    %238 = vector.extract_strided_slice %224 {offsets = [32, 0], sizes = [16, 128], strides = [1, 1]} : vector<144x128xf32> to vector<16x128xf32>
    %c40 = arith.constant 40 : index
    %c0_92 = arith.constant 0 : index
    %239 = vector.load %arg3[%c40, %c0_92] : memref<72x128xf32, #tpu.memory_space<vmem>>, vector<1x128xf32>
    %240 = vector.broadcast %239 : vector<1x128xf32> to vector<16x128xf32>
    %241 = arith.mulf %238, %240 : vector<16x128xf32>
    %242 = arith.addf %237, %241 : vector<16x128xf32>
    %243 = vector.extract_strided_slice %224 {offsets = [48, 0], sizes = [16, 128], strides = [1, 1]} : vector<144x128xf32> to vector<16x128xf32>
    %c41 = arith.constant 41 : index
    %c0_93 = arith.constant 0 : index
    %244 = vector.load %arg3[%c41, %c0_93] : memref<72x128xf32, #tpu.memory_space<vmem>>, vector<1x128xf32>
    %245 = vector.broadcast %244 : vector<1x128xf32> to vector<16x128xf32>
    %246 = arith.mulf %243, %245 : vector<16x128xf32>
    %247 = arith.addf %242, %246 : vector<16x128xf32>
    %248 = vector.extract_strided_slice %224 {offsets = [64, 0], sizes = [16, 128], strides = [1, 1]} : vector<144x128xf32> to vector<16x128xf32>
    %c42 = arith.constant 42 : index
    %c0_94 = arith.constant 0 : index
    %249 = vector.load %arg3[%c42, %c0_94] : memref<72x128xf32, #tpu.memory_space<vmem>>, vector<1x128xf32>
    %250 = vector.broadcast %249 : vector<1x128xf32> to vector<16x128xf32>
    %251 = arith.mulf %248, %250 : vector<16x128xf32>
    %252 = arith.addf %247, %251 : vector<16x128xf32>
    %253 = vector.extract_strided_slice %224 {offsets = [80, 0], sizes = [16, 128], strides = [1, 1]} : vector<144x128xf32> to vector<16x128xf32>
    %c43 = arith.constant 43 : index
    %c0_95 = arith.constant 0 : index
    %254 = vector.load %arg3[%c43, %c0_95] : memref<72x128xf32, #tpu.memory_space<vmem>>, vector<1x128xf32>
    %255 = vector.broadcast %254 : vector<1x128xf32> to vector<16x128xf32>
    %256 = arith.mulf %253, %255 : vector<16x128xf32>
    %257 = arith.addf %252, %256 : vector<16x128xf32>
    %258 = vector.extract_strided_slice %224 {offsets = [96, 0], sizes = [16, 128], strides = [1, 1]} : vector<144x128xf32> to vector<16x128xf32>
    %c44 = arith.constant 44 : index
    %c0_96 = arith.constant 0 : index
    %259 = vector.load %arg3[%c44, %c0_96] : memref<72x128xf32, #tpu.memory_space<vmem>>, vector<1x128xf32>
    %260 = vector.broadcast %259 : vector<1x128xf32> to vector<16x128xf32>
    %261 = arith.mulf %258, %260 : vector<16x128xf32>
    %262 = arith.addf %257, %261 : vector<16x128xf32>
    %263 = vector.extract_strided_slice %224 {offsets = [112, 0], sizes = [16, 128], strides = [1, 1]} : vector<144x128xf32> to vector<16x128xf32>
    %c45 = arith.constant 45 : index
    %c0_97 = arith.constant 0 : index
    %264 = vector.load %arg3[%c45, %c0_97] : memref<72x128xf32, #tpu.memory_space<vmem>>, vector<1x128xf32>
    %265 = vector.broadcast %264 : vector<1x128xf32> to vector<16x128xf32>
    %266 = arith.mulf %263, %265 : vector<16x128xf32>
    %267 = arith.addf %262, %266 : vector<16x128xf32>
    %268 = vector.extract_strided_slice %224 {offsets = [128, 0], sizes = [16, 128], strides = [1, 1]} : vector<144x128xf32> to vector<16x128xf32>
    %c46 = arith.constant 46 : index
    %c0_98 = arith.constant 0 : index
    %269 = vector.load %arg3[%c46, %c0_98] : memref<72x128xf32, #tpu.memory_space<vmem>>, vector<1x128xf32>
    %270 = vector.broadcast %269 : vector<1x128xf32> to vector<16x128xf32>
    %271 = arith.mulf %268, %270 : vector<16x128xf32>
    %272 = arith.addf %267, %271 : vector<16x128xf32>
    %273 = arith.truncf %272 : vector<16x128xf32> to vector<16x128xbf16>
    %c5_99 = arith.constant 5 : index
    %c0_100 = arith.constant 0 : index
    %c0_101 = arith.constant 0 : index
    %274 = vector.load %arg4[%c5_99, %c0_100, %c0_101] : memref<9x128x128xbf16, #tpu.memory_space<vmem>>, vector<1x128x128xbf16>
    %275 = vector.shape_cast %274 : vector<1x128x128xbf16> to vector<128x128xbf16>
    %cst_102 = arith.constant dense<0.000000e+00> : vector<16x128xf32>
    %276 = tpu.matmul %273, %275, %cst_102 {dimension_numbers = #tpu.dot_dimension_numbers<[1], [0], [0], [1], [0, 0, 1, 1], [], []>} : vector<16x128xbf16>, vector<128x128xbf16>, vector<16x128xf32> -> vector<16x128xf32>
    %c37 = arith.constant 37 : index
    %c0_103 = arith.constant 0 : index
    %277 = vector.load %arg3[%c37, %c0_103] : memref<72x128xf32, #tpu.memory_space<vmem>>, vector<1x128xf32>
    %278 = vector.broadcast %277 : vector<1x128xf32> to vector<16x128xf32>
    %279 = arith.addf %276, %278 : vector<16x128xf32>
    %280 = arith.addf %202, %279 : vector<16x128xf32>
    %c47 = arith.constant 47 : index
    %c0_104 = arith.constant 0 : index
    %281 = vector.load %arg3[%c47, %c0_104] : memref<72x128xf32, #tpu.memory_space<vmem>>, vector<1x128xf32>
    %282 = vector.broadcast %281 : vector<1x128xf32> to vector<16x128xf32>
    %283 = arith.mulf %280, %282 : vector<16x128xf32>
    %c48 = arith.constant 48 : index
    %c0_105 = arith.constant 0 : index
    %284 = vector.load %arg3[%c48, %c0_105] : memref<72x128xf32, #tpu.memory_space<vmem>>, vector<1x128xf32>
    %285 = vector.broadcast %284 : vector<1x128xf32> to vector<16x128xf32>
    %286 = arith.addf %283, %285 : vector<16x128xf32>
    %cst_106 = arith.constant 0.000000e+00 : f32
    %287 = vector.broadcast %cst_106 : f32 to vector<16x128xf32>
    %288 = arith.maximumf %286, %287 : vector<16x128xf32>
    %289 = arith.truncf %288 : vector<16x128xf32> to vector<16x128xbf16>
    %c6_107 = arith.constant 6 : index
    %c0_108 = arith.constant 0 : index
    %c0_109 = arith.constant 0 : index
    %290 = vector.load %arg4[%c6_107, %c0_108, %c0_109] : memref<9x128x128xbf16, #tpu.memory_space<vmem>>, vector<1x128x128xbf16>
    %291 = vector.shape_cast %290 : vector<1x128x128xbf16> to vector<128x128xbf16>
    %cst_110 = arith.constant dense<0.000000e+00> : vector<16x128xf32>
    %292 = tpu.matmul %289, %291, %cst_110 {dimension_numbers = #tpu.dot_dimension_numbers<[1], [0], [0], [1], [0, 0, 1, 1], [], []>} : vector<16x128xbf16>, vector<128x128xbf16>, vector<16x128xf32> -> vector<16x128xf32>
    %c49 = arith.constant 49 : index
    %c0_111 = arith.constant 0 : index
    %293 = vector.load %arg3[%c49, %c0_111] : memref<72x128xf32, #tpu.memory_space<vmem>>, vector<1x128xf32>
    %294 = vector.broadcast %293 : vector<1x128xf32> to vector<16x128xf32>
    %295 = arith.mulf %292, %294 : vector<16x128xf32>
    %c50 = arith.constant 50 : index
    %c0_112 = arith.constant 0 : index
    %296 = vector.load %arg3[%c50, %c0_112] : memref<72x128xf32, #tpu.memory_space<vmem>>, vector<1x128xf32>
    %297 = vector.broadcast %296 : vector<1x128xf32> to vector<16x128xf32>
    %298 = arith.addf %295, %297 : vector<16x128xf32>
    %cst_113 = arith.constant 0.000000e+00 : f32
    %299 = vector.broadcast %cst_113 : f32 to vector<16x128xf32>
    %300 = arith.maximumf %298, %299 : vector<16x128xf32>
    %c0_114 = arith.constant 0 : index
    %c0_115 = arith.constant 0 : index
    %301 = vector.load %arg9[%c0_114, %c0_115] : memref<144x16xf32, #tpu.memory_space<vmem>>, vector<144x16xf32>
    %cst_116 = arith.constant dense<0.000000e+00> : vector<144x128xf32>
    %302 = tpu.matmul %301, %300, %cst_116 {dimension_numbers = #tpu.dot_dimension_numbers<[1], [0], [0], [1], [0, 0, 1, 1], [], []>} : vector<144x16xf32>, vector<16x128xf32>, vector<144x128xf32> -> vector<144x128xf32>
    %c51 = arith.constant 51 : index
    %c0_117 = arith.constant 0 : index
    %303 = vector.load %arg3[%c51, %c0_117] : memref<72x128xf32, #tpu.memory_space<vmem>>, vector<1x128xf32>
    %304 = vector.shape_cast %303 : vector<1x128xf32> to vector<1x128xf32>
    %305 = vector.broadcast %304 : vector<1x128xf32> to vector<16x128xf32>
    %306 = vector.extract_strided_slice %302 {offsets = [0, 0], sizes = [16, 128], strides = [1, 1]} : vector<144x128xf32> to vector<16x128xf32>
    %c53 = arith.constant 53 : index
    %c0_118 = arith.constant 0 : index
    %307 = vector.load %arg3[%c53, %c0_118] : memref<72x128xf32, #tpu.memory_space<vmem>>, vector<1x128xf32>
    %308 = vector.broadcast %307 : vector<1x128xf32> to vector<16x128xf32>
    %309 = arith.mulf %306, %308 : vector<16x128xf32>
    %310 = arith.addf %305, %309 : vector<16x128xf32>
    %311 = vector.extract_strided_slice %302 {offsets = [16, 0], sizes = [16, 128], strides = [1, 1]} : vector<144x128xf32> to vector<16x128xf32>
    %c54 = arith.constant 54 : index
    %c0_119 = arith.constant 0 : index
    %312 = vector.load %arg3[%c54, %c0_119] : memref<72x128xf32, #tpu.memory_space<vmem>>, vector<1x128xf32>
    %313 = vector.broadcast %312 : vector<1x128xf32> to vector<16x128xf32>
    %314 = arith.mulf %311, %313 : vector<16x128xf32>
    %315 = arith.addf %310, %314 : vector<16x128xf32>
    %316 = vector.extract_strided_slice %302 {offsets = [32, 0], sizes = [16, 128], strides = [1, 1]} : vector<144x128xf32> to vector<16x128xf32>
    %c55 = arith.constant 55 : index
    %c0_120 = arith.constant 0 : index
    %317 = vector.load %arg3[%c55, %c0_120] : memref<72x128xf32, #tpu.memory_space<vmem>>, vector<1x128xf32>
    %318 = vector.broadcast %317 : vector<1x128xf32> to vector<16x128xf32>
    %319 = arith.mulf %316, %318 : vector<16x128xf32>
    %320 = arith.addf %315, %319 : vector<16x128xf32>
    %321 = vector.extract_strided_slice %302 {offsets = [48, 0], sizes = [16, 128], strides = [1, 1]} : vector<144x128xf32> to vector<16x128xf32>
    %c56 = arith.constant 56 : index
    %c0_121 = arith.constant 0 : index
    %322 = vector.load %arg3[%c56, %c0_121] : memref<72x128xf32, #tpu.memory_space<vmem>>, vector<1x128xf32>
    %323 = vector.broadcast %322 : vector<1x128xf32> to vector<16x128xf32>
    %324 = arith.mulf %321, %323 : vector<16x128xf32>
    %325 = arith.addf %320, %324 : vector<16x128xf32>
    %326 = vector.extract_strided_slice %302 {offsets = [64, 0], sizes = [16, 128], strides = [1, 1]} : vector<144x128xf32> to vector<16x128xf32>
    %c57 = arith.constant 57 : index
    %c0_122 = arith.constant 0 : index
    %327 = vector.load %arg3[%c57, %c0_122] : memref<72x128xf32, #tpu.memory_space<vmem>>, vector<1x128xf32>
    %328 = vector.broadcast %327 : vector<1x128xf32> to vector<16x128xf32>
    %329 = arith.mulf %326, %328 : vector<16x128xf32>
    %330 = arith.addf %325, %329 : vector<16x128xf32>
    %331 = vector.extract_strided_slice %302 {offsets = [80, 0], sizes = [16, 128], strides = [1, 1]} : vector<144x128xf32> to vector<16x128xf32>
    %c58 = arith.constant 58 : index
    %c0_123 = arith.constant 0 : index
    %332 = vector.load %arg3[%c58, %c0_123] : memref<72x128xf32, #tpu.memory_space<vmem>>, vector<1x128xf32>
    %333 = vector.broadcast %332 : vector<1x128xf32> to vector<16x128xf32>
    %334 = arith.mulf %331, %333 : vector<16x128xf32>
    %335 = arith.addf %330, %334 : vector<16x128xf32>
    %336 = vector.extract_strided_slice %302 {offsets = [96, 0], sizes = [16, 128], strides = [1, 1]} : vector<144x128xf32> to vector<16x128xf32>
    %c59 = arith.constant 59 : index
    %c0_124 = arith.constant 0 : index
    %337 = vector.load %arg3[%c59, %c0_124] : memref<72x128xf32, #tpu.memory_space<vmem>>, vector<1x128xf32>
    %338 = vector.broadcast %337 : vector<1x128xf32> to vector<16x128xf32>
    %339 = arith.mulf %336, %338 : vector<16x128xf32>
    %340 = arith.addf %335, %339 : vector<16x128xf32>
    %341 = vector.extract_strided_slice %302 {offsets = [112, 0], sizes = [16, 128], strides = [1, 1]} : vector<144x128xf32> to vector<16x128xf32>
    %c60 = arith.constant 60 : index
    %c0_125 = arith.constant 0 : index
    %342 = vector.load %arg3[%c60, %c0_125] : memref<72x128xf32, #tpu.memory_space<vmem>>, vector<1x128xf32>
    %343 = vector.broadcast %342 : vector<1x128xf32> to vector<16x128xf32>
    %344 = arith.mulf %341, %343 : vector<16x128xf32>
    %345 = arith.addf %340, %344 : vector<16x128xf32>
    %346 = vector.extract_strided_slice %302 {offsets = [128, 0], sizes = [16, 128], strides = [1, 1]} : vector<144x128xf32> to vector<16x128xf32>
    %c61 = arith.constant 61 : index
    %c0_126 = arith.constant 0 : index
    %347 = vector.load %arg3[%c61, %c0_126] : memref<72x128xf32, #tpu.memory_space<vmem>>, vector<1x128xf32>
    %348 = vector.broadcast %347 : vector<1x128xf32> to vector<16x128xf32>
    %349 = arith.mulf %346, %348 : vector<16x128xf32>
    %350 = arith.addf %345, %349 : vector<16x128xf32>
    %351 = arith.truncf %350 : vector<16x128xf32> to vector<16x128xbf16>
    %c7_127 = arith.constant 7 : index
    %c0_128 = arith.constant 0 : index
    %c0_129 = arith.constant 0 : index
    %352 = vector.load %arg4[%c7_127, %c0_128, %c0_129] : memref<9x128x128xbf16, #tpu.memory_space<vmem>>, vector<1x128x128xbf16>
    %353 = vector.shape_cast %352 : vector<1x128x128xbf16> to vector<128x128xbf16>
    %cst_130 = arith.constant dense<0.000000e+00> : vector<16x128xf32>
    %354 = tpu.matmul %351, %353, %cst_130 {dimension_numbers = #tpu.dot_dimension_numbers<[1], [0], [0], [1], [0, 0, 1, 1], [], []>} : vector<16x128xbf16>, vector<128x128xbf16>, vector<16x128xf32> -> vector<16x128xf32>
    %c52 = arith.constant 52 : index
    %c0_131 = arith.constant 0 : index
    %355 = vector.load %arg3[%c52, %c0_131] : memref<72x128xf32, #tpu.memory_space<vmem>>, vector<1x128xf32>
    %356 = vector.broadcast %355 : vector<1x128xf32> to vector<16x128xf32>
    %357 = arith.addf %354, %356 : vector<16x128xf32>
    %358 = arith.addf %280, %357 : vector<16x128xf32>
    %c64 = arith.constant 64 : index
    %c0_132 = arith.constant 0 : index
    %359 = vector.load %arg3[%c64, %c0_132] : memref<72x128xf32, #tpu.memory_space<vmem>>, vector<1x128xf32>
    %360 = vector.broadcast %359 : vector<1x128xf32> to vector<16x128xf32>
    %361 = arith.mulf %358, %360 : vector<16x128xf32>
    %c65 = arith.constant 65 : index
    %c0_133 = arith.constant 0 : index
    %362 = vector.load %arg3[%c65, %c0_133] : memref<72x128xf32, #tpu.memory_space<vmem>>, vector<1x128xf32>
    %363 = vector.broadcast %362 : vector<1x128xf32> to vector<16x128xf32>
    %364 = arith.addf %361, %363 : vector<16x128xf32>
    %cst_134 = arith.constant dense<0xFF800000> : vector<128xf32>
    %365 = vector.multi_reduction <maximumf>, %364, %cst_134 [0] : vector<16x128xf32> to vector<128xf32>
    %366 = vector.shape_cast %365 : vector<128xf32> to vector<1x128xf32>
    %cst_135 = arith.constant dense<0.000000e+00> : vector<128xf32>
    %367 = vector.multi_reduction <add>, %364, %cst_135 [0] : vector<16x128xf32> to vector<128xf32>
    %368 = vector.shape_cast %367 : vector<128xf32> to vector<1x128xf32>
    %cst_136 = arith.constant 6.250000e-02 : f32
    %369 = vector.broadcast %cst_136 : f32 to vector<1x128xf32>
    %370 = arith.mulf %368, %369 : vector<1x128xf32>
    %c0_137 = arith.constant 0 : index
    %c0_138 = arith.constant 0 : index
    %c0_139 = arith.constant 0 : index
    %371 = vector.load %arg5[%c0_137, %c0_138, %c0_139] : memref<5x128x128xf32, #tpu.memory_space<vmem>>, vector<1x128x128xf32>
    %372 = vector.shape_cast %371 : vector<1x128x128xf32> to vector<128x128xf32>
    %cst_140 = arith.constant dense<0.000000e+00> : vector<1x128xf32>
    %373 = tpu.matmul %366, %372, %cst_140 {dimension_numbers = #tpu.dot_dimension_numbers<[1], [0], [0], [1], [0, 0, 1, 1], [], []>} : vector<1x128xf32>, vector<128x128xf32>, vector<1x128xf32> -> vector<1x128xf32>
    %cst_141 = arith.constant 0.000000e+00 : f32
    %374 = vector.broadcast %cst_141 : f32 to vector<1x128xf32>
    %375 = arith.maximumf %373, %374 : vector<1x128xf32>
    %c1_142 = arith.constant 1 : index
    %c0_143 = arith.constant 0 : index
    %c0_144 = arith.constant 0 : index
    %376 = vector.load %arg5[%c1_142, %c0_143, %c0_144] : memref<5x128x128xf32, #tpu.memory_space<vmem>>, vector<1x128x128xf32>
    %377 = vector.shape_cast %376 : vector<1x128x128xf32> to vector<128x128xf32>
    %cst_145 = arith.constant dense<0.000000e+00> : vector<1x128xf32>
    %378 = tpu.matmul %375, %377, %cst_145 {dimension_numbers = #tpu.dot_dimension_numbers<[1], [0], [0], [1], [0, 0, 1, 1], [], []>} : vector<1x128xf32>, vector<128x128xf32>, vector<1x128xf32> -> vector<1x128xf32>
    %379 = arith.negf %378 : vector<1x128xf32>
    %380 = math.exp %379 : vector<1x128xf32>
    %cst_146 = arith.constant 1.000000e+00 : f32
    %381 = vector.broadcast %cst_146 : f32 to vector<1x128xf32>
    %382 = arith.addf %381, %380 : vector<1x128xf32>
    %383 = arith.divf %381, %382 : vector<1x128xf32>
    %c2_147 = arith.constant 2 : index
    %c0_148 = arith.constant 0 : index
    %c0_149 = arith.constant 0 : index
    %384 = vector.load %arg5[%c2_147, %c0_148, %c0_149] : memref<5x128x128xf32, #tpu.memory_space<vmem>>, vector<1x128x128xf32>
    %385 = vector.shape_cast %384 : vector<1x128x128xf32> to vector<128x128xf32>
    %cst_150 = arith.constant dense<0.000000e+00> : vector<1x128xf32>
    %386 = tpu.matmul %370, %385, %cst_150 {dimension_numbers = #tpu.dot_dimension_numbers<[1], [0], [0], [1], [0, 0, 1, 1], [], []>} : vector<1x128xf32>, vector<128x128xf32>, vector<1x128xf32> -> vector<1x128xf32>
    %cst_151 = arith.constant 0.000000e+00 : f32
    %387 = vector.broadcast %cst_151 : f32 to vector<1x128xf32>
    %388 = arith.maximumf %386, %387 : vector<1x128xf32>
    %c3_152 = arith.constant 3 : index
    %c0_153 = arith.constant 0 : index
    %c0_154 = arith.constant 0 : index
    %389 = vector.load %arg5[%c3_152, %c0_153, %c0_154] : memref<5x128x128xf32, #tpu.memory_space<vmem>>, vector<1x128x128xf32>
    %390 = vector.shape_cast %389 : vector<1x128x128xf32> to vector<128x128xf32>
    %cst_155 = arith.constant dense<0.000000e+00> : vector<1x128xf32>
    %391 = tpu.matmul %388, %390, %cst_155 {dimension_numbers = #tpu.dot_dimension_numbers<[1], [0], [0], [1], [0, 0, 1, 1], [], []>} : vector<1x128xf32>, vector<128x128xf32>, vector<1x128xf32> -> vector<1x128xf32>
    %392 = arith.negf %391 : vector<1x128xf32>
    %393 = math.exp %392 : vector<1x128xf32>
    %cst_156 = arith.constant 1.000000e+00 : f32
    %394 = vector.broadcast %cst_156 : f32 to vector<1x128xf32>
    %395 = arith.addf %394, %393 : vector<1x128xf32>
    %396 = arith.divf %394, %395 : vector<1x128xf32>
    %397 = arith.addf %383, %396 : vector<1x128xf32>
    %398 = arith.negf %397 : vector<1x128xf32>
    %399 = math.exp %398 : vector<1x128xf32>
    %cst_157 = arith.constant 1.000000e+00 : f32
    %400 = vector.broadcast %cst_157 : f32 to vector<1x128xf32>
    %401 = arith.addf %400, %399 : vector<1x128xf32>
    %402 = arith.divf %400, %401 : vector<1x128xf32>
    %403 = vector.broadcast %402 : vector<1x128xf32> to vector<16x128xf32>
    %404 = arith.mulf %364, %403 : vector<16x128xf32>
    %c66 = arith.constant 66 : index
    %c0_158 = arith.constant 0 : index
    %405 = vector.load %arg3[%c66, %c0_158] : memref<72x128xf32, #tpu.memory_space<vmem>>, vector<1x128xf32>
    %406 = vector.broadcast %405 : vector<1x128xf32> to vector<16x128xf32>
    %407 = arith.addf %404, %406 : vector<16x128xf32>
    %cst_159 = arith.constant dense<0xFF800000> : vector<16xf32>
    %408 = vector.multi_reduction <maximumf>, %407, %cst_159 [1] : vector<16x128xf32> to vector<16xf32>
    %409 = vector.shape_cast %408 : vector<16xf32> to vector<16x1xf32>
    %cst_160 = arith.constant dense<0.000000e+00> : vector<16xf32>
    %410 = vector.multi_reduction <add>, %404, %cst_160 [1] : vector<16x128xf32> to vector<16xf32>
    %411 = vector.shape_cast %410 : vector<16xf32> to vector<16x1xf32>
    %c67 = arith.constant 67 : index
    %c0_161 = arith.constant 0 : index
    %412 = vector.load %arg3[%c67, %c0_161] : memref<72x128xf32, #tpu.memory_space<vmem>>, vector<1x1xf32>
    %c0_162 = arith.constant 0 : index
    %c0_163 = arith.constant 0 : index
    %413 = vector.load %arg10[%c0_162, %c0_163] : memref<32x16xf32, #tpu.memory_space<vmem>>, vector<16x16xf32>
    %cst_164 = arith.constant dense<0.000000e+00> : vector<16x1xf32>
    %414 = tpu.matmul %413, %409, %cst_164 {dimension_numbers = #tpu.dot_dimension_numbers<[1], [0], [0], [1], [0, 0, 1, 1], [], []>} : vector<16x16xf32>, vector<16x1xf32>, vector<16x1xf32> -> vector<16x1xf32>
    %c16_165 = arith.constant 16 : index
    %c0_166 = arith.constant 0 : index
    %415 = vector.load %arg10[%c16_165, %c0_166] : memref<32x16xf32, #tpu.memory_space<vmem>>, vector<16x16xf32>
    %cst_167 = arith.constant dense<0.000000e+00> : vector<16x1xf32>
    %416 = tpu.matmul %415, %411, %cst_167 {dimension_numbers = #tpu.dot_dimension_numbers<[1], [0], [0], [1], [0, 0, 1, 1], [], []>} : vector<16x16xf32>, vector<16x1xf32>, vector<16x1xf32> -> vector<16x1xf32>
    %417 = arith.addf %414, %416 : vector<16x1xf32>
    %418 = vector.broadcast %412 : vector<1x1xf32> to vector<16x1xf32>
    %419 = arith.addf %417, %418 : vector<16x1xf32>
    %420 = arith.negf %419 : vector<16x1xf32>
    %421 = math.exp %420 : vector<16x1xf32>
    %cst_168 = arith.constant 1.000000e+00 : f32
    %422 = vector.broadcast %cst_168 : f32 to vector<16x1xf32>
    %423 = arith.addf %422, %421 : vector<16x1xf32>
    %424 = arith.divf %422, %423 : vector<16x1xf32>
    %425 = vector.broadcast %424 : vector<16x1xf32> to vector<16x128xf32>
    %426 = arith.mulf %425, %404 : vector<16x128xf32>
    %cst_169 = arith.constant 0.000000e+00 : f32
    %427 = vector.broadcast %cst_169 : f32 to vector<16x128xf32>
    %428 = arith.maximumf %426, %427 : vector<16x128xf32>
    %cst_170 = arith.constant dense<0.000000e+00> : vector<128xf32>
    %429 = vector.multi_reduction <add>, %428, %cst_170 [0] : vector<16x128xf32> to vector<128xf32>
    %430 = vector.shape_cast %429 : vector<128xf32> to vector<1x128xf32>
    %cst_171 = arith.constant 6.250000e-02 : f32
    %431 = vector.broadcast %cst_171 : f32 to vector<1x128xf32>
    %432 = arith.mulf %430, %431 : vector<1x128xf32>
    %c4_172 = arith.constant 4 : index
    %c0_173 = arith.constant 0 : index
    %c0_174 = arith.constant 0 : index
    %433 = vector.load %arg5[%c4_172, %c0_173, %c0_174] : memref<5x128x128xf32, #tpu.memory_space<vmem>>, vector<1x128x128xf32>
    %434 = vector.shape_cast %433 : vector<1x128x128xf32> to vector<128x128xf32>
    %cst_175 = arith.constant dense<0.000000e+00> : vector<1x128xf32>
    %435 = tpu.matmul %432, %434, %cst_175 {dimension_numbers = #tpu.dot_dimension_numbers<[1], [0], [0], [1], [0, 0, 1, 1], [], []>} : vector<1x128xf32>, vector<128x128xf32>, vector<1x128xf32> -> vector<1x128xf32>
    %436 = vector.shape_cast %435 : vector<1x128xf32> to vector<1x128xf32>
    %437 = vector.broadcast %436 : vector<1x128xf32> to vector<8x128xf32>
    %c0_176 = arith.constant 0 : index
    %c0_177 = arith.constant 0 : index
    %438 = vector.load %arg11[%c0_176, %c0_177] : memref<8x128xf32, #tpu.memory_space<vmem>>, vector<8x128xf32>
    tpu.vector_store %arg11[%c0_176, %c0_177], %437 {strides = array<i32>} : memref<8x128xf32, #tpu.memory_space<vmem>>, vector<8x128xf32>,
    return
  }
  func.func @transform_0(%arg0: i32) -> (i32, i32) {
    %c0_i32 = arith.constant 0 : i32
    %c0_i32_0 = arith.constant 0 : i32
    return %arg0, %c0_i32 : i32, i32
  }
  func.func @transform_1(%arg0: i32) -> (i32, i32) {
    %c0_i32 = arith.constant 0 : i32
    %c0_i32_0 = arith.constant 0 : i32
    %c0_i32_1 = arith.constant 0 : i32
    return %c0_i32, %c0_i32_0 : i32, i32
  }
  func.func @transform_2(%arg0: i32) -> (i32, i32) {
    %c0_i32 = arith.constant 0 : i32
    %c0_i32_0 = arith.constant 0 : i32
    %c0_i32_1 = arith.constant 0 : i32
    return %c0_i32, %c0_i32_0 : i32, i32
  }
  func.func @transform_3(%arg0: i32) -> (i32, i32, i32) {
    %c0_i32 = arith.constant 0 : i32
    %c0_i32_0 = arith.constant 0 : i32
    %c0_i32_1 = arith.constant 0 : i32
    %c0_i32_2 = arith.constant 0 : i32
    return %c0_i32, %c0_i32_0, %c0_i32_1 : i32, i32, i32
  }
  func.func @transform_4(%arg0: i32) -> (i32, i32, i32) {
    %c0_i32 = arith.constant 0 : i32
    %c0_i32_0 = arith.constant 0 : i32
    %c0_i32_1 = arith.constant 0 : i32
    %c0_i32_2 = arith.constant 0 : i32
    return %c0_i32, %c0_i32_0, %c0_i32_1 : i32, i32, i32
  }
  func.func @transform_5(%arg0: i32) -> (i32, i32) {
    %c0_i32 = arith.constant 0 : i32
    %c0_i32_0 = arith.constant 0 : i32
    %c0_i32_1 = arith.constant 0 : i32
    return %c0_i32, %c0_i32_0 : i32, i32
  }
  func.func @transform_6(%arg0: i32) -> (i32, i32) {
    %c0_i32 = arith.constant 0 : i32
    %c0_i32_0 = arith.constant 0 : i32
    %c0_i32_1 = arith.constant 0 : i32
    return %c0_i32, %c0_i32_0 : i32, i32
  }
  func.func @transform_7(%arg0: i32) -> (i32, i32) {
    %c0_i32 = arith.constant 0 : i32
    %c0_i32_0 = arith.constant 0 : i32
    %c0_i32_1 = arith.constant 0 : i32
    return %c0_i32, %c0_i32_0 : i32, i32
  }
  func.func @transform_8(%arg0: i32) -> (i32, i32) {
    %c0_i32 = arith.constant 0 : i32
    %c0_i32_0 = arith.constant 0 : i32
    %c0_i32_1 = arith.constant 0 : i32
    return %c0_i32, %c0_i32_0 : i32, i32
  }
  func.func @transform_9(%arg0: i32) -> (i32, i32) {
    %c0_i32 = arith.constant 0 : i32
    %c0_i32_0 = arith.constant 0 : i32
    %c0_i32_1 = arith.constant 0 : i32
    return %c0_i32, %c0_i32_0 : i32, i32
  }
  func.func @transform_10(%arg0: i32) -> (i32, i32) {
    %c0_i32 = arith.constant 0 : i32
    %c0_i32_0 = arith.constant 0 : i32
    return %arg0, %c0_i32 : i32, i32
  }
}

</mosaic_0001>

<bundles_post_ra>
// kernel: _lambda_.1
= control target key start
LH: loop header
LB: loop body
LE: loop exit
PB: predicated region body
PF: predicated region fallthrough
CT: control target
= control target key end

     0   :  { %s8021_s13 = smov 0   ;;  %s10172_s0 = inlined_call_operand.vmem [shape: bf16[512,256], index: 0, kind: input, shape index: {}]   ;;  %s10173_s1 = inlined_call_operand.vmem [shape: bf16[256,128], index: 1, kind: input, shape index: {}]   ;;  %s10174_s2 = inlined_call_operand.vmem [shape: f32[72,128], index: 2, kind: input, shape index: {}]   ;;  %s10175_s3 = inlined_call_operand.vmem [shape: bf16[9,128,128], index: 3, kind: input, shape index: {}]   ;;  %s10176_s4 = inlined_call_operand.vmem [shape: f32[5,128,128], index: 4, kind: input, shape index: {}]   ;;  %s10177_s5 = inlined_call_operand.vmem [shape: bf16[576,256], index: 5, kind: input, shape index: {}]   ;;  %s10178_s6 = inlined_call_operand.vmem [shape: bf16[576,64], index: 6, kind: input, shape index: {}]   ;;  %s10179_s7 = inlined_call_operand.vmem [shape: f32[16,64], index: 7, kind: input, shape index: {}]   ;;  %s10180_s8 = inlined_call_operand.vmem [shape: f32[144,16], index: 8, kind: input, shape index: {}]   ;;  %s10181_s9 = inlined_call_operand.vmem [shape: f32[32,16], index: 9, kind: input, shape index: {}]   ;;  %s10182_s10 = inlined_call_operand.vmem [shape: f32[16,128], index: 10, kind: output, shape index: {}]  }
   0x1 LB: > { %s8027_s14 = sadd.s32 4294967295, %s7961_s13   ;;  %p5966_p0 = scmp.ge.s32.totalorder %s7961_s13, 1  ;;  %s7961_s13 = sphi %s8021_s13, %s20_s13  }
   0x2   : > { %p314_p1 = scmp.lt.s32.totalorder %s7961_s13, 3 }
   0x4   : > { %p315_p2 = pnand %p5966_p0, %p314_p1 }
   0x6   : > { %318 = sbr.rel (%p315_p2) target bundleno = 5374 (0x14fe), region = 60 }
   0xb   : > { %v7655_v0 = vld [vmem:[%s10173_s1 + $0x78] sm:$0xff]   ;;  %s5967_s17 = sshll.u32 %s8027_s14, 5  ;;  %v7657_v2 = vld [vmem:[%s10173_s1 + $0x70] sm:$0xff]   ;;  %v7659_v4 = vld [vmem:[%s10173_s1 + $0x68] sm:$0xff]   ;;  %v7963_v48 = vmov 0   ;;  %vm2241_vm0 = vcmask 523264  }
   0xc   : > { %v7656_v1 = vld [vmem:[%s10173_s1 + $0x38] sm:$0xff]   ;;  %6581 = vmatprep.subr.bf16.mxu0 %v7655_v0  ;;  %v7658_v3 = vld [vmem:[%s10173_s1 + $0x30] sm:$0xff]   ;;  %p353_p3 = scmp.lt.s32.totalorder %s5967_s17, 63  ;;  %v7660_v5 = vld [vmem:[%s10173_s1 + $0x28] sm:$0xff]   ;;  %1399 = vmatprep.subr.bf16.mxu1 %v7963_v48  ;;  %vm7965_vm1 = vmmov 0   ;;  %vm4288_vm2 = vcmask 130048  }
   0xd   : > { %6582 = vmatpush3.bf16.msra.mxu0 %v7656_v1  ;;  %v7661_v6 = vld [vmem:[%s10173_s1 + $0x60] sm:$0xff]   ;;  %v7663_v8 = vld [vmem:[%s10173_s1 + $0x58] sm:$0xff]   ;;  %v7665_v10 = vld [vmem:[%s10173_s1 + $0x50] sm:$0xff]   ;;  %7654 = vset.pattern.permute.xlu1 %v7963_v48  ;;  %p359_p4 = scmp.lt.s32.totalorder %s8027_s14, 1 }
   0xe   : > { %6583 = vmatprep.subr.bf16.mxu0 %v7657_v2  ;;  %s10324_s17 = smov (!%p353_p3, %s5967_s17), 63  ;;  %v7662_v7 = vld [vmem:[%s10173_s1 + $0x20] sm:$0xff]   ;;  %v7664_v9 = vld [vmem:[%s10173_s1 + $0x18] sm:$0xff]   ;;  %v7666_v12 = vld [vmem:[%s10173_s1 + $0x10] sm:$0xff]   ;;  %7653 = vset.pattern.permute.xlu0 %v7963_v48 }
   0xf   : > { %s6580_s12 = sshll.u32 %s10324_s17, 3  ;;  %v7667_v13 = vld [vmem:[%s10173_s1 + $0x48] sm:$0xff]   ;;  %v7669_v15 = vld [vmem:[%s10173_s1 + $0x40] sm:$0xff]   ;;  %s10326_s14 = smov (!%p359_p4, %s8027_s14), 1 }
  0x10   : > { %s8062_s20 = scalar_lea.vmem %s10172_s0, %s6580_s12  ;;  %v7668_v14 = vld [vmem:[%s10173_s1 + $0x8] sm:$0xff]   ;;  %v7670_v16 = vld [vmem:[%s10173_s1] sm:$0xff]   ;;  %s5970_s19 = sshll.u32 %s10326_s14, 3 }
  0x11   : > { %6584 = vmatpush3.bf16.msra.mxu0 %v7658_v3  ;;  %v7673_v11 = vld [vmem:[%s8062_s20 + $0x4] ss:$8 sps:$4 sm:$0xff]   ;;  %v7671_v17 = vld [vmem:[%s8062_s20] ss:$8 sps:$4 sm:$0xff]   ;;  %v7674_v18 = vld [vmem:[%s8062_s20 + $0x14] ss:$8 sps:$4 sm:$0xff]   ;;  %s362_s22 = scalar_lea.vmem %s10182_s10, %s5970_s19 }
  0x12   : > { %6585 = vmatprep.subr.bf16.mxu0 %v7659_v4  ;;  %716 = vmatprep.mubr.bf16.mxu0 %v7673_v11  ;;  %v7676_v19 = vld [vmem:[%s8062_s20 + $0x10] ss:$8 sps:$4 sm:$0xff]   ;;  %v7677_v20 = vld [vmem:[%s8062_s20 + $0x24] ss:$8 sps:$4 sm:$0xff]   ;;  %v7679_v21 = vld [vmem:[%s8062_s20 + $0x20] ss:$8 sps:$4 sm:$0xff]  }
  0x13   : > { %v7680_v22 = vld [vmem:[%s8062_s20 + $0x34] ss:$8 sps:$4 sm:$0xff]   ;;  %v7682_v23 = vld [vmem:[%s8062_s20 + $0x30] ss:$8 sps:$4 sm:$0xff]   ;;  %v7683_v24 = vld [vmem:[%s8062_s20 + $0x44] ss:$8 sps:$4 sm:$0xff]  }
  0x14   : > { %v7685_v25 = vld [vmem:[%s8062_s20 + $0x40] ss:$8 sps:$4 sm:$0xff]   ;;  %v7686_v26 = vld [vmem:[%s8062_s20 + $0x54] ss:$8 sps:$4 sm:$0xff]   ;;  %v7688_v27 = vld [vmem:[%s8062_s20 + $0x50] ss:$8 sps:$4 sm:$0xff]  }
  0x15   : > { %6586 = vmatpush3.bf16.msra.mxu0 %v7660_v5  ;;  %v7689_v28 = vld [vmem:[%s8062_s20 + $0x64] ss:$8 sps:$4 sm:$0xff]   ;;  %v7691_v29 = vld [vmem:[%s8062_s20 + $0x60] ss:$8 sps:$4 sm:$0xff]   ;;  %v7692_v30 = vld [vmem:[%s8062_s20 + $0x74] ss:$8 sps:$4 sm:$0xff]  }
  0x16   : > { %6587 = vmatprep.subr.bf16.mxu0 %v7661_v6  ;;  %v7694_v31 = vld [vmem:[%s8062_s20 + $0x70] ss:$8 sps:$4 sm:$0xff]   ;;  %v7695_v32 = vld [vmem:[%s8062_s20 + $0x84] ss:$8 sps:$4 sm:$0xff]   ;;  %v7697_v33 = vld [vmem:[%s8062_s20 + $0x80] ss:$8 sps:$4 sm:$0xff]  }
  0x17   : > { %v7698_v34 = vld [vmem:[%s8062_s20 + $0x94] ss:$8 sps:$4 sm:$0xff]   ;;  %v7700_v35 = vld [vmem:[%s8062_s20 + $0x90] ss:$8 sps:$4 sm:$0xff]   ;;  %v7701_v36 = vld [vmem:[%s8062_s20 + $0xa4] ss:$8 sps:$4 sm:$0xff]  }
  0x18   : > { %v7703_v37 = vld [vmem:[%s8062_s20 + $0xa0] ss:$8 sps:$4 sm:$0xff]   ;;  %v7704_v38 = vld [vmem:[%s8062_s20 + $0xb4] ss:$8 sps:$4 sm:$0xff]   ;;  %v7706_v39 = vld [vmem:[%s8062_s20 + $0xb0] ss:$8 sps:$4 sm:$0xff]  }
  0x19   : > { %6588 = vmatpush3.bf16.msra.mxu0 %v7662_v7  ;;  %v7707_v40 = vld [vmem:[%s8062_s20 + $0xc4] ss:$8 sps:$4 sm:$0xff]   ;;  %v7709_v41 = vld [vmem:[%s8062_s20 + $0xc0] ss:$8 sps:$4 sm:$0xff]   ;;  %v7710_v42 = vld [vmem:[%s8062_s20 + $0xd4] ss:$8 sps:$4 sm:$0xff]  }
  0x1a   : > { %6589 = vmatprep.subr.bf16.mxu0 %v7663_v8  ;;  %v7712_v43 = vld [vmem:[%s8062_s20 + $0xd0] ss:$8 sps:$4 sm:$0xff]   ;;  %v7713_v44 = vld [vmem:[%s8062_s20 + $0xe4] ss:$8 sps:$4 sm:$0xff]   ;;  %v7715_v45 = vld [vmem:[%s8062_s20 + $0xe0] ss:$8 sps:$4 sm:$0xff]  }
  0x1b   : > { %v7716_v46 = vld [vmem:[%s8062_s20 + $0xf4] ss:$8 sps:$4 sm:$0xff]   ;;  %v7718_v47 = vld [vmem:[%s8062_s20 + $0xf0] ss:$8 sps:$4 sm:$0xff]   ;;  %v8123_v51 = vld [vmem:[%s10174_s2] ss:$0 sm:$0xff] }
  0x1c   : > { %v8129_v55 = vld [vmem:[%s10174_s2 + $0x1] ss:$0 sm:$0xff] }
  0x1d   : > { %6590 = vmatpush3.bf16.msra.mxu0 %v7664_v9 }
  0x1e   : > { %6591 = vmatprep.subr.bf16.mxu0 %v7665_v10 }
  0x21   : > { %6592 = vmatpush3.bf16.msra.mxu0 %v7666_v12 }
  0x22   : > { %6593 = vmatprep.subr.bf16.mxu0 %v7667_v13 }
  0x25   : > { %6594 = vmatpush3.bf16.msra.mxu0 %v7668_v14 }
  0x26   : > { %6595 = vmatprep.subr.bf16.mxu0 %v7669_v15 }
  0x29   : > { %6596 = vmatpush3.bf16.msra.mxu0 %v7670_v16 }
  0x2c   : > { %717 = vmatmul.mubr.bf16.vlgmr.msra.gmra.mxu0 %v7671_v17 }
  0x2d   : > { %724 = vmatprep.mubr.bf16.mxu0 %v7674_v18 }
  0x34   : > { %725 = vmatmul.mubr.bf16.gmra.mxu0 %v7676_v19 }
  0x35   : > { %732 = vmatprep.mubr.bf16.mxu0 %v7677_v20 }
  0x3c   : > { %733 = vmatmul.mubr.bf16.gmra.mxu0 %v7679_v21 }
  0x3d   : > { %740 = vmatprep.mubr.bf16.mxu0 %v7680_v22 }
  0x44   : > { %741 = vmatmul.mubr.bf16.gmra.mxu0 %v7682_v23 }
  0x45   : > { %748 = vmatprep.mubr.bf16.mxu0 %v7683_v24 }
  0x4c   : > { %749 = vmatmul.mubr.bf16.gmra.mxu0 %v7685_v25  ;;  %v7721_v25 = vld [vmem:[%s10177_s5 + $0x4] ss:$8 sps:$4 sm:$0xff]  }
  0x4d   : > { %756 = vmatprep.mubr.bf16.mxu0 %v7686_v26  ;;  %1431 = vmatprep.mubr.bf16.mxu1 %v7721_v25 }
  0x54   : > { %757 = vmatmul.mubr.bf16.gmra.mxu0 %v7688_v27 }
  0x55   : > { %764 = vmatprep.mubr.bf16.mxu0 %v7689_v28 }
  0x5c   : > { %765 = vmatmul.mubr.bf16.gmra.mxu0 %v7691_v29 }
  0x5d   : > { %772 = vmatprep.mubr.bf16.mxu0 %v7692_v30 }
  0x64   : > { %773 = vmatmul.mubr.bf16.gmra.mxu0 %v7694_v31 }
  0x65   : > { %780 = vmatprep.mubr.bf16.mxu0 %v7695_v32 }
  0x6c   : > { %781 = vmatmul.mubr.bf16.gmra.mxu0 %v7697_v33 }
  0x6d   : > { %788 = vmatprep.mubr.bf16.mxu0 %v7698_v34 }
  0x74   : > { %789 = vmatmul.mubr.bf16.gmra.mxu0 %v7700_v35 }
  0x75   : > { %796 = vmatprep.mubr.bf16.mxu0 %v7701_v36 }
  0x7c   : > { %797 = vmatmul.mubr.bf16.gmra.mxu0 %v7703_v37 }
  0x7d   : > { %804 = vmatprep.mubr.bf16.mxu0 %v7704_v38 }
  0x84   : > { %805 = vmatmul.mubr.bf16.gmra.mxu0 %v7706_v39 }
  0x85   : > { %812 = vmatprep.mubr.bf16.mxu0 %v7707_v40 }
  0x8c   : > { %813 = vmatmul.mubr.bf16.gmra.mxu0 %v7709_v41 }
  0x8d   : > { %820 = vmatprep.mubr.bf16.mxu0 %v7710_v42 }
  0x94   : > { %821 = vmatmul.mubr.bf16.gmra.mxu0 %v7712_v43 }
  0x95   : > { %828 = vmatprep.mubr.bf16.mxu0 %v7713_v44 }
  0x9c   : > { %829 = vmatmul.mubr.bf16.gmra.mxu0 %v7715_v45 }
  0x9d   : > { %836 = vmatprep.mubr.bf16.mxu0 %v7716_v46 }
  0xa4   : > { %837 = vmatmul.mubr.bf16.gmra.mxu0 %v7718_v47 }
  0xec   : > { %v6597_v49 = vpop.f32.mrf.mxu0 }
  0xee   : > { %v6598_v50 = vpop.f32.mrf.mxu0 }
  0xef   : > { %v6599_v52 = vadd.f32 %v6598_v50, %v6597_v49 }
  0xf0   : > { %v6600_v53 = vpop.f32.mrf.mxu0 }
  0xf1   : > { %v850_v54 = vmul.f32 %v6599_v52, %v8123_v51 }
  0xf2   : > { %v6601_v56 = vpop.f32.mrf.mxu0 }
  0xf3   : > { %v6602_v57 = vadd.f32 %v6601_v56, %v6600_v53  ;;  %v887_v59 = vadd.f32 %v8129_v55, %v850_v54 }
  0xf4   : > { %v6603_v58 = vpop.f32.mrf.mxu0 }
  0xf5   : > { %v851_v60 = vmul.f32 %v6602_v57, %v8123_v51  ;;  %v919_v1 = vmax.f32 %v887_v59, 0.0 }
  0xf6   : > { %v6604_v61 = vpop.f32.mrf.mxu0 }
  0xf7   : > { %v888_v62 = vadd.f32 %v8129_v55, %v851_v60  ;;  %v6605_v63 = vadd.f32 %v6604_v61, %v6603_v58 }
  0xf8   : > { %v6606_v0 = vpop.f32.mrf.mxu0 }
  0xf9   : > { %v852_v2 = vmul.f32 %v6605_v63, %v8123_v51  ;;  %v920_v3 = vmax.f32 %v888_v62, 0.0 }
  0xfa   : > { %v6607_v4 = vpop.f32.mrf.mxu0 }
  0xfb   : > { %v6608_v5 = vadd.f32 %v6607_v4, %v6606_v0  ;;  %v8135_v6 = vpack.c.bf16 %v920_v3, %v919_v1  ;;  %v889_v8 = vadd.f32 %v8129_v55, %v852_v2 }
  0xfc   : > { %v6609_v7 = vpop.f32.mrf.mxu0 }
  0xfd   : > { %v853_v9 = vmul.f32 %v6608_v5, %v8123_v51  ;;  %v921_v14 = vmax.f32 %v889_v8, 0.0 }
  0xfe   : > { %v6610_v10 = vpop.f32.mrf.mxu0 }
  0xff   : > { %v890_v11 = vadd.f32 %v8129_v55, %v853_v9  ;;  %v8140_v12 = vadd.f32 %v6610_v10, %v6609_v7 }
 0x100   : > { %v8142_v13 = vpop.f32.mrf.mxu0 }
 0x101   : > { %v922_v15 = vmax.f32 %v890_v11, 0.0 }
 0x102   : > { %v8144_v16 = vpop.f32.mrf.mxu0 }
 0x103   : > { %v8146_v17 = vpack.c.bf16 %v922_v15, %v921_v14 }
 0x104   : > { %v6615_v18 = vpop.f32.mrf.mxu0 }
 0x106   : > { %v6616_v19 = vpop.f32.mrf.mxu0 }
 0x107   : > { %v6617_v11 = vadd.f32 %v6616_v19, %v6615_v18 }
 0x108   : > { %v6618_v20 = vpop.f32.mrf.mxu0 }
 0x10a   : > { %v6619_v21 = vpop.f32.mrf.mxu0 }
 0x10b   : > { %v6620_v3 = vadd.f32 %v6619_v21, %v6618_v20  ;;  %v6614_v20 = vadd.f32 %v8144_v16, %v8142_v13 }
 0x10c   : > { %v6621_v22 = vpop.f32.mrf.mxu0 }
 0x10d   : > { %v857_v21 = vmul.f32 %v6620_v3, %v8123_v51 }
 0x10e   : > { %v6622_v23 = vpop.f32.mrf.mxu0 }
 0x10f   : > { %v6623_v60 = vadd.f32 %v6622_v23, %v6621_v22 }
 0x110   : > { %v6624_v24 = vpop.f32.mrf.mxu0 }
 0x111   : > { %v858_v14 = vmul.f32 %v6623_v60, %v8123_v51 }
 0x112   : > { %v6625_v26 = vpop.f32.mrf.mxu0 }
 0x113   : > { %v6626_v53 = vadd.f32 %v6625_v26, %v6624_v24 }
 0x114   : > { %v6627_v27 = vpop.f32.mrf.mxu0 }
 0x115   : > { %v859_v4 = vmul.f32 %v6626_v53, %v8123_v51 }
 0x116   : > { %v6628_v28 = vpop.f32.mrf.mxu0 }
 0x117   : > { %v6629_v46 = vadd.f32 %v6628_v28, %v6627_v27  ;;  %v896_v26 = vadd.f32 %v8129_v55, %v859_v4 }
 0x118   : > { %v6630_v29 = vpop.f32.mrf.mxu0 }
 0x119   : > { %v860_v61 = vmul.f32 %v6629_v46, %v8123_v51 }
 0x11a   : > { %v6631_v30 = vpop.f32.mrf.mxu0 }
 0x11b   : > { %v6632_v43 = vadd.f32 %v6631_v30, %v6630_v29  ;;  %v897_v22 = vadd.f32 %v8129_v55, %v860_v61  ;;  %v856_v30 = vmul.f32 %v6617_v11, %v8123_v51 }
 0x11c   : > { %v6633_v31 = vpop.f32.mrf.mxu0 }
 0x11d   : > { %v861_v56 = vmul.f32 %v6632_v43, %v8123_v51 }
 0x11e   : > { %v6634_v32 = vpop.f32.mrf.mxu0 }
 0x11f   : > { %v6635_v40 = vadd.f32 %v6634_v32, %v6633_v31  ;;  %v898_v7 = vadd.f32 %v8129_v55, %v861_v56  ;;  %v895_v31 = vadd.f32 %v8129_v55, %v858_v14 }
 0x120   : > { %v6636_v33 = vpop.f32.mrf.mxu0 }
 0x121   : > { %v862_v49 = vmul.f32 %v6635_v40, %v8123_v51  ;;  %v930_v29 = vmax.f32 %v898_v7, 0.0  ;;  %v928_v40 = vmax.f32 %v896_v26, 0.0 }
 0x122   : > { %v6637_v34 = vpop.f32.mrf.mxu0 }
 0x123   : > { %v6638_v37 = vadd.f32 %v6637_v34, %v6636_v33  ;;  %v899_v63 = vadd.f32 %v8129_v55, %v862_v49  ;;  %v929_v33 = vmax.f32 %v897_v22, 0.0 }
 0x124   : > { %v6639_v35 = vpop.f32.mrf.mxu0 }
 0x125   : > { %v863_v44 = vmul.f32 %v6638_v37, %v8123_v51  ;;  %v931_v23 = vmax.f32 %v899_v63, 0.0 }
 0x126   : > { %v6640_v36 = vpop.f32.mrf.mxu0 }
 0x127   : > { %v6641_v38 = vadd.f32 %v6640_v36, %v6639_v35  ;;  %v900_v57 = vadd.f32 %v8129_v55, %v863_v44  ;;  %v855_v35 = vmul.f32 %v6614_v20, %v8123_v51  ;;  %v894_v36 = vadd.f32 %v8129_v55, %v857_v21 }
 0x128   : > { %v6642_v39 = vpop.f32.mrf.mxu0  ;;  %v893_v44 = vadd.f32 %v8129_v55, %v856_v30 }
 0x129   : > { %v864_v41 = vmul.f32 %v6641_v38, %v8123_v51  ;;  %v932_v10 = vmax.f32 %v900_v57, 0.0  ;;  %v892_v49 = vadd.f32 %v8129_v55, %v855_v35 }
 0x12a   : > { %v6643_v42 = vpop.f32.mrf.mxu0 }
 0x12b   : > { %v6644_v45 = vadd.f32 %v6643_v42, %v6642_v39  ;;  %v901_v52 = vadd.f32 %v8129_v55, %v864_v41  ;;  %v1029_v28 = vpack.c.bf16 %v932_v10, %v931_v23  ;;  %v1028_v39 = vpack.c.bf16 %v930_v29, %v929_v33 }
 0x12c   : > { %v6645_v47 = vpop.f32.mrf.mxu0  ;;  %v854_v42 = vmul.f32 %v8140_v12, %v8123_v51  ;;  %v926_v12 = vmax.f32 %v894_v36, 0.0  ;;  %v924_v63 = vmax.f32 %v892_v49, 0.0 }
 0x12d   : > { %v865_v50 = vmul.f32 %v6644_v45, %v8123_v51  ;;  %v933_v1 = vmax.f32 %v901_v52, 0.0  ;;  %v927_v45 = vmax.f32 %v895_v31, 0.0 }
 0x12e   : > { %v6646_v54 = vpop.f32.mrf.mxu0  ;;  %v891_v57 = vadd.f32 %v8129_v55, %v854_v42 }
 0x12f   : > { %v6647_v58 = vadd.f32 %v6646_v54, %v6645_v47  ;;  %v902_v59 = vadd.f32 %v8129_v55, %v865_v50  ;;  %v1027_v54 = vpack.c.bf16 %v928_v40, %v927_v45 }
 0x130   : > { %v6648_v62 = vpop.f32.mrf.mxu0 }
 0x131   : > { %v866_v0 = vmul.f32 %v6647_v58, %v8123_v51  ;;  %v934_v2 = vmax.f32 %v902_v59, 0.0  ;;  %v925_v58 = vmax.f32 %v893_v44, 0.0 }
 0x132   : > { %v6649_v5 = vpop.f32.mrf.mxu0 }
 0x133   : > { %v6650_v8 = vadd.f32 %v6649_v5, %v6648_v62  ;;  %v1030_v9 = vpack.c.bf16 %v934_v2, %v933_v1  ;;  %v903_v24 = vadd.f32 %v8129_v55, %v866_v0  ;;  %v1026_v62 = vpack.c.bf16 %v926_v12, %v925_v58 }
 0x134   : > { %v6651_v15 = vpop.f32.mrf.mxu0  ;;  %v923_v2 = vmax.f32 %v891_v57, 0.0 }
 0x135   : > { %v867_v25 = vmul.f32 %v6650_v8, %v8123_v51  ;;  %1400 = vmatpush1.bf16.msra.mxu1 %v1030_v9  ;;  %v935_v34 = vmax.f32 %v903_v24, 0.0 }
 0x136   : > { %v6652_v27 = vpop.f32.mrf.mxu0  ;;  %1401 = vmatprep.subr.bf16.mxu1 %v7963_v48  ;;  %v1025_v4 = vpack.c.bf16 %v924_v63, %v923_v2 }
 0x137   : > { %v904_v18 = vadd.f32 %v8129_v55, %v867_v25  ;;  %v6653_v19 = vadd.f32 %v6652_v27, %v6651_v15 }
 0x138   : > { %v6654_v32 = vpop.f32.mrf.mxu0 }
 0x139   : > { %v868_v13 = vmul.f32 %v6653_v19, %v8123_v51  ;;  %1402 = vmatpush1.bf16.msra.mxu1 %v1029_v28  ;;  %v936_v16 = vmax.f32 %v904_v18, 0.0 }
 0x13a   : > { %v6655_v37 = vpop.f32.mrf.mxu0  ;;  %1403 = vmatprep.subr.bf16.mxu1 %v7963_v48 }
 0x13b   : > { %v6656_v38 = vadd.f32 %v6655_v37, %v6654_v32  ;;  %v8180_v41 = vpack.c.bf16 %v936_v16, %v935_v34  ;;  %v905_v46 = vadd.f32 %v8129_v55, %v868_v13 }
 0x13c   : > { %v6657_v43 = vpop.f32.mrf.mxu0 }
 0x13d   : > { %v869_v47 = vmul.f32 %v6656_v38, %v8123_v51  ;;  %1404 = vmatpush1.bf16.msra.mxu1 %v1028_v39  ;;  %v937_v59 = vmax.f32 %v905_v46, 0.0 }
 0x13e   : > { %v6658_v50 = vpop.f32.mrf.mxu0  ;;  %1405 = vmatprep.subr.bf16.mxu1 %v7963_v48 }
 0x13f   : > { %v906_v52 = vadd.f32 %v8129_v55, %v869_v47  ;;  %v8190_v53 = vadd.f32 %v6658_v50, %v6657_v43 }
 0x140   : > { %v8192_v56 = vpop.f32.mrf.mxu0 }
 0x141   : > { %1406 = vmatpush1.bf16.msra.mxu1 %v1027_v54  ;;  %v938_v60 = vmax.f32 %v906_v52, 0.0 }
 0x142   : > { %v8195_v61 = vpop.f32.mrf.mxu0  ;;  %1407 = vmatprep.subr.bf16.mxu1 %v7963_v48 }
 0x143   : > { %v8198_v0 = vpack.c.bf16 %v938_v60, %v937_v59  ;;  %v6662_v58 = vadd.f32 %v8195_v61, %v8192_v56 }
 0x144   : > { %v6663_v1 = vpop.f32.mrf.mxu0 }
 0x145   : > { %1408 = vmatpush1.bf16.msra.mxu1 %v1026_v62 }
 0x146   : > { %v6664_v3 = vpop.f32.mrf.mxu0  ;;  %1409 = vmatprep.subr.bf16.mxu1 %v7963_v48 }
 0x147   : > { %v6665_v52 = vadd.f32 %v6664_v3, %v6663_v1 }
 0x148   : > { %v6666_v5 = vpop.f32.mrf.mxu0 }
 0x149   : > { %1410 = vmatpush1.bf16.msra.mxu1 %v1025_v4  ;;  %v872_v2 = vmul.f32 %v6665_v52, %v8123_v51  ;;  %v871_v4 = vmul.f32 %v6662_v58, %v8123_v51  ;;  %v7775_v52 = vld [vmem:[%s10177_s5 + $0x120] ss:$8 sps:$4 sm:$0xff]  }
 0x14a   : > { %v6667_v7 = vpop.f32.mrf.mxu0  ;;  %1411 = vmatprep.subr.bf16.mxu1 %v7963_v48  ;;  %v7781_v58 = vld [vmem:[%s10177_s5 + $0x140] ss:$8 sps:$4 sm:$0xff]  }
 0x14b   : > { %v6668_v45 = vadd.f32 %v6667_v7, %v6666_v5  ;;  %v870_v7 = vmul.f32 %v8190_v53, %v8123_v51  ;;  %v7722_v53 = vld [vmem:[%s10177_s5 + $0x14] ss:$8 sps:$4 sm:$0xff]  }
 0x14c   : > { %v6669_v8 = vpop.f32.mrf.mxu0 }
 0x14d   : > { %1412 = vmatpush1.bf16.msra.mxu1 %v8146_v17  ;;  %v873_v59 = vmul.f32 %v6668_v45, %v8123_v51  ;;  %v7767_v45 = vld [vmem:[%s10177_s5 + $0x104] ss:$8 sps:$4 sm:$0xff]  }
 0x14e   : > { %v6670_v9 = vpop.f32.mrf.mxu0  ;;  %1413 = vmatprep.subr.bf16.mxu1 %v7963_v48 }
 0x14f   : > { %v6671_v39 = vadd.f32 %v6670_v9, %v6669_v8  ;;  %v910_v56 = vadd.f32 %v8129_v55, %v873_v59  ;;  %v909_v8 = vadd.f32 %v8129_v55, %v872_v2  ;;  %v7782_v59 = vld [vmem:[%s10177_s5 + $0x154] ss:$8 sps:$4 sm:$0xff]  }
 0x150   : > { %v6672_v10 = vpop.f32.mrf.mxu0  ;;  %v7788_v2 = vld [vmem:[%s10177_s5 + $0x174] ss:$8 sps:$4 sm:$0xff]  }
 0x151   : > { %1414 = vmatpush1.bf16.msra.mxu1 %v8135_v6  ;;  %v874_v54 = vmul.f32 %v6671_v39, %v8123_v51  ;;  %v7760_v39 = vld [vmem:[%s10177_s5 + $0xd0] ss:$8 sps:$4 sm:$0xff]  }
 0x152   : > { %v6673_v11 = vpop.f32.mrf.mxu0  ;;  %1415 = vmatprep.subr.bf16.mxu1 %v7963_v48 }
 0x153   : > { %v6674_v35 = vadd.f32 %v6673_v11, %v6672_v10  ;;  %v911_v1 = vadd.f32 %v8129_v55, %v874_v54  ;;  %v908_v10 = vadd.f32 %v8129_v55, %v871_v4  ;;  %v7776_v54 = vld [vmem:[%s10177_s5 + $0x134] ss:$8 sps:$4 sm:$0xff]   ;;  %v7793_v4 = vld [vmem:[%s10177_s5 + $0x180] ss:$8 sps:$4 sm:$0xff]  }
 0x154   : > { %v6675_v14 = vpop.f32.mrf.mxu0 }
 0x155   : > { %v875_v46 = vmul.f32 %v6674_v35, %v8123_v51  ;;  %v943_v9 = vmax.f32 %v911_v1, 0.0  ;;  %v7754_v35 = vld [vmem:[%s10177_s5 + $0xb0] ss:$8 sps:$4 sm:$0xff]  }
 0x156   : > { %v6676_v15 = vpop.f32.mrf.mxu0  ;;  %v7790_v1 = vld [vmem:[%s10177_s5 + $0x170] ss:$8 sps:$4 sm:$0xff]  }
 0x157   : > { %v6677_v33 = vadd.f32 %v6676_v15, %v6675_v14  ;;  %v912_v60 = vadd.f32 %v8129_v55, %v875_v46  ;;  %v942_v14 = vmax.f32 %v910_v56, 0.0  ;;  %v907_v15 = vadd.f32 %v8129_v55, %v870_v7  ;;  %v7769_v46 = vld [vmem:[%s10177_s5 + $0x100] ss:$8 sps:$4 sm:$0xff]   ;;  %v7794_v56 = vld [vmem:[%s10177_s5 + $0x194] ss:$8 sps:$4 sm:$0xff]  }
 0x158   : > { %v6678_v22 = vpop.f32.mrf.mxu0 }
 0x159   : > { %v876_v40 = vmul.f32 %v6677_v33, %v8123_v51  ;;  %v944_v5 = vmax.f32 %v912_v60, 0.0  ;;  %v7748_v33 = vld [vmem:[%s10177_s5 + $0x90] ss:$8 sps:$4 sm:$0xff]  }
 0x15a   : > { %v6679_v23 = vpop.f32.mrf.mxu0  ;;  %v7784_v60 = vld [vmem:[%s10177_s5 + $0x150] ss:$8 sps:$4 sm:$0xff]  }
 0x15b   : > { %v6680_v30 = vadd.f32 %v6679_v23, %v6678_v22  ;;  %v913_v12 = vadd.f32 %v8129_v55, %v876_v40  ;;  %v1035_v11 = vpack.c.bf16 %v944_v5, %v943_v9  ;;  %v941_v22 = vmax.f32 %v909_v8, 0.0  ;;  %v7761_v40 = vld [vmem:[%s10177_s5 + $0xe4] ss:$8 sps:$4 sm:$0xff]   ;;  %v7796_v8 = vld [vmem:[%s10177_s5 + $0x190] ss:$8 sps:$4 sm:$0xff]  }
 0x15c   : > { %v6681_v24 = vpop.f32.mrf.mxu0  ;;  %v7797_v9 = vld [vmem:[%s10177_s5 + $0x1a4] ss:$8 sps:$4 sm:$0xff]  }
 0x15d   : > { %v877_v36 = vmul.f32 %v6680_v30, %v8123_v51  ;;  %v945_v3 = vmax.f32 %v913_v12, 0.0  ;;  %v1034_v23 = vpack.c.bf16 %v942_v14, %v941_v22  ;;  %v7743_v30 = vld [vmem:[%s10177_s5 + $0x84] ss:$8 sps:$4 sm:$0xff]   ;;  %v7778_v12 = vld [vmem:[%s10177_s5 + $0x130] ss:$8 sps:$4 sm:$0xff]  }
 0x15e   : > { %v6682_v25 = vpop.f32.mrf.mxu0  ;;  %v7799_v22 = vld [vmem:[%s10177_s5 + $0x1a0] ss:$8 sps:$4 sm:$0xff]  }
 0x15f   : > { %v6683_v28 = vadd.f32 %v6682_v25, %v6681_v24  ;;  %v914_v47 = vadd.f32 %v8129_v55, %v877_v36  ;;  %v940_v24 = vmax.f32 %v908_v10, 0.0  ;;  %v939_v25 = vmax.f32 %v907_v15, 0.0  ;;  %v7755_v36 = vld [vmem:[%s10177_s5 + $0xc4] ss:$8 sps:$4 sm:$0xff]  }
 0x160   : > { %v6684_v20 = vpop.f32.mrf.mxu0 }
 0x161   : > { %v878_v34 = vmul.f32 %v6683_v28, %v8123_v51  ;;  %v946_v63 = vmax.f32 %v914_v47, 0.0  ;;  %v7739_v28 = vld [vmem:[%s10177_s5 + $0x60] ss:$8 sps:$4 sm:$0xff]   ;;  %v7770_v47 = vld [vmem:[%s10177_s5 + $0x114] ss:$8 sps:$4 sm:$0xff]  }
 0x162   : > { %v6685_v21 = vpop.f32.mrf.mxu0 }
 0x163   : > { %v6686_v17 = vadd.f32 %v6685_v21, %v6684_v20  ;;  %v915_v42 = vadd.f32 %v8129_v55, %v878_v34  ;;  %v1036_v61 = vpack.c.bf16 %v946_v63, %v945_v3  ;;  %v7724_v20 = vld [vmem:[%s10177_s5 + $0x10] ss:$8 sps:$4 sm:$0xff]   ;;  %v7749_v34 = vld [vmem:[%s10177_s5 + $0xa4] ss:$8 sps:$4 sm:$0xff]   ;;  %v7787_v63 = vld [vmem:[%s10177_s5 + $0x160] ss:$8 sps:$4 sm:$0xff]  }
 0x164   : > { %v6687_v26 = vpop.f32.mrf.mxu0  ;;  %v7730_v21 = vld [vmem:[%s10177_s5 + $0x30] ss:$8 sps:$4 sm:$0xff]   ;;  %v7791_v3 = vld [vmem:[%s10177_s5 + $0x184] ss:$8 sps:$4 sm:$0xff]  }
 0x165   : > { %v879_v31 = vmul.f32 %v6686_v17, %v8123_v51  ;;  %v947_v57 = vmax.f32 %v915_v42, 0.0  ;;  %v7734_v17 = vld [vmem:[%s10177_s5 + $0x54] ss:$8 sps:$4 sm:$0xff]   ;;  %v7763_v42 = vld [vmem:[%s10177_s5 + $0xe0] ss:$8 sps:$4 sm:$0xff]  }
 0x166   : > { %v6688_v27 = vpop.f32.mrf.mxu0 }
 0x167   : > { %v6689_v18 = vadd.f32 %v6688_v27, %v6687_v26  ;;  %v916_v37 = vadd.f32 %v8129_v55, %v879_v31  ;;  %v7731_v26 = vld [vmem:[%s10177_s5 + $0x44] ss:$8 sps:$4 sm:$0xff]   ;;  %v7733_v27 = vld [vmem:[%s10177_s5 + $0x40] ss:$8 sps:$4 sm:$0xff]  }
 0x168   : > { %v6690_v19 = vpop.f32.mrf.mxu0  ;;  %v7745_v31 = vld [vmem:[%s10177_s5 + $0x80] ss:$8 sps:$4 sm:$0xff]  }
 0x169   : > { %v880_v29 = vmul.f32 %v6689_v18, %v8123_v51  ;;  %v948_v50 = vmax.f32 %v916_v37, 0.0  ;;  %v7736_v18 = vld [vmem:[%s10177_s5 + $0x50] ss:$8 sps:$4 sm:$0xff]   ;;  %v7757_v37 = vld [vmem:[%s10177_s5 + $0xc0] ss:$8 sps:$4 sm:$0xff]  }
 0x16a   : > { %v6691_v6 = vpop.f32.mrf.mxu0 }
 0x16b   : > { %v6692_v32 = vadd.f32 %v6691_v6, %v6690_v19  ;;  %v917_v13 = vadd.f32 %v8129_v55, %v880_v29  ;;  %v1037_v62 = vpack.c.bf16 %v948_v50, %v947_v57  ;;  %v7737_v19 = vld [vmem:[%s10177_s5 + $0x64] ss:$8 sps:$4 sm:$0xff]   ;;  %v7740_v29 = vld [vmem:[%s10177_s5 + $0x74] ss:$8 sps:$4 sm:$0xff]   ;;  %v7742_v6 = vld [vmem:[%s10177_s5 + $0x70] ss:$8 sps:$4 sm:$0xff]  }
 0x16c   : > { %v7773_v50 = vld [vmem:[%s10177_s5 + $0x124] ss:$8 sps:$4 sm:$0xff]  }
 0x16d   : > { %v881_v16 = vmul.f32 %v6692_v32, %v8123_v51  ;;  %v949_v43 = vmax.f32 %v917_v13, 0.0  ;;  %v1033_v51 = vpack.c.bf16 %v940_v24, %v939_v25  ;;  %v7746_v32 = vld [vmem:[%s10177_s5 + $0x94] ss:$8 sps:$4 sm:$0xff]   ;;  %v7751_v13 = vld [vmem:[%s10177_s5 + $0xa0] ss:$8 sps:$4 sm:$0xff]  }
 0x16e   : > { %v7779_v57 = vld [vmem:[%s10177_s5 + $0x144] ss:$8 sps:$4 sm:$0xff]  }
 0x16f   : > { %v918_v38 = vadd.f32 %v8129_v55, %v881_v16  ;;  %v7719_v55 = vld [vmem:[%s10177_s5] ss:$8 sps:$4 sm:$0xff]   ;;  %v7752_v16 = vld [vmem:[%s10177_s5 + $0xb4] ss:$8 sps:$4 sm:$0xff]  }
 0x171   : > { %v950_v44 = vmax.f32 %v918_v38, 0.0  ;;  %v7758_v38 = vld [vmem:[%s10177_s5 + $0xd4] ss:$8 sps:$4 sm:$0xff]  }
 0x173   : > { %v1038_v49 = vpack.c.bf16 %v950_v44, %v949_v43  ;;  %v7764_v43 = vld [vmem:[%s10177_s5 + $0xf4] ss:$8 sps:$4 sm:$0xff]   ;;  %v7766_v44 = vld [vmem:[%s10177_s5 + $0xf0] ss:$8 sps:$4 sm:$0xff]  }
 0x175   : > { %1416 = vmatpush2.bf16.msra.mxu1 %v1038_v49  ;;  %v7772_v49 = vld [vmem:[%s10177_s5 + $0x110] ss:$8 sps:$4 sm:$0xff]  }
 0x176   : > { %1417 = vmatprep.subr.bf16.mxu1 %v7963_v48 }
 0x179   : > { %1418 = vmatpush2.bf16.msra.mxu1 %v1037_v62  ;;  %v7785_v62 = vld [vmem:[%s10177_s5 + $0x164] ss:$8 sps:$4 sm:$0xff]  }
 0x17a   : > { %1419 = vmatprep.subr.bf16.mxu1 %v7963_v48 }
 0x17d   : > { %1420 = vmatpush2.bf16.msra.mxu1 %v1036_v61 }
 0x17e   : > { %1421 = vmatprep.subr.bf16.mxu1 %v7963_v48 }
 0x181   : > { %1422 = vmatpush2.bf16.msra.mxu1 %v1035_v11 }
 0x182   : > { %1423 = vmatprep.subr.bf16.mxu1 %v7963_v48 }
 0x185   : > { %1424 = vmatpush2.bf16.msra.mxu1 %v1034_v23  ;;  %v7800_v23 = vld [vmem:[%s10177_s5 + $0x1b4] ss:$8 sps:$4 sm:$0xff]  }
 0x186   : > { %1425 = vmatprep.subr.bf16.mxu1 %v7963_v48 }
 0x189   : > { %1426 = vmatpush2.bf16.msra.mxu1 %v1033_v51 }
 0x18a   : > { %1427 = vmatprep.subr.bf16.mxu1 %v7963_v48 }
 0x18d   : > { %1428 = vmatpush2.bf16.msra.mxu1 %v8198_v0  ;;  %v7728_v0 = vld [vmem:[%s10177_s5 + $0x34] ss:$8 sps:$4 sm:$0xff]  }
 0x18e   : > { %1429 = vmatprep.subr.bf16.mxu1 %v7963_v48  ;;  %v7725_v48 = vld [vmem:[%s10177_s5 + $0x24] ss:$8 sps:$4 sm:$0xff]  }
 0x191   : > { %1430 = vmatpush2.bf16.msra.mxu1 %v8180_v41  ;;  %v7727_v41 = vld [vmem:[%s10177_s5 + $0x20] ss:$8 sps:$4 sm:$0xff]  }
 0x194   : > { %1432 = vmatmul.mubr.bf16.vlgmr.msra.gmra.mxu1 %v7719_v55 }
 0x195   : > { %1439 = vmatprep.mubr.bf16.mxu1 %v7722_v53  ;;  %v7802_v53 = vld [vmem:[%s10177_s5 + $0x1b0] ss:$8 sps:$4 sm:$0xff]  }
 0x19c   : > { %1440 = vmatmul.mubr.bf16.gmra.mxu1 %v7724_v20  ;;  %v7805_v20 = vld [vmem:[%s10177_s5 + $0x1c4] ss:$8 sps:$4 sm:$0xff]  }
 0x19d   : > { %1447 = vmatprep.mubr.bf16.mxu1 %v7725_v48 }
 0x1a4   : > { %1448 = vmatmul.mubr.bf16.gmra.mxu1 %v7727_v41 }
 0x1a5   : > { %1455 = vmatprep.mubr.bf16.mxu1 %v7728_v0 }
 0x1ac   : > { %1456 = vmatmul.mubr.bf16.gmra.mxu1 %v7730_v21 }
 0x1ad   : > { %1463 = vmatprep.mubr.bf16.mxu1 %v7731_v26  ;;  %v7803_v26 = vld [vmem:[%s10177_s5 + $0x1c0] ss:$8 sps:$4 sm:$0xff]  }
 0x1b4   : > { %1464 = vmatmul.mubr.bf16.gmra.mxu1 %v7733_v27  ;;  %v7808_v27 = vld [vmem:[%s10177_s5 + $0x1d4] ss:$8 sps:$4 sm:$0xff]  }
 0x1b5   : > { %1471 = vmatprep.mubr.bf16.mxu1 %v7734_v17 }
 0x1bc   : > { %1472 = vmatmul.mubr.bf16.gmra.mxu1 %v7736_v18 }
 0x1bd   : > { %1479 = vmatprep.mubr.bf16.mxu1 %v7737_v19 }
 0x1c4   : > { %1480 = vmatmul.mubr.bf16.gmra.mxu1 %v7739_v28 }
 0x1c5   : > { %1487 = vmatprep.mubr.bf16.mxu1 %v7740_v29 }
 0x1cc   : > { %1488 = vmatmul.mubr.bf16.gmra.mxu1 %v7742_v6  ;;  %v7806_v6 = vld [vmem:[%s10177_s5 + $0x1d0] ss:$8 sps:$4 sm:$0xff]  }
 0x1cd   : > { %1495 = vmatprep.mubr.bf16.mxu1 %v7743_v30 }
 0x1d4   : > { %1496 = vmatmul.mubr.bf16.gmra.mxu1 %v7745_v31  ;;  %v7811_v31 = vld [vmem:[%s10177_s5 + $0x1e4] ss:$8 sps:$4 sm:$0xff]  }
 0x1d5   : > { %1503 = vmatprep.mubr.bf16.mxu1 %v7746_v32 }
 0x1dc   : > { %1504 = vmatmul.mubr.bf16.gmra.mxu1 %v7748_v33 }
 0x1dd   : > { %1511 = vmatprep.mubr.bf16.mxu1 %v7749_v34 }
 0x1e4   : > { %1512 = vmatmul.mubr.bf16.gmra.mxu1 %v7751_v13 }
 0x1e5   : > { %1519 = vmatprep.mubr.bf16.mxu1 %v7752_v16 }
 0x1ec   : > { %1520 = vmatmul.mubr.bf16.gmra.mxu1 %v7754_v35  ;;  %v7809_v35 = vld [vmem:[%s10177_s5 + $0x1e0] ss:$8 sps:$4 sm:$0xff]  }
 0x1ed   : > { %1527 = vmatprep.mubr.bf16.mxu1 %v7755_v36 }
 0x1f4   : > { %1528 = vmatmul.mubr.bf16.gmra.mxu1 %v7757_v37  ;;  %v7814_v37 = vld [vmem:[%s10177_s5 + $0x1f4] ss:$8 sps:$4 sm:$0xff]  }
 0x1f5   : > { %1535 = vmatprep.mubr.bf16.mxu1 %v7758_v38 }
 0x1fc   : > { %1536 = vmatmul.mubr.bf16.gmra.mxu1 %v7760_v39 }
 0x1fd   : > { %1543 = vmatprep.mubr.bf16.mxu1 %v7761_v40 }
 0x204   : > { %1544 = vmatmul.mubr.bf16.gmra.mxu1 %v7763_v42 }
 0x205   : > { %1551 = vmatprep.mubr.bf16.mxu1 %v7764_v43 }
 0x20c   : > { %1552 = vmatmul.mubr.bf16.gmra.mxu1 %v7766_v44  ;;  %v7812_v44 = vld [vmem:[%s10177_s5 + $0x1f0] ss:$8 sps:$4 sm:$0xff]  }
 0x20d   : > { %1559 = vmatprep.mubr.bf16.mxu1 %v7767_v45 }
 0x214   : > { %1560 = vmatmul.mubr.bf16.gmra.mxu1 %v7769_v46  ;;  %v7817_v46 = vld [vmem:[%s10177_s5 + $0x204] ss:$8 sps:$4 sm:$0xff]  }
 0x215   : > { %1567 = vmatprep.mubr.bf16.mxu1 %v7770_v47 }
 0x21c   : > { %1568 = vmatmul.mubr.bf16.gmra.mxu1 %v7772_v49 }
 0x21d   : > { %1575 = vmatprep.mubr.bf16.mxu1 %v7773_v50 }
 0x224   : > { %1576 = vmatmul.mubr.bf16.gmra.mxu1 %v7775_v52 }
 0x225   : > { %1583 = vmatprep.mubr.bf16.mxu1 %v7776_v54 }
 0x22c   : > { %1584 = vmatmul.mubr.bf16.gmra.mxu1 %v7778_v12  ;;  %v7815_v12 = vld [vmem:[%s10177_s5 + $0x200] ss:$8 sps:$4 sm:$0xff]  }
 0x22d   : > { %1591 = vmatprep.mubr.bf16.mxu1 %v7779_v57 }
 0x234   : > { %1592 = vmatmul.mubr.bf16.gmra.mxu1 %v7781_v58  ;;  %v7820_v58 = vld [vmem:[%s10177_s5 + $0x214] ss:$8 sps:$4 sm:$0xff]  }
 0x235   : > { %1599 = vmatprep.mubr.bf16.mxu1 %v7782_v59 }
 0x23c   : > { %1600 = vmatmul.mubr.bf16.gmra.mxu1 %v7784_v60 }
 0x23d   : > { %1607 = vmatprep.mubr.bf16.mxu1 %v7785_v62 }
 0x244   : > { %1608 = vmatmul.mubr.bf16.gmra.mxu1 %v7787_v63 }
 0x245   : > { %1615 = vmatprep.mubr.bf16.mxu1 %v7788_v2 }
 0x24c   : > { %1616 = vmatmul.mubr.bf16.gmra.mxu1 %v7790_v1  ;;  %v7818_v1 = vld [vmem:[%s10177_s5 + $0x210] ss:$8 sps:$4 sm:$0xff]  }
 0x24d   : > { %1623 = vmatprep.mubr.bf16.mxu1 %v7791_v3 }
 0x254   : > { %v8392_v61 = vpop.f32.mrf.mxu1  ;;  %1624 = vmatmul.mubr.bf16.gmra.mxu1 %v7793_v4  ;;  %v7823_v4 = vld [vmem:[%s10177_s5 + $0x224] ss:$8 sps:$4 sm:$0xff]  }
 0x255   : > { %1631 = vmatprep.mubr.bf16.mxu1 %v7794_v56 }
 0x256   : > { %v1435_v5 = vpop.f32.mrf.mxu1 }
 0x258   : > { %v8394_v7 = vpop.f32.mrf.mxu1 }
 0x25a   : > { %v1438_v10 = vpop.f32.mrf.mxu1 }
 0x25c   : > { %v8402_v11 = vpop.f32.mrf.mxu1  ;;  %1632 = vmatmul.mubr.bf16.gmra.mxu1 %v7796_v8 }
 0x25d   : > { %1639 = vmatprep.mubr.bf16.mxu1 %v7797_v9  ;;  %v7821_v9 = vld [vmem:[%s10177_s5 + $0x220] ss:$8 sps:$4 sm:$0xff]  }
 0x25e   : > { %v1443_v14 = vpop.f32.mrf.mxu1 }
 0x260   : > { %v8404_v15 = vpop.f32.mrf.mxu1 }
 0x262   : > { %v1446_v24 = vpop.f32.mrf.mxu1 }
 0x264   : > { %v8412_v25 = vpop.f32.mrf.mxu1  ;;  %1640 = vmatmul.mubr.bf16.gmra.mxu1 %v7799_v22 }
 0x265   : > { %1647 = vmatprep.mubr.bf16.mxu1 %v7800_v23 }
 0x266   : > { %v1451_v51 = vpop.f32.mrf.mxu1 }
 0x268   : > { %v8414_v55 = vpop.f32.mrf.mxu1 }
 0x26a   : > { %v1454_v48 = vpop.f32.mrf.mxu1 }
 0x26c   : > { %v8422_v41 = vpop.f32.mrf.mxu1  ;;  %1648 = vmatmul.mubr.bf16.gmra.mxu1 %v7802_v53 }
 0x26d   : > { %1655 = vmatprep.mubr.bf16.mxu1 %v7805_v20 }
 0x26e   : > { %v1459_v0 = vpop.f32.mrf.mxu1 }
 0x270   : > { %v8424_v21 = vpop.f32.mrf.mxu1 }
 0x272   : > { %v1462_v17 = vpop.f32.mrf.mxu1 }
 0x274   : > { %v1465_v18 = vpop.f32.mrf.mxu1  ;;  %1656 = vmatmul.mubr.bf16.gmra.mxu1 %v7803_v26 }
 0x275   : > { %v1720_v19 = vmax.f32 %v8392_v61, %v1465_v18  ;;  %1663 = vmatprep.mubr.bf16.mxu1 %v7808_v27 }
 0x276   : > { %v1467_v28 = vpop.f32.mrf.mxu1 }
 0x278   : > { %v1468_v29 = vpop.f32.mrf.mxu1 }
 0x279   : > { %v1721_v30 = vmax.f32 %v8394_v7, %v1468_v29 }
 0x27a   : > { %v1470_v32 = vpop.f32.mrf.mxu1 }
 0x27c   : > { %v1473_v33 = vpop.f32.mrf.mxu1  ;;  %1664 = vmatmul.mubr.bf16.gmra.mxu1 %v7806_v6 }
 0x27d   : > { %v1722_v34 = vmax.f32 %v8402_v11, %v1473_v33  ;;  %1671 = vmatprep.mubr.bf16.mxu1 %v7811_v31  ;;  %v7826_v11 = vld [vmem:[%s10177_s5 + $0x234] ss:$8 sps:$4 sm:$0xff]  }
 0x27e   : > { %v1475_v13 = vpop.f32.mrf.mxu1 }
 0x280   : > { %v1476_v16 = vpop.f32.mrf.mxu1 }
 0x281   : > { %v1723_v36 = vmax.f32 %v8404_v15, %v1476_v16 }
 0x282   : > { %v1478_v38 = vpop.f32.mrf.mxu1 }
 0x284   : > { %v1481_v39 = vpop.f32.mrf.mxu1  ;;  %1672 = vmatmul.mubr.bf16.gmra.mxu1 %v7809_v35 }
 0x285   : > { %v1724_v40 = vmax.f32 %v8412_v25, %v1481_v39  ;;  %1679 = vmatprep.mubr.bf16.mxu1 %v7814_v37  ;;  %v7824_v25 = vld [vmem:[%s10177_s5 + $0x230] ss:$8 sps:$4 sm:$0xff]  }
 0x286   : > { %v1483_v42 = vpop.f32.mrf.mxu1  ;;  %v7827_v37 = vld [vmem:[%s10175_s3 + $0x38] sm:$0xff]  }
 0x287   : > { %7012 = vmatprep.subr.bf16.mxu0 %v7827_v37  ;;  %v7828_v42 = vld [vmem:[%s10175_s3 + $0x30] sm:$0xff]  }
 0x288   : > { %v1484_v43 = vpop.f32.mrf.mxu1  ;;  %7013 = vmatpush3.bf16.msra.mxu0 %v7827_v37 }
 0x289   : > { %v1725_v45 = vmax.f32 %v8414_v55, %v1484_v43  ;;  %7014 = vmatprep.subr.bf16.mxu0 %v7828_v42 }
 0x28a   : > { %v1486_v47 = vpop.f32.mrf.mxu1 }
 0x28c   : > { %v1489_v49 = vpop.f32.mrf.mxu1  ;;  %1680 = vmatmul.mubr.bf16.gmra.mxu1 %v7812_v44  ;;  %7015 = vmatpush3.bf16.msra.mxu0 %v7828_v42 }
 0x28d   : > { %v1726_v50 = vmax.f32 %v8422_v41, %v1489_v49  ;;  %1687 = vmatprep.mubr.bf16.mxu1 %v7817_v46  ;;  %v7829_v46 = vld [vmem:[%s10175_s3 + $0x28] sm:$0xff]  }
 0x28e   : > { %v1491_v52 = vpop.f32.mrf.mxu1  ;;  %7016 = vmatprep.subr.bf16.mxu0 %v7829_v46 }
 0x28f   : > { %v7830_v52 = vld [vmem:[%s10175_s3 + $0x20] sm:$0xff]  }
 0x290   : > { %v1492_v54 = vpop.f32.mrf.mxu1  ;;  %7017 = vmatpush3.bf16.msra.mxu0 %v7829_v46 }
 0x291   : > { %v1727_v57 = vmax.f32 %v8424_v21, %v1492_v54  ;;  %7018 = vmatprep.subr.bf16.mxu0 %v7830_v52 }
 0x292   : > { %v1494_v59 = vpop.f32.mrf.mxu1 }
 0x294   : > { %v1497_v60 = vpop.f32.mrf.mxu1  ;;  %1688 = vmatmul.mubr.bf16.gmra.mxu1 %v7815_v12  ;;  %7019 = vmatpush3.bf16.msra.mxu0 %v7830_v52 }
 0x295   : > { %v8464_v62 = vmax.f32 %v1720_v19, %v1497_v60  ;;  %1695 = vmatprep.mubr.bf16.mxu1 %v7820_v58  ;;  %v7831_v58 = vld [vmem:[%s10175_s3 + $0x18] sm:$0xff]  }
 0x296   : > { %v1499_v63 = vpop.f32.mrf.mxu1  ;;  %7020 = vmatprep.subr.bf16.mxu0 %v7831_v58 }
 0x297   : > { %v7832_v63 = vld [vmem:[%s10175_s3 + $0x10] sm:$0xff]  }
 0x298   : > { %v1500_v2 = vpop.f32.mrf.mxu1  ;;  %7021 = vmatpush3.bf16.msra.mxu0 %v7831_v58 }
 0x299   : > { %v8469_v3 = vmax.f32 %v1721_v30, %v1500_v2  ;;  %7022 = vmatprep.subr.bf16.mxu0 %v7832_v63 }
 0x29a   : > { %v1502_v56 = vpop.f32.mrf.mxu1 }
 0x29c   : > { %v1505_v61 = vpop.f32.mrf.mxu1  ;;  %1696 = vmatmul.mubr.bf16.gmra.mxu1 %v7818_v1  ;;  %7023 = vmatpush3.bf16.msra.mxu0 %v7832_v63 }
 0x29d   : > { %v8474_v5 = vmax.f32 %v1722_v34, %v1505_v61  ;;  %1703 = vmatprep.mubr.bf16.mxu1 %v7823_v4  ;;  %v7833_v4 = vld [vmem:[%s10175_s3 + $0x8] sm:$0xff]  }
 0x29e   : > { %v1507_v7 = vpop.f32.mrf.mxu1  ;;  %7024 = vmatprep.subr.bf16.mxu0 %v7833_v4 }
 0x29f   : > { %v7834_v7 = vld [vmem:[%s10175_s3] sm:$0xff]  }
 0x2a0   : > { %v1508_v8 = vpop.f32.mrf.mxu1  ;;  %7025 = vmatpush3.bf16.msra.mxu0 %v7833_v4 }
 0x2a1   : > { %v8479_v10 = vmax.f32 %v1723_v36, %v1508_v8  ;;  %7026 = vmatprep.subr.bf16.mxu0 %v7834_v7 }
 0x2a2   : > { %v1510_v14 = vpop.f32.mrf.mxu1 }
 0x2a4   : > { %v1513_v15 = vpop.f32.mrf.mxu1  ;;  %1704 = vmatmul.mubr.bf16.gmra.mxu1 %v7821_v9  ;;  %7027 = vmatpush3.bf16.msra.mxu0 %v7834_v7 }
 0x2a5   : > { %v8484_v22 = vmax.f32 %v1724_v40, %v1513_v15  ;;  %1711 = vmatprep.mubr.bf16.mxu1 %v7826_v11 }
 0x2a6   : > { %v1515_v23 = vpop.f32.mrf.mxu1 }
 0x2a8   : > { %v1516_v24 = vpop.f32.mrf.mxu1 }
 0x2a9   : > { %v8489_v51 = vmax.f32 %v1725_v45, %v1516_v24 }
 0x2aa   : > { %v1518_v55 = vpop.f32.mrf.mxu1 }
 0x2ac   : > { %v1521_v53 = vpop.f32.mrf.mxu1  ;;  %1712 = vmatmul.mubr.bf16.gmra.mxu1 %v7824_v25 }
 0x2ad   : > { %v8491_v20 = vmax.f32 %v1726_v50, %v1521_v53 }
 0x2ae   : > { %v1523_v48 = vpop.f32.mrf.mxu1 }
 0x2b0   : > { %v1524_v41 = vpop.f32.mrf.mxu1 }
 0x2b1   : > { %v8493_v0 = vmax.f32 %v1727_v57, %v1524_v41 }
 0x2b2   : > { %v1526_v21 = vpop.f32.mrf.mxu1 }
 0x2b4   : > { %v1529_v26 = vpop.f32.mrf.mxu1 }
 0x2b5   : > { %v1736_v27 = vmax.f32 %v8464_v62, %v1529_v26 }
 0x2b6   : > { %v1531_v17 = vpop.f32.mrf.mxu1 }
 0x2b8   : > { %v1532_v18 = vpop.f32.mrf.mxu1 }
 0x2b9   : > { %v1737_v19 = vmax.f32 %v8469_v3, %v1532_v18 }
 0x2ba   : > { %v1534_v28 = vpop.f32.mrf.mxu1 }
 0x2bc   : > { %v1537_v29 = vpop.f32.mrf.mxu1 }
 0x2bd   : > { %v1738_v6 = vmax.f32 %v8474_v5, %v1537_v29 }
 0x2be   : > { %v1539_v30 = vpop.f32.mrf.mxu1 }
 0x2c0   : > { %v1540_v31 = vpop.f32.mrf.mxu1 }
 0x2c1   : > { %v1739_v32 = vmax.f32 %v8479_v10, %v1540_v31 }
 0x2c2   : > { %v1542_v33 = vpop.f32.mrf.mxu1 }
 0x2c4   : > { %v1545_v34 = vpop.f32.mrf.mxu1 }
 0x2c5   : > { %v1740_v13 = vmax.f32 %v8484_v22, %v1545_v34 }
 0x2c6   : > { %v1547_v16 = vpop.f32.mrf.mxu1 }
 0x2c8   : > { %v1548_v35 = vpop.f32.mrf.mxu1 }
 0x2c9   : > { %v1741_v36 = vmax.f32 %v8489_v51, %v1548_v35 }
 0x2ca   : > { %v1550_v38 = vpop.f32.mrf.mxu1 }
 0x2cc   : > { %v1553_v39 = vpop.f32.mrf.mxu1 }
 0x2cd   : > { %v1742_v40 = vmax.f32 %v8491_v20, %v1553_v39 }
 0x2ce   : > { %v1555_v43 = vpop.f32.mrf.mxu1 }
 0x2d0   : > { %v1556_v44 = vpop.f32.mrf.mxu1 }
 0x2d1   : > { %v1743_v45 = vmax.f32 %v8493_v0, %v1556_v44 }
 0x2d2   : > { %v1558_v47 = vpop.f32.mrf.mxu1 }
 0x2d4   : > { %v1561_v49 = vpop.f32.mrf.mxu1 }
 0x2d5   : > { %v8512_v50 = vmax.f32 %v1736_v27, %v1561_v49 }
 0x2d6   : > { %v1563_v54 = vpop.f32.mrf.mxu1 }
 0x2d8   : > { %v1564_v12 = vpop.f32.mrf.mxu1 }
 0x2d9   : > { %v8517_v57 = vmax.f32 %v1737_v19, %v1564_v12 }
 0x2da   : > { %v1566_v59 = vpop.f32.mrf.mxu1 }
 0x2dc   : > { %v1569_v60 = vpop.f32.mrf.mxu1 }
 0x2dd   : > { %v1746_v62 = vmax.f32 %v1738_v6, %v1569_v60 }
 0x2de   : > { %v1571_v2 = vpop.f32.mrf.mxu1 }
 0x2e0   : > { %v1572_v1 = vpop.f32.mrf.mxu1 }
 0x2e1   : > { %v8525_v3 = vmax.f32 %v1739_v32, %v1572_v1 }
 0x2e2   : > { %v1574_v56 = vpop.f32.mrf.mxu1 }
 0x2e4   : > { %v1577_v61 = vpop.f32.mrf.mxu1 }
 0x2e5   : > { %v1748_v5 = vmax.f32 %v1740_v13, %v1577_v61 }
 0x2e6   : > { %v1579_v8 = vpop.f32.mrf.mxu1 }
 0x2e8   : > { %v1580_v9 = vpop.f32.mrf.mxu1 }
 0x2e9   : > { %v8533_v10 = vmax.f32 %v1741_v36, %v1580_v9 }
 0x2ea   : > { %v1582_v11 = vpop.f32.mrf.mxu1 }
 0x2ec   : > { %v1585_v14 = vpop.f32.mrf.mxu1 }
 0x2ed   : > { %v1750_v15 = vmax.f32 %v1742_v40, %v1585_v14 }
 0x2ee   : > { %v1587_v22 = vpop.f32.mrf.mxu1 }
 0x2f0   : > { %v1588_v23 = vpop.f32.mrf.mxu1 }
 0x2f1   : > { %v8535_v24 = vmax.f32 %v1743_v45, %v1588_v23 }
 0x2f2   : > { %v1590_v25 = vpop.f32.mrf.mxu1 }
 0x2f4   : > { %v1593_v51 = vpop.f32.mrf.mxu1 }
 0x2f5   : > { %v1752_v55 = vmax.f32 %v8512_v50, %v1593_v51 }
 0x2f6   : > { %v1595_v53 = vpop.f32.mrf.mxu1 }
 0x2f8   : > { %v1596_v20 = vpop.f32.mrf.mxu1 }
 0x2f9   : > { %v1753_v48 = vmax.f32 %v8517_v57, %v1596_v20 }
 0x2fa   : > { %v1598_v41 = vpop.f32.mrf.mxu1 }
 0x2fc   : > { %v1601_v0 = vpop.f32.mrf.mxu1 }
 0x2fd   : > { %v1754_v21 = vmax.f32 %v1746_v62, %v1601_v0 }
 0x2fe   : > { %v1603_v26 = vpop.f32.mrf.mxu1 }
 0x2ff   : > { %v6094_v26 = vld [vmem:[%s10174_s2 + $0x3] ss:$0 sm:$0xff] }
 0x300   : > { %v8539_v27 = vpop.f32.mrf.mxu1 }
 0x301   : > { %v1755_v17 = vmax.f32 %v8525_v3, %v8539_v27 }
 0x302   : > { %v1606_v18 = vpop.f32.mrf.mxu1 }
 0x304   : > { %v1609_v19 = vpop.f32.mrf.mxu1 }
 0x305   : > { %v1756_v28 = vmax.f32 %v1748_v5, %v1609_v19 }
 0x306   : > { %v1611_v29 = vpop.f32.mrf.mxu1 }
 0x308   : > { %v8543_v6 = vpop.f32.mrf.mxu1 }
 0x309   : > { %v1757_v30 = vmax.f32 %v8533_v10, %v8543_v6 }
 0x30a   : > { %v1614_v31 = vpop.f32.mrf.mxu1 }
 0x30c   : > { %v1617_v32 = vpop.f32.mrf.mxu1 }
 0x30d   : > { %v1758_v33 = vmax.f32 %v1750_v15, %v1617_v32 }
 0x30e   : > { %v1619_v34 = vpop.f32.mrf.mxu1 }
 0x310   : > { %v8547_v13 = vpop.f32.mrf.mxu1 }
 0x311   : > { %v1759_v16 = vmax.f32 %v8535_v24, %v8547_v13 }
 0x312   : > { %v1622_v35 = vpop.f32.mrf.mxu1 }
 0x314   : > { %v1625_v36 = vpop.f32.mrf.mxu1 }
 0x315   : > { %v1760_v37 = vmax.f32 %v1752_v55, %v1625_v36  ;;  %v6093_v55 = vld [vmem:[%s10174_s2 + $0x2] ss:$0 sm:$0xff] }
 0x316   : > { %v1627_v38 = vpop.f32.mrf.mxu1 }
 0x318   : > { %v1628_v39 = vpop.f32.mrf.mxu1 }
 0x319   : > { %v1761_v53 = vmax.f32 %v1753_v48, %v1628_v39 }
 0x31a   : > { %v1630_v40 = vpop.f32.mrf.mxu1 }
 0x31c   : > { %v1633_v42 = vpop.f32.mrf.mxu1 }
 0x31d   : > { %v1762_v43 = vmax.f32 %v1754_v21, %v1633_v42 }
 0x31e   : > { %v1635_v44 = vpop.f32.mrf.mxu1 }
 0x320   : > { %v1636_v45 = vpop.f32.mrf.mxu1 }
 0x321   : > { %v1763_v48 = vmax.f32 %v1755_v17, %v1636_v45 }
 0x322   : > { %v1638_v46 = vpop.f32.mrf.mxu1 }
 0x324   : > { %v1641_v47 = vpop.f32.mrf.mxu1 }
 0x325   : > { %v1764_v49 = vmax.f32 %v1756_v28, %v1641_v47 }
 0x326   : > { %v1643_v50 = vpop.f32.mrf.mxu1 }
 0x328   : > { %v1644_v52 = vpop.f32.mrf.mxu1 }
 0x329   : > { %v1765_v27 = vmax.f32 %v1757_v30, %v1644_v52 }
 0x32a   : > { %v1646_v54 = vpop.f32.mrf.mxu1 }
 0x32c   : > { %v1649_v12 = vpop.f32.mrf.mxu1 }
 0x32d   : > { %v8551_v57 = vmax.f32 %v1758_v33, %v1649_v12 }
 0x32e   : > { %v1651_v58 = vpop.f32.mrf.mxu1 }
 0x330   : > { %v8553_v59 = vpop.f32.mrf.mxu1 }
 0x331   : > { %v1767_v30 = vmax.f32 %v1759_v16, %v8553_v59 }
 0x332   : > { %v1654_v60 = vpop.f32.mrf.mxu1 }
 0x334   : > { %v1657_v62 = vpop.f32.mrf.mxu1 }
 0x335   : > { %v1768_v25 = vmax.f32 %v1760_v37, %v1657_v62 }
 0x336   : > { %v1659_v63 = vpop.f32.mrf.mxu1 }
 0x338   : > { %v1660_v2 = vpop.f32.mrf.mxu1 }
 0x339   : > { %v1769_v0 = vmax.f32 %v1761_v53, %v1660_v2 }
 0x33a   : > { %v1662_v1 = vpop.f32.mrf.mxu1 }
 0x33c   : > { %v1665_v4 = vpop.f32.mrf.mxu1 }
 0x33d   : > { %v1770_v29 = vmax.f32 %v1762_v43, %v1665_v4 }
 0x33e   : > { %v1667_v56 = vpop.f32.mrf.mxu1 }
 0x340   : > { %v1668_v61 = vpop.f32.mrf.mxu1 }
 0x341   : > { %v1771_v37 = vmax.f32 %v1763_v48, %v1668_v61 }
 0x342   : > { %v1670_v5 = vpop.f32.mrf.mxu1 }
 0x344   : > { %v1673_v7 = vpop.f32.mrf.mxu1 }
 0x345   : > { %v1772_v47 = vmax.f32 %v1764_v49, %v1673_v7 }
 0x346   : > { %v1675_v8 = vpop.f32.mrf.mxu1 }
 0x348   : > { %v1676_v9 = vpop.f32.mrf.mxu1 }
 0x349   : > { %v1773_v58 = vmax.f32 %v1765_v27, %v1676_v9 }
 0x34a   : > { %v1678_v11 = vpop.f32.mrf.mxu1 }
 0x34c   : > { %v1681_v14 = vpop.f32.mrf.mxu1 }
 0x34d   : > { %v1774_v56 = vmax.f32 %v8551_v57, %v1681_v14 }
 0x34e   : > { %v1683_v15 = vpop.f32.mrf.mxu1 }
 0x350   : > { %v1684_v22 = vpop.f32.mrf.mxu1 }
 0x351   : > { %v1775_v8 = vmax.f32 %v1767_v30, %v1684_v22  ;;  %v7835_v22 = vld [vmem:[%s10178_s6] sm:$0xff]   ;;  %v8615_v30 = vld [vmem:[%s10178_s6 + $0x10] sm:$0xff]  }
 0x352   : > { %v1686_v23 = vpop.f32.mrf.mxu1  ;;  %7172 = vmatprep.mubr.msk.bf16.mxu1 %vm2241_vm0, %v7835_v22  ;;  %10238 = vst [vmem:[#allocation11_spill] sm:$0xff] %v8615_v30 }
 0x354   : > { %v1689_v51 = vpop.f32.mrf.mxu1 }
 0x355   : > { %v8558_v20 = vmax.f32 %v1768_v25, %v1689_v51 }
 0x356   : > { %v1691_v41 = vpop.f32.mrf.mxu1 }
 0x357   : > { %10229 = vst [vmem:[#allocation2_spill] sm:$0xff] %v8558_v20  ;;  %v1789_v21 = vmul.f32 %v6093_v55, %v8558_v20 }
 0x358   : > { %v1692_v18 = vpop.f32.mrf.mxu1 }
 0x359   : > { %v8564_v19 = vmax.f32 %v1769_v0, %v1692_v18  ;;  %v1802_v31 = vadd.f32 %v6094_v26, %v1789_v21 }
 0x35a   : > { %v1694_v28 = vpop.f32.mrf.mxu1 }
 0x35b   : > { %10230 = vst [vmem:[#allocation3_spill] sm:$0xff] %v8564_v19  ;;  %v1790_v32 = vmul.f32 %v6093_v55, %v8564_v19  ;;  %v1810_v38 = vmax.f32 %v1802_v31, 0.0 }
 0x35c   : > { %v1697_v33 = vpop.f32.mrf.mxu1 }
 0x35d   : > { %v1803_v34 = vadd.f32 %v6094_v26, %v1790_v32  ;;  %v8570_v35 = vmax.f32 %v1770_v29, %v1697_v33  ;;  %v6104_v32 = vld [vmem:[%s10174_s2 + $0x5] ss:$0 sm:$0xff] }
 0x35e   : > { %v1699_v36 = vpop.f32.mrf.mxu1 }
 0x35f   : > { %10231 = vst [vmem:[#allocation4_spill] sm:$0xff] %v8570_v35  ;;  %v1811_v39 = vmax.f32 %v1803_v34, 0.0  ;;  %v1791_v40 = vmul.f32 %v6093_v55, %v8570_v35 }
 0x360   : > { %v1700_v42 = vpop.f32.mrf.mxu1 }
 0x361   : > { %v8573_v44 = vmax.f32 %v1771_v37, %v1700_v42  ;;  %v1818_v43 = vpack.c.bf16 %v1811_v39, %v1810_v38  ;;  %v1804_v50 = vadd.f32 %v6094_v26, %v1791_v40 }
 0x362   : > { %v1702_v46 = vpop.f32.mrf.mxu1 }
 0x363   : > { %10232 = vst [vmem:[#allocation5_spill] sm:$0xff] %v8573_v44  ;;  %v1792_v54 = vmul.f32 %v6093_v55, %v8573_v44  ;;  %7028 = vmatprep.mubr.bf16.mxu0 %v1818_v43  ;;  %v1812_v60 = vmax.f32 %v1804_v50, 0.0 }
 0x364   : > { %v1705_v3 = vpop.f32.mrf.mxu1 }
 0x365   : > { %v1805_v17 = vadd.f32 %v6094_v26, %v1792_v54  ;;  %v8579_v45 = vmax.f32 %v1772_v47, %v1705_v3 }
 0x366   : > { %v1707_v12 = vpop.f32.mrf.mxu1 }
 0x367   : > { %10233 = vst [vmem:[#allocation6_spill] sm:$0xff] %v8579_v45  ;;  %v1813_v62 = vmax.f32 %v1805_v17, 0.0  ;;  %v1793_v63 = vmul.f32 %v6093_v55, %v8579_v45 }
 0x368   : > { %v1708_v2 = vpop.f32.mrf.mxu1 }
 0x369   : > { %v1819_v49 = vpack.c.bf16 %v1813_v62, %v1812_v60  ;;  %v8582_v1 = vmax.f32 %v1773_v58, %v1708_v2  ;;  %v1806_v61 = vadd.f32 %v6094_v26, %v1793_v63 }
 0x36a   : > { %v1710_v4 = vpop.f32.mrf.mxu1 }
 0x36b   : > { %10234 = vst [vmem:[#allocation7_spill] sm:$0xff] %v8582_v1  ;;  %v1794_v10 = vmul.f32 %v6093_v55, %v8582_v1  ;;  %7029 = vmatmul.mubr.bf16.vlgmr.msra.gmra.mxu0 %v1819_v49  ;;  %v1814_v9 = vmax.f32 %v1806_v61, 0.0 }
 0x36c   : > { %v1713_v6 = vpop.f32.mrf.mxu1 }
 0x36d   : > { %v1807_v52 = vadd.f32 %v6094_v26, %v1794_v10  ;;  %v8590_v5 = vmax.f32 %v1774_v56, %v1713_v6  ;;  %v8610_v6 = vld [vmem:[%s10178_s6 + $0x8] sm:$0xff]  }
 0x36e   : > { %v1715_v7 = vpop.f32.mrf.mxu1  ;;  %10237 = vst [vmem:[#allocation10_spill] sm:$0xff] %v8610_v6 }
 0x36f   : > { %10235 = vst [vmem:[#allocation8_spill] sm:$0xff] %v8590_v5  ;;  %v1815_v11 = vmax.f32 %v1807_v52, 0.0  ;;  %v1795_v15 = vmul.f32 %v6093_v55, %v8590_v5  ;;  %v8624_v52 = vld [vmem:[%s10178_s6 + $0x18] sm:$0xff]   ;;  %v8629_v7 = vld [vmem:[%s10178_s6 + $0x20] sm:$0xff]  }
 0x370   : > { %v1716_v57 = vpop.f32.mrf.mxu1  ;;  %10239 = vst [vmem:[#allocation12_spill] sm:$0xff] %v8624_v52  ;;  %10240 = vst [vmem:[#allocation13_spill] sm:$0xff] %v8629_v7 }
 0x371   : > { %v8593_v14 = vmax.f32 %v1775_v8, %v1716_v57  ;;  %v1820_v23 = vpack.c.bf16 %v1815_v11, %v1814_v9  ;;  %v1808_v51 = vadd.f32 %v6094_v26, %v1795_v15  ;;  %v8638_v8 = vld [vmem:[%s10178_s6 + $0x28] sm:$0xff]   ;;  %v8643_v9 = vld [vmem:[%s10178_s6 + $0x30] sm:$0xff]   ;;  %v8652_v11 = vld [vmem:[%s10178_s6 + $0x38] sm:$0xff]  }
 0x372   : > { %v1718_v25 = vpop.f32.mrf.mxu1  ;;  %10241 = vst [vmem:[#allocation14_spill] sm:$0xff] %v8638_v8  ;;  %10242 = vst [vmem:[#allocation15_spill] sm:$0xff] %v8643_v9  ;;  %v8657_v15 = vld [vmem:[%s10178_s6 + $0x40] sm:$0xff]   ;;  %v8666_v57 = vld [vmem:[%s10178_s6 + $0x48] sm:$0xff]  }
 0x373   : > { %10236 = vst [vmem:[#allocation9_spill] sm:$0xff] %v8593_v14  ;;  %v1796_v53 = vmul.f32 %v6093_v55, %v8593_v14  ;;  %7032 = vmatprep.mubr.bf16.mxu0 %v1820_v23  ;;  %v1816_v13 = vmax.f32 %v1808_v51, 0.0  ;;  %v6103_v55 = vld [vmem:[%s10174_s2 + $0x4] ss:$0 sm:$0xff]  ;;  %10243 = vst [vmem:[#allocation16_spill] sm:$0xff] %v8652_v11  ;;  %v8671_v23 = vld [vmem:[%s10178_s6 + $0x50] sm:$0xff]  }
 0x374   : > { %10244 = vst [vmem:[#allocation17_spill] sm:$0xff] %v8657_v15  ;;  %10245 = vst [vmem:[#allocation18_spill] sm:$0xff] %v8666_v57  ;;  %v8680_v25 = vld [vmem:[%s10178_s6 + $0x58] sm:$0xff]   ;;  %v8685_v51 = vld [vmem:[%s10178_s6 + $0x60] sm:$0xff]  }
 0x375   : > { %v1809_v24 = vadd.f32 %v6094_v26, %v1796_v53  ;;  %10246 = vst [vmem:[#allocation19_spill] sm:$0xff] %v8671_v23  ;;  %10247 = vst [vmem:[#allocation20_spill] sm:$0xff] %v8680_v25  ;;  %v8694_v53 = vld [vmem:[%s10178_s6 + $0x68] sm:$0xff]  }
 0x376   : > { %10248 = vst [vmem:[#allocation21_spill] sm:$0xff] %v8685_v51  ;;  %10249 = vst [vmem:[#allocation22_spill] sm:$0xff] %v8694_v53 }
 0x377   : > { %v1817_v16 = vmax.f32 %v1809_v24, 0.0  ;;  %v8699_v24 = vld [vmem:[%s10178_s6 + $0x70] sm:$0xff]  }
 0x378   : > { %10250 = vst [vmem:[#allocation23_spill] sm:$0xff] %v8699_v24 }
 0x379   : > { %v1821_v59 = vpack.c.bf16 %v1817_v16, %v1816_v13  ;;  %v8708_v13 = vld [vmem:[%s10178_s6 + $0x78] sm:$0xff]   ;;  %v8713_v16 = vld [vmem:[%s10178_s6 + $0x80] sm:$0xff]  }
 0x37a   : > { %10251 = vst [vmem:[#allocation24_spill] sm:$0xff] %v8708_v13  ;;  %10252 = vst [vmem:[#allocation25_spill] sm:$0xff] %v8713_v16 }
 0x37b   : > { %7033 = vmatmul.mubr.bf16.gmra.mxu0 %v1821_v59  ;;  %v8722_v59 = vld [vmem:[%s10178_s6 + $0x88] sm:$0xff]  }
 0x37c   : > { %7044 = vmatprep.mubr.msk.bf16.mxu0 %vm2241_vm0, %v7835_v22  ;;  %10253 = vst [vmem:[#allocation26_spill] sm:$0xff] %v8722_v59  ;;  %v8727_v22 = vld [vmem:[%s10178_s6 + $0x90] sm:$0xff]  }
 0x37d   : > { %10254 = vst [vmem:[#allocation27_spill] sm:$0xff] %v8727_v22 }
 0x42b   : > { %v7030_v41 = vpop.f32.mrf.mxu0 }
 0x42c   : > { %v1958_v37 = vmul.f32 %v7030_v41, %v6103_v55  ;;  %v8736_v41 = vld [vmem:[%s10178_s6 + $0x98] sm:$0xff]  }
 0x42d   : > { %v1920_v0 = vpop.f32.mrf.mxu0  ;;  %10255 = vst [vmem:[#allocation28_spill] sm:$0xff] %v8736_v41 }
 0x42e   : > { %v1971_v3 = vadd.f32 %v6104_v32, %v1958_v37  ;;  %v1956_v27 = vmul.f32 %v6103_v55, %v1920_v0  ;;  %v8741_v0 = vld [vmem:[%s10178_s6 + $0xa0] sm:$0xff]   ;;  %v8834_v37 = vld [vmem:[%s10178_s6 + $0x108] sm:$0xff]  }
 0x42f   : > { %v7031_v21 = vpop.f32.mrf.mxu0  ;;  %10256 = vst [vmem:[#allocation29_spill] sm:$0xff] %v8741_v0  ;;  %10269 = vst [vmem:[#allocation42_spill] sm:$0xff] %v8834_v37 }
 0x430   : > { %v1959_v33 = vmul.f32 %v7031_v21, %v6103_v55  ;;  %v1979_v2 = vmax.f32 %v1971_v3, 0.0  ;;  %v1969_v49 = vadd.f32 %v6104_v32, %v1956_v27  ;;  %v8750_v21 = vld [vmem:[%s10178_s6 + $0xa8] sm:$0xff]  }
 0x431   : > { %v1923_v18 = vpop.f32.mrf.mxu0  ;;  %10257 = vst [vmem:[#allocation30_spill] sm:$0xff] %v8750_v21 }
 0x432   : > { %v1972_v43 = vadd.f32 %v6104_v32, %v1959_v33  ;;  %v1957_v46 = vmul.f32 %v6103_v55, %v1923_v18  ;;  %v1977_v61 = vmax.f32 %v1969_v49, 0.0  ;;  %v8755_v18 = vld [vmem:[%s10178_s6 + $0xb0] sm:$0xff]   ;;  %v8806_v33 = vld [vmem:[%s10178_s6 + $0xe8] sm:$0xff]  }
 0x433   : > { %10258 = vst [vmem:[#allocation31_spill] sm:$0xff] %v8755_v18  ;;  %10265 = vst [vmem:[#allocation38_spill] sm:$0xff] %v8806_v33 }
 0x434   : > { %v1980_v60 = vmax.f32 %v1972_v43, 0.0  ;;  %v1970_v62 = vadd.f32 %v6104_v32, %v1957_v46  ;;  %v7873_v43 = vld [vmem:[%s10175_s3 + $0x68] sm:$0xff]   ;;  %v7874_v46 = vld [vmem:[%s10175_s3 + $0x60] sm:$0xff]  }
 0x436   : > { %v1978_v4 = vmax.f32 %v1970_v62, 0.0  ;;  %v2058_v56 = vpack.c.bf16 %v1980_v60, %v1979_v2  ;;  %v7878_v60 = vld [vmem:[%s10175_s3 + $0x40] sm:$0xff]   ;;  %v8883_v62 = vld [vmem:[%s10174_s2 + $0x8] ss:$0 sm:$0xff] }
 0x438   : > { %v2057_v10 = vpack.c.bf16 %v1978_v4, %v1977_v61  ;;  %v8891_v4 = vld [vmem:[%s10174_s2 + $0x6] ss:$0 sm:$0xff]  ;;  %v8898_v61 = vld [vmem:[%s10174_s2 + $0x9] ss:$0 sm:$0xff] }
 0x43b   : > { %v7034_v26 = vpop.f32.mrf.mxu0 }
 0x43c   : > { %v1962_v28 = vmul.f32 %v7034_v26, %v6103_v55  ;;  %v8769_v26 = vld [vmem:[%s10178_s6 + $0xc0] sm:$0xff]  }
 0x43d   : > { %v1936_v29 = vpop.f32.mrf.mxu0  ;;  %10260 = vst [vmem:[#allocation33_spill] sm:$0xff] %v8769_v26 }
 0x43e   : > { %v1960_v31 = vmul.f32 %v6103_v55, %v1936_v29  ;;  %v1975_v34 = vadd.f32 %v6104_v32, %v1962_v28  ;;  %v8778_v28 = vld [vmem:[%s10178_s6 + $0xc8] sm:$0xff]   ;;  %v8783_v29 = vld [vmem:[%s10178_s6 + $0xd0] sm:$0xff]  }
 0x43f   : > { %v7035_v48 = vpop.f32.mrf.mxu0  ;;  %10261 = vst [vmem:[#allocation34_spill] sm:$0xff] %v8778_v28  ;;  %10262 = vst [vmem:[#allocation35_spill] sm:$0xff] %v8783_v29 }
 0x440   : > { %v1963_v36 = vmul.f32 %v7035_v48, %v6103_v55  ;;  %v1973_v39 = vadd.f32 %v6104_v32, %v1960_v31  ;;  %v1983_v47 = vmax.f32 %v1975_v34, 0.0  ;;  %v8792_v31 = vld [vmem:[%s10178_s6 + $0xd8] sm:$0xff]   ;;  %v8811_v48 = vld [vmem:[%s10178_s6 + $0xf0] sm:$0xff]  }
 0x441   : > { %v1939_v38 = vpop.f32.mrf.mxu0  ;;  %10263 = vst [vmem:[#allocation36_spill] sm:$0xff] %v8792_v31  ;;  %10266 = vst [vmem:[#allocation39_spill] sm:$0xff] %v8811_v48  ;;  %v8820_v34 = vld [vmem:[%s10178_s6 + $0xf8] sm:$0xff]  }
 0x442   : > { %v1976_v40 = vadd.f32 %v6104_v32, %v1963_v36  ;;  %v1961_v42 = vmul.f32 %v6103_v55, %v1939_v38  ;;  %v1981_v17 = vmax.f32 %v1973_v39, 0.0  ;;  %v8764_v55 = vld [vmem:[%s10178_s6 + $0xb8] sm:$0xff]   ;;  %10267 = vst [vmem:[#allocation40_spill] sm:$0xff] %v8820_v34  ;;  %v8825_v36 = vld [vmem:[%s10178_s6 + $0x100] sm:$0xff]   ;;  %v8839_v38 = vld [vmem:[%s10178_s6 + $0x110] sm:$0xff]  }
 0x443   : > { %10259 = vst [vmem:[#allocation32_spill] sm:$0xff] %v8764_v55  ;;  %10268 = vst [vmem:[#allocation41_spill] sm:$0xff] %v8825_v36  ;;  %v8848_v39 = vld [vmem:[%s10178_s6 + $0x118] sm:$0xff]  }
 0x444   : > { %v1984_v50 = vmax.f32 %v1976_v40, 0.0  ;;  %v1974_v54 = vadd.f32 %v6104_v32, %v1961_v42  ;;  %v8797_v32 = vld [vmem:[%s10178_s6 + $0xe0] sm:$0xff]   ;;  %10270 = vst [vmem:[#allocation43_spill] sm:$0xff] %v8839_v38  ;;  %10271 = vst [vmem:[#allocation44_spill] sm:$0xff] %v8848_v39  ;;  %v7871_v40 = vld [vmem:[%s10175_s3 + $0x78] sm:$0xff]  }
 0x445   : > { %10264 = vst [vmem:[#allocation37_spill] sm:$0xff] %v8797_v32  ;;  %v7872_v42 = vld [vmem:[%s10175_s3 + $0x70] sm:$0xff]  }
 0x446   : > { %v1982_v12 = vmax.f32 %v1974_v54, 0.0  ;;  %v2060_v58 = vpack.c.bf16 %v1984_v50, %v1983_v47  ;;  %v7875_v47 = vld [vmem:[%s10175_s3 + $0x58] sm:$0xff]   ;;  %v7876_v54 = vld [vmem:[%s10175_s3 + $0x50] sm:$0xff]  }
 0x448   : > { %7036 = vmatprep.subr.bf16.mxu0 %v2060_v58  ;;  %v2059_v63 = vpack.c.bf16 %v1982_v12, %v1981_v17  ;;  %v7877_v17 = vld [vmem:[%s10175_s3 + $0x48] sm:$0xff]  }
 0x449   : > { %7037 = vmatpush3.bf16.msra.mxu0 %v2060_v58 }
 0x44a   : > { %7038 = vmatprep.subr.bf16.mxu0 %v2059_v63 }
 0x44d   : > { %7039 = vmatpush3.bf16.msra.mxu0 %v2059_v63 }
 0x44e   : > { %7040 = vmatprep.subr.bf16.mxu0 %v2058_v56 }
 0x451   : > { %7041 = vmatpush3.bf16.msra.mxu0 %v2058_v56 }
 0x452   : > { %7042 = vmatprep.subr.bf16.mxu0 %v2057_v10 }
 0x455   : > { %7043 = vmatpush3.bf16.msra.mxu0 %v2057_v10 }
 0x456   : > { %7116 = vmatprep.subr.bf16.mxu0 %v7871_v40 }
 0x458   : > { %7045 = vmatmul.mubr.msk.bf16.vlgmr.msra.gmra.mxu0 %vm2241_vm0, %v8610_v6 }
 0x459   : > { %7048 = vmatprep.mubr.msk.bf16.mxu0 %vm2241_vm0, %v8615_v30  ;;  %7117 = vmatpush3.bf16.msra.mxu0 %v7871_v40 }
 0x45a   : > { %7118 = vmatprep.subr.bf16.mxu0 %v7872_v42 }
 0x45d   : > { %7119 = vmatpush3.bf16.msra.mxu0 %v7872_v42 }
 0x45e   : > { %7120 = vmatprep.subr.bf16.mxu0 %v7873_v43 }
 0x460   : > { %7049 = vmatmul.mubr.msk.bf16.gmra.mxu0 %vm2241_vm0, %v8624_v52 }
 0x461   : > { %7052 = vmatprep.mubr.msk.bf16.mxu0 %vm2241_vm0, %v8629_v7  ;;  %7121 = vmatpush3.bf16.msra.mxu0 %v7873_v43 }
 0x462   : > { %7122 = vmatprep.subr.bf16.mxu0 %v7874_v46 }
 0x465   : > { %7123 = vmatpush3.bf16.msra.mxu0 %v7874_v46 }
 0x466   : > { %7124 = vmatprep.subr.bf16.mxu0 %v7875_v47 }
 0x468   : > { %7053 = vmatmul.mubr.msk.bf16.gmra.mxu0 %vm2241_vm0, %v8638_v8 }
 0x469   : > { %7056 = vmatprep.mubr.msk.bf16.mxu0 %vm2241_vm0, %v8643_v9  ;;  %7125 = vmatpush3.bf16.msra.mxu0 %v7875_v47 }
 0x46a   : > { %7126 = vmatprep.subr.bf16.mxu0 %v7876_v54 }
 0x46d   : > { %7127 = vmatpush3.bf16.msra.mxu0 %v7876_v54 }
 0x46e   : > { %7128 = vmatprep.subr.bf16.mxu0 %v7877_v17 }
 0x470   : > { %7057 = vmatmul.mubr.msk.bf16.gmra.mxu0 %vm2241_vm0, %v8652_v11 }
 0x471   : > { %7060 = vmatprep.mubr.msk.bf16.mxu0 %vm2241_vm0, %v8657_v15  ;;  %7129 = vmatpush3.bf16.msra.mxu0 %v7877_v17 }
 0x472   : > { %7130 = vmatprep.subr.bf16.mxu0 %v7878_v60 }
 0x475   : > { %7131 = vmatpush3.bf16.msra.mxu0 %v7878_v60 }
 0x478   : > { %7061 = vmatmul.mubr.msk.bf16.gmra.mxu0 %vm2241_vm0, %v8666_v57 }
 0x479   : > { %7064 = vmatprep.mubr.msk.bf16.mxu0 %vm2241_vm0, %v8671_v23 }
 0x480   : > { %7065 = vmatmul.mubr.msk.bf16.gmra.mxu0 %vm2241_vm0, %v8680_v25 }
 0x481   : > { %7068 = vmatprep.mubr.msk.bf16.mxu0 %vm2241_vm0, %v8685_v51 }
 0x488   : > { %7069 = vmatmul.mubr.msk.bf16.gmra.mxu0 %vm2241_vm0, %v8694_v53 }
 0x489   : > { %7072 = vmatprep.mubr.msk.bf16.mxu0 %vm2241_vm0, %v8699_v24 }
 0x490   : > { %7073 = vmatmul.mubr.msk.bf16.gmra.mxu0 %vm2241_vm0, %v8708_v13 }
 0x491   : > { %7076 = vmatprep.mubr.msk.bf16.mxu0 %vm2241_vm0, %v8713_v16 }
 0x498   : > { %7077 = vmatmul.mubr.msk.bf16.gmra.mxu0 %vm2241_vm0, %v8722_v59 }
 0x499   : > { %7080 = vmatprep.mubr.msk.bf16.mxu0 %vm2241_vm0, %v8727_v22 }
 0x4a0   : > { %7081 = vmatmul.mubr.msk.bf16.gmra.mxu0 %vm2241_vm0, %v8736_v41 }
 0x4a1   : > { %7084 = vmatprep.mubr.msk.bf16.mxu0 %vm2241_vm0, %v8741_v0 }
 0x4a8   : > { %7085 = vmatmul.mubr.msk.bf16.gmra.mxu0 %vm2241_vm0, %v8750_v21 }
 0x4a9   : > { %7088 = vmatprep.mubr.msk.bf16.mxu0 %vm2241_vm0, %v8755_v18 }
 0x4b0   : > { %7089 = vmatmul.mubr.msk.bf16.gmra.mxu0 %vm2241_vm0, %v8764_v55 }
 0x4b1   : > { %7092 = vmatprep.mubr.msk.bf16.mxu0 %vm2241_vm0, %v8769_v26 }
 0x4b8   : > { %7093 = vmatmul.mubr.msk.bf16.gmra.mxu0 %vm2241_vm0, %v8778_v28 }
 0x4b9   : > { %7096 = vmatprep.mubr.msk.bf16.mxu0 %vm2241_vm0, %v8783_v29 }
 0x4c0   : > { %7097 = vmatmul.mubr.msk.bf16.gmra.mxu0 %vm2241_vm0, %v8792_v31 }
 0x4c1   : > { %7100 = vmatprep.mubr.msk.bf16.mxu0 %vm2241_vm0, %v8797_v32 }
 0x4c8   : > { %7101 = vmatmul.mubr.msk.bf16.gmra.mxu0 %vm2241_vm0, %v8806_v33 }
 0x4c9   : > { %7104 = vmatprep.mubr.msk.bf16.mxu0 %vm2241_vm0, %v8811_v48 }
 0x4d0   : > { %7105 = vmatmul.mubr.msk.bf16.gmra.mxu0 %vm2241_vm0, %v8820_v34 }
 0x4d1   : > { %7108 = vmatprep.mubr.msk.bf16.mxu0 %vm2241_vm0, %v8825_v36 }
 0x4d8   : > { %7109 = vmatmul.mubr.msk.bf16.gmra.mxu0 %vm2241_vm0, %v8834_v37 }
 0x4d9   : > { %7112 = vmatprep.mubr.msk.bf16.mxu0 %vm2241_vm0, %v8839_v38 }
 0x4e0   : > { %7113 = vmatmul.mubr.msk.bf16.gmra.mxu0 %vm2241_vm0, %v8848_v39 }
 0x518   : > { %v7046_v50 = vpop.f32.mrf.mxu0 }
 0x519   : > { %v2683_v49 = vmul.f32 %v7046_v50, %v8883_v62 }
 0x51a   : > { %v8870_v3 = vpop.f32.mrf.mxu0 }
 0x51b   : > { %v2691_v40 = vadd.f32 %v8891_v4, %v2683_v49  ;;  %v8913_v49 = vld [vmem:[%s10175_s3 + $0xb8] sm:$0xff]   ;;  %v2681_v9 = vmul.f32 %v8883_v62, %v8870_v3 }
 0x51c   : > { %v7047_v27 = vpop.f32.mrf.mxu0  ;;  %10272 = vst [vmem:[#allocation45_spill] sm:$0xff] %v8913_v49  ;;  %7140 = vmatprep.subr.bf16.mxu0 %v8913_v49 }
 0x51d   : > { %v2684_v42 = vmul.f32 %v7047_v27, %v8883_v62  ;;  %v2689_v45 = vadd.f32 %v8891_v4, %v2681_v9  ;;  %v6182_v9 = vld [vmem:[%s10174_s2 + $0xc] ss:$0 sm:$0xff] }
 0x51e   : > { %v8875_v12 = vpop.f32.mrf.mxu0 }
 0x51f   : > { %v2692_v54 = vadd.f32 %v8891_v4, %v2684_v42  ;;  %v2682_v7 = vmul.f32 %v8883_v62, %v8875_v12 }
 0x520   : > { %v7050_v58 = vpop.f32.mrf.mxu0 }
 0x521   : > { %v2687_v17 = vmul.f32 %v7050_v58, %v8883_v62 }
 0x522   : > { %v8885_v63 = vpop.f32.mrf.mxu0 }
 0x523   : > { %v2685_v52 = vmul.f32 %v8883_v62, %v8885_v63 }
 0x524   : > { %v7051_v2 = vpop.f32.mrf.mxu0 }
 0x526   : > { %v8893_v56 = vpop.f32.mrf.mxu0 }
 0x527   : > { %v2686_v30 = vmul.f32 %v8883_v62, %v8893_v56  ;;  %v2690_v56 = vadd.f32 %v8891_v4, %v2682_v7 }
 0x528   : > { %v7054_v10 = vpop.f32.mrf.mxu0 }
 0x529   : > { %v2704_v43 = vmul.f32 %v7054_v10, %v8898_v61  ;;  %v2695_v10 = vadd.f32 %v8891_v4, %v2687_v17 }
 0x52a   : > { %v8903_v46 = vpop.f32.mrf.mxu0 }
 0x52b   : > { %v2712_v47 = vadd.f32 %v2704_v43, %v2691_v40  ;;  %v2688_v40 = vmul.f32 %v7051_v2, %v8883_v62  ;;  %v2702_v6 = vmul.f32 %v8898_v61, %v8903_v46  ;;  %v2693_v46 = vadd.f32 %v8891_v4, %v2685_v52 }
 0x52c   : > { %v7055_v50 = vpop.f32.mrf.mxu0 }
 0x52d   : > { %v2705_v60 = vmul.f32 %v7055_v50, %v8898_v61  ;;  %v2696_v37 = vadd.f32 %v8891_v4, %v2688_v40 }
 0x52e   : > { %v8908_v39 = vpop.f32.mrf.mxu0 }
 0x52f   : > { %v2713_v27 = vadd.f32 %v2705_v60, %v2692_v54  ;;  %v8928_v54 = vld [vmem:[%s10174_s2 + $0xa] ss:$0 sm:$0xff]  ;;  %v2703_v14 = vmul.f32 %v8898_v61, %v8908_v39 }
 0x530   : > { %v7058_v38 = vpop.f32.mrf.mxu0 }
 0x531   : > { %v2708_v42 = vmul.f32 %v7058_v38, %v8898_v61  ;;  %v2711_v52 = vadd.f32 %v2703_v14, %v2690_v56  ;;  %v6183_v14 = vld [vmem:[%s10174_s2 + $0xd] ss:$0 sm:$0xff] }
 0x532   : > { %v8919_v58 = vpop.f32.mrf.mxu0 }
 0x533   : > { %v2716_v43 = vadd.f32 %v2708_v42, %v2695_v10  ;;  %v2706_v3 = vmul.f32 %v8898_v61, %v8919_v58 }
 0x534   : > { %v7059_v50 = vpop.f32.mrf.mxu0 }
 0x535   : > { %v2709_v36 = vmul.f32 %v7059_v50, %v8898_v61  ;;  %v2714_v19 = vadd.f32 %v2706_v3, %v2693_v46 }
 0x536   : > { %v8923_v34 = vpop.f32.mrf.mxu0 }
 0x537   : > { %v2717_v17 = vadd.f32 %v2709_v36, %v2696_v37  ;;  %v2707_v12 = vmul.f32 %v8898_v61, %v8923_v34  ;;  %v2694_v34 = vadd.f32 %v8891_v4, %v2686_v30  ;;  %v2710_v61 = vadd.f32 %v2702_v6, %v2689_v45 }
 0x538   : > { %v7062_v60 = vpop.f32.mrf.mxu0 }
 0x539   : > { %v2725_v2 = vmul.f32 %v7062_v60, %v8928_v54 }
 0x53a   : > { %v8931_v38 = vpop.f32.mrf.mxu0 }
 0x53b   : > { %v2733_v48 = vadd.f32 %v2725_v2, %v2712_v47  ;;  %v8945_v47 = vld [vmem:[%s10174_s2 + $0xb] ss:$0 sm:$0xff]  ;;  %v2723_v63 = vmul.f32 %v8928_v54, %v8931_v38 }
 0x53c   : > { %v7063_v10 = vpop.f32.mrf.mxu0 }
 0x53d   : > { %v2726_v42 = vmul.f32 %v7063_v10, %v8928_v54  ;;  %v2731_v20 = vadd.f32 %v2723_v63, %v2710_v61 }
 0x53e   : > { %v8934_v40 = vpop.f32.mrf.mxu0 }
 0x53f   : > { %v2734_v50 = vadd.f32 %v2726_v42, %v2713_v27  ;;  %v2724_v5 = vmul.f32 %v8928_v54, %v8934_v40 }
 0x540   : > { %v7066_v33 = vpop.f32.mrf.mxu0 }
 0x541   : > { %v2729_v32 = vmul.f32 %v7066_v33, %v8928_v54  ;;  %v2732_v45 = vadd.f32 %v2724_v5, %v2711_v52 }
 0x542   : > { %v8937_v31 = vpop.f32.mrf.mxu0 }
 0x543   : > { %v2737_v29 = vadd.f32 %v2729_v32, %v2716_v43  ;;  %v2727_v39 = vmul.f32 %v8928_v54, %v8937_v31  ;;  %v2715_v31 = vadd.f32 %v2707_v12, %v2694_v34 }
 0x544   : > { %v7067_v28 = vpop.f32.mrf.mxu0 }
 0x545   : > { %v2730_v36 = vmul.f32 %v7067_v28, %v8928_v54  ;;  %v2735_v6 = vadd.f32 %v2727_v39, %v2714_v19  ;;  %v9071_v39 = vld [vmem:[%s10174_s2 + $0x10] ss:$0 sm:$0xff] }
 0x546   : > { %v8940_v37 = vpop.f32.mrf.mxu0 }
 0x547   : > { %v2738_v60 = vadd.f32 %v2730_v36, %v2717_v17  ;;  %v2728_v58 = vmul.f32 %v8928_v54, %v8940_v37 }
 0x548   : > { %v7070_v2 = vpop.f32.mrf.mxu0 }
 0x549   : > { %v2746_v27 = vmul.f32 %v7070_v2, %v8945_v47  ;;  %v2736_v54 = vadd.f32 %v2728_v58, %v2715_v31 }
 0x54a   : > { %v2480_v10 = vpop.f32.mrf.mxu0 }
 0x54b   : > { %v8948_v42 = vadd.f32 %v2746_v27, %v2733_v48  ;;  %v2744_v7 = vmul.f32 %v8945_v47, %v2480_v10 }
 0x54c   : > { %v7071_v33 = vpop.f32.mrf.mxu0 }
 0x54d   : > { %v2747_v32 = vmul.f32 %v7071_v33, %v8945_v47  ;;  %v2752_v37 = vadd.f32 %v2744_v7, %v2731_v20 }
 0x54e   : > { %v2483_v43 = vpop.f32.mrf.mxu0 }
 0x54f   : > { %v8951_v26 = vadd.f32 %v2747_v32, %v2734_v50  ;;  %v2745_v40 = vmul.f32 %v8945_v47, %v2483_v43 }
 0x550   : > { %v7074_v28 = vpop.f32.mrf.mxu0 }
 0x551   : > { %v2750_v55 = vmul.f32 %v7074_v28, %v8945_v47 }
 0x552   : > { %v2496_v18 = vpop.f32.mrf.mxu0 }
 0x553   : > { %v8954_v21 = vadd.f32 %v2750_v55, %v2737_v29  ;;  %v2748_v44 = vmul.f32 %v8945_v47, %v2496_v18  ;;  %v2753_v18 = vadd.f32 %v2745_v40, %v2732_v45 }
 0x554   : > { %v7075_v0 = vpop.f32.mrf.mxu0 }
 0x555   : > { %v2751_v17 = vmul.f32 %v7075_v0, %v8945_v47  ;;  %v2756_v3 = vadd.f32 %v2748_v44, %v2735_v6 }
 0x556   : > { %v2499_v36 = vpop.f32.mrf.mxu0 }
 0x557   : > { %v8957_v2 = vadd.f32 %v2751_v17, %v2738_v60  ;;  %v2749_v35 = vmul.f32 %v8945_v47, %v2499_v36 }
 0x558   : > { %v7078_v48 = vpop.f32.mrf.mxu0 }
 0x559   : > { %v2767_v49 = vmul.f32 %v7078_v48, %v6182_v9  ;;  %v2757_v48 = vadd.f32 %v2749_v35, %v2736_v54 }
 0x55a   : > { %v2512_v27 = vpop.f32.mrf.mxu0 }
 0x55b   : > { %v2765_v30 = vmul.f32 %v6182_v9, %v2512_v27  ;;  %v2775_v19 = vadd.f32 %v2767_v49, %v8948_v42 }
 0x55c   : > { %v7079_v41 = vpop.f32.mrf.mxu0 }
 0x55d   : > { %v2768_v4 = vmul.f32 %v7079_v41, %v6182_v9  ;;  %v2773_v27 = vadd.f32 %v2765_v30, %v2752_v37 }
 0x55e   : > { %v2515_v22 = vpop.f32.mrf.mxu0 }
 0x55f   : > { %v2766_v10 = vmul.f32 %v6182_v9, %v2515_v22  ;;  %v6184_v22 = vld [vmem:[%s10174_s2 + $0xe] ss:$0 sm:$0xff]  ;;  %v2776_v12 = vadd.f32 %v2768_v4, %v8951_v26 }
 0x560   : > { %v8959_v33 = vpop.f32.mrf.mxu0 }
 0x561   : > { %v2771_v47 = vmul.f32 %v8959_v33, %v6182_v9 }
 0x562   : > { %v8961_v50 = vpop.f32.mrf.mxu0 }
 0x563   : > { %v2769_v36 = vmul.f32 %v6182_v9, %v8961_v50  ;;  %v2774_v50 = vadd.f32 %v2766_v10, %v2753_v18  ;;  %v2779_v63 = vadd.f32 %v2771_v47, %v8954_v21 }
 0x564   : > { %v8963_v32 = vpop.f32.mrf.mxu0 }
 0x565   : > { %v2772_v5 = vmul.f32 %v8963_v32, %v6182_v9  ;;  %v6185_v32 = vld [vmem:[%s10174_s2 + $0xf] ss:$0 sm:$0xff]  ;;  %v2777_v56 = vadd.f32 %v2769_v36, %v2756_v3 }
 0x566   : > { %v8965_v28 = vpop.f32.mrf.mxu0 }
 0x567   : > { %v2770_v20 = vmul.f32 %v6182_v9, %v8965_v28 }
 0x568   : > { %v8967_v55 = vpop.f32.mrf.mxu0 }
 0x569   : > { %v2788_v44 = vmul.f32 %v8967_v55, %v6183_v14  ;;  %v2778_v46 = vadd.f32 %v2770_v20, %v2757_v48 }
 0x56a   : > { %v8969_v29 = vpop.f32.mrf.mxu0 }
 0x56b   : > { %v2786_v35 = vmul.f32 %v6183_v14, %v8969_v29  ;;  %v2796_v9 = vadd.f32 %v2788_v44, %v2775_v19 }
 0x56c   : > { %v8971_v0 = vpop.f32.mrf.mxu0 }
 0x56d   : > { %v2789_v33 = vmul.f32 %v8971_v0, %v6183_v14  ;;  %v2780_v0 = vadd.f32 %v2772_v5, %v8957_v2  ;;  %v2794_v61 = vadd.f32 %v2786_v35, %v2773_v27 }
 0x56e   : > { %v8973_v60 = vpop.f32.mrf.mxu0 }
 0x56f   : > { %v2787_v49 = vmul.f32 %v6183_v14, %v8973_v60  ;;  %v2797_v21 = vadd.f32 %v2789_v33, %v2776_v12 }
 0x570   : > { %v8975_v17 = vpop.f32.mrf.mxu0 }
 0x571   : > { %v2792_v42 = vmul.f32 %v8975_v17, %v6183_v14 }
 0x572   : > { %v8977_v59 = vpop.f32.mrf.mxu0 }
 0x573   : > { %v2800_v58 = vadd.f32 %v2792_v42, %v2779_v63  ;;  %v2790_v31 = vmul.f32 %v6183_v14, %v8977_v59 }
 0x574   : > { %v8979_v16 = vpop.f32.mrf.mxu0 }
 0x575   : > { %v2793_v45 = vmul.f32 %v8979_v16, %v6183_v14 }
 0x576   : > { %v8981_v13 = vpop.f32.mrf.mxu0 }
 0x577   : > { %v2801_v48 = vadd.f32 %v2793_v45, %v2780_v0 }
 0x578   : > { %v8983_v24 = vpop.f32.mrf.mxu0 }
 0x579   : > { %v2809_v26 = vmul.f32 %v8983_v24, %v6184_v22 }
 0x57a   : > { %v8985_v53 = vpop.f32.mrf.mxu0 }
 0x57b   : > { %v2807_v29 = vmul.f32 %v6184_v22, %v8985_v53  ;;  %v2817_v53 = vadd.f32 %v2809_v26, %v2796_v9 }
 0x57c   : > { %v8987_v51 = vpop.f32.mrf.mxu0 }
 0x57d   : > { %v2810_v55 = vmul.f32 %v8987_v51, %v6184_v22  ;;  %v2795_v51 = vadd.f32 %v2787_v49, %v2774_v50  ;;  %v2815_v6 = vadd.f32 %v2807_v29, %v2794_v61 }
 0x57e   : > { %v8989_v25 = vpop.f32.mrf.mxu0 }
 0x57f   : > { %v2808_v60 = vmul.f32 %v6184_v22, %v8989_v25  ;;  %v2818_v52 = vadd.f32 %v2810_v55, %v2797_v21  ;;  %v10275_v21 = vld [vmem:[#allocation45_spill] sm:$0xff] }
 0x580   : > { %v8991_v23 = vpop.f32.mrf.mxu0 }
 0x581   : > { %v2816_v30 = vadd.f32 %v2808_v60, %v2795_v51  ;;  %v2813_v10 = vmul.f32 %v8991_v23, %v6184_v22 }
 0x582   : > { %v8993_v57 = vpop.f32.mrf.mxu0 }
 0x583   : > { %v2811_v19 = vmul.f32 %v6184_v22, %v8993_v57  ;;  %v2821_v50 = vadd.f32 %v2813_v10, %v2800_v58 }
 0x584   : > { %v8995_v15 = vpop.f32.mrf.mxu0 }
 0x586   : > { %v8997_v11 = vpop.f32.mrf.mxu0 }
 0x587   : > { %10273 = vst [vmem:[#allocation46_spill] sm:$0xff] %v8997_v11 }
 0x588   : > { %v9001_v8 = vpop.f32.mrf.mxu0 }
 0x589   : > { %v2830_v34 = vmul.f32 %v9001_v8, %v6185_v32 }
 0x58a   : > { %v9011_v1 = vpop.f32.mrf.mxu0 }
 0x58b   : > { %v2828_v2 = vmul.f32 %v6185_v32, %v9011_v1  ;;  %v2838_v8 = vadd.f32 %v2830_v34, %v2817_v53  ;;  %v2791_v1 = vmul.f32 %v6183_v14, %v8981_v13  ;;  %v7881_v34 = vld [vmem:[%s10175_s3 + $0xa8] sm:$0xff]  }
 0x58c   : > { %v7103_v62 = vpop.f32.mrf.mxu0  ;;  %v7885_v53 = vld [vmem:[%s10175_s3 + $0x88] sm:$0xff]  }
 0x58d   : > { %v2831_v24 = vmul.f32 %v7103_v62, %v6185_v32  ;;  %v2836_v18 = vadd.f32 %v2828_v2, %v2815_v6  ;;  %v2799_v33 = vadd.f32 %v2791_v1, %v2778_v46  ;;  %v7883_v2 = vld [vmem:[%s10175_s3 + $0x98] sm:$0xff]   ;;  %v6212_v1 = vld [vmem:[%s10174_s2 + $0x11] ss:$0 sm:$0xff] }
 0x58e   : > { %v2611_v38 = vpop.f32.mrf.mxu0  ;;  %v10274_v5 = vld [vmem:[#allocation46_spill] sm:$0xff] }
 0x58f   : > { %v2829_v25 = vmul.f32 %v6185_v32, %v2611_v38  ;;  %v2839_v62 = vadd.f32 %v2831_v24, %v2818_v52  ;;  %v2814_v38 = vmul.f32 %v8995_v15, %v6184_v22  ;;  %v2812_v20 = vmul.f32 %v6184_v22, %v10274_v5  ;;  %v7886_v52 = vld [vmem:[%s10175_s3 + $0x80] sm:$0xff]  }
 0x590   : > { %v9038_v11 = vpop.f32.mrf.mxu0  ;;  %v2798_v15 = vadd.f32 %v2790_v31, %v2777_v56 }
 0x591   : > { %v2837_v59 = vadd.f32 %v2829_v25, %v2816_v30  ;;  %v2834_v27 = vmul.f32 %v9038_v11, %v6185_v32  ;;  %v2822_v42 = vadd.f32 %v2814_v38, %v2801_v48  ;;  %v2820_v22 = vadd.f32 %v2812_v20, %v2799_v33  ;;  %v7880_v11 = vld [vmem:[%s10175_s3 + $0xb0] sm:$0xff]   ;;  %v6203_v25 = vld [vmem:[%s10174_s2 + $0x7] ss:$0 sm:$0xff]  ;;  %v10278_v38 = vld [vmem:[#allocation5_spill] sm:$0xff] }
 0x592   : > { %v9043_v43 = vpop.f32.mrf.mxu0  ;;  %v2819_v55 = vadd.f32 %v2811_v19, %v2798_v15  ;;  %v10279_v48 = vld [vmem:[#allocation3_spill] sm:$0xff]  ;;  %v6213_v20 = vld [vmem:[%s10174_s2 + $0x12] ss:$0 sm:$0xff] }
 0x593   : > { %v2832_v35 = vmul.f32 %v6185_v32, %v9043_v43  ;;  %v10280_v33 = vld [vmem:[#allocation8_spill] sm:$0xff] }
 0x594   : > { %v7107_v41 = vpop.f32.mrf.mxu0 }
 0x595   : > { %v2835_v13 = vmul.f32 %v7107_v41, %v6185_v32  ;;  %v2842_v41 = vadd.f32 %v2834_v27, %v2821_v50  ;;  %v2840_v43 = vadd.f32 %v2832_v35, %v2819_v55  ;;  %v10281_v35 = vld [vmem:[#allocation6_spill] sm:$0xff]  ;;  %v10282_v55 = vld [vmem:[#allocation9_spill] sm:$0xff] }
 0x596   : > { %v2627_v28 = vpop.f32.mrf.mxu0 }
 0x597   : > { %v2833_v63 = vmul.f32 %v6185_v32, %v2627_v28  ;;  %v2843_v29 = vadd.f32 %v2835_v13, %v2822_v42 }
 0x598   : > { %v7110_v17 = vpop.f32.mrf.mxu0 }
 0x599   : > { %v2851_v40 = vmul.f32 %v7110_v17, %v9071_v39  ;;  %v2841_v32 = vadd.f32 %v2833_v63, %v2820_v22 }
 0x59a   : > { %v2640_v7 = vpop.f32.mrf.mxu0 }
 0x59b   : > { %v2849_v54 = vmul.f32 %v9071_v39, %v2640_v7  ;;  %v2859_v47 = vadd.f32 %v2851_v40, %v2838_v8  ;;  %v7884_v7 = vld [vmem:[%s10175_s3 + $0x90] sm:$0xff]  }
 0x59c   : > { %v7111_v4 = vpop.f32.mrf.mxu0 }
 0x59d   : > { %v2852_v37 = vmul.f32 %v7111_v4, %v9071_v39  ;;  %v2857_v14 = vadd.f32 %v2849_v54, %v2836_v18  ;;  %v10276_v4 = vld [vmem:[#allocation4_spill] sm:$0xff] }
 0x59e   : > { %v2643_v3 = vpop.f32.mrf.mxu0 }
 0x59f   : > { %v2860_v16 = vadd.f32 %v2852_v37, %v2839_v62  ;;  %v2850_v36 = vmul.f32 %v9071_v39, %v2643_v3  ;;  %v10277_v62 = vld [vmem:[#allocation2_spill] sm:$0xff] }
 0x5a0   : > { %v7114_v12 = vpop.f32.mrf.mxu0 }
 0x5a1   : > { %v2866_v23 = vpack.c.bf16 %v2860_v16, %v2859_v47  ;;  %v2858_v44 = vadd.f32 %v2850_v36, %v2837_v59  ;;  %v2855_v26 = vmul.f32 %v7114_v12, %v9071_v39 }
 0x5a2   : > { %v2656_v49 = vpop.f32.mrf.mxu0 }
 0x5a3   : > { %v2865_v57 = vpack.c.bf16 %v2858_v44, %v2857_v14  ;;  %v2853_v56 = vmul.f32 %v9071_v39, %v2656_v49  ;;  %v2863_v28 = vadd.f32 %v2855_v26, %v2842_v41 }
 0x5a4   : > { %v7115_v0 = vpop.f32.mrf.mxu0 }
 0x5a5   : > { %v2856_v46 = vmul.f32 %v7115_v0, %v9071_v39  ;;  %7132 = vmatprep.mubr.bf16.mxu0 %v2865_v57  ;;  %v2861_v24 = vadd.f32 %v2853_v56, %v2840_v43 }
 0x5a6   : > { %v2659_v60 = vpop.f32.mrf.mxu0  ;;  %7133 = vmatmul.mubr.bf16.vlgmr.msra.gmra.mxu0 %v2866_v23 }
 0x5a7   : > { %v2864_v17 = vadd.f32 %v2856_v46, %v2843_v29  ;;  %v2854_v9 = vmul.f32 %v9071_v39, %v2659_v60  ;;  %7141 = vmatpush3.bf16.msra.mxu0 %v10275_v21  ;;  %v7882_v39 = vld [vmem:[%s10175_s3 + $0xa0] sm:$0xff]   ;;  %v10284_v60 = vld [vmem:[#allocation7_spill] sm:$0xff] }
 0x5a8   : > { %7142 = vmatprep.subr.bf16.mxu0 %v7880_v11 }
 0x5a9   : > { %v2868_v61 = vpack.c.bf16 %v2864_v17, %v2863_v28  ;;  %v2862_v51 = vadd.f32 %v2854_v9, %v2841_v32 }
 0x5ab   : > { %v2867_v58 = vpack.c.bf16 %v2862_v51, %v2861_v24  ;;  %7143 = vmatpush3.bf16.msra.mxu0 %v7880_v11 }
 0x5ac   : > { %7144 = vmatprep.subr.bf16.mxu0 %v7881_v34 }
 0x5ad   : > { %7136 = vmatprep.mubr.bf16.mxu0 %v2867_v58 }
 0x5ae   : > { %7137 = vmatmul.mubr.bf16.gmra.mxu0 %v2868_v61 }
 0x5af   : > { %7145 = vmatpush3.bf16.msra.mxu0 %v7881_v34 }
 0x5b0   : > { %7146 = vmatprep.subr.bf16.mxu0 %v7882_v39 }
 0x5b3   : > { %7147 = vmatpush3.bf16.msra.mxu0 %v7882_v39 }
 0x5b4   : > { %7148 = vmatprep.subr.bf16.mxu0 %v7883_v2 }
 0x5b7   : > { %7149 = vmatpush3.bf16.msra.mxu0 %v7883_v2 }
 0x5b8   : > { %7150 = vmatprep.subr.bf16.mxu0 %v7884_v7 }
 0x5bb   : > { %7151 = vmatpush3.bf16.msra.mxu0 %v7884_v7 }
 0x5bc   : > { %7152 = vmatprep.subr.bf16.mxu0 %v7885_v53 }
 0x5bf   : > { %7153 = vmatpush3.bf16.msra.mxu0 %v7885_v53 }
 0x5c0   : > { %7154 = vmatprep.subr.bf16.mxu0 %v7886_v52 }
 0x5c3   : > { %7155 = vmatpush3.bf16.msra.mxu0 %v7886_v52 }
 0x666   : > { %v7134_v40 = vpop.f32.mrf.mxu0 }
 0x667   : > { %v2982_v31 = vadd.f32 %v7134_v40, %v6203_v25 }
 0x668   : > { %v2973_v45 = vpop.f32.mrf.mxu0 }
 0x669   : > { %v2974_v6 = vadd.f32 %v6203_v25, %v2973_v45  ;;  %v9118_v8 = vadd.f32 %v2982_v31, %v10276_v4  ;;  %v6238_v45 = vld [vmem:[%s10174_s2 + $0x13] ss:$0 sm:$0xff] }
 0x66a   : > { %v7135_v30 = vpop.f32.mrf.mxu0 }
 0x66b   : > { %v9121_v54 = vadd.f32 %v2974_v6, %v10277_v62  ;;  %v2985_v37 = vadd.f32 %v7135_v30, %v6203_v25  ;;  %v3019_v16 = vmul.f32 %v6212_v1, %v9118_v8 }
 0x66c   : > { %v2976_v10 = vpop.f32.mrf.mxu0 }
 0x66d   : > { %v9127_v18 = vadd.f32 %v2985_v37, %v10278_v38  ;;  %v2977_v3 = vadd.f32 %v6203_v25, %v2976_v10  ;;  %v3017_v59 = vmul.f32 %v6212_v1, %v9121_v54  ;;  %v3032_v15 = vadd.f32 %v6213_v20, %v3019_v16  ;;  %v6239_v37 = vld [vmem:[%s10174_s2 + $0x14] ss:$0 sm:$0xff] }
 0x66e   : > { %v7138_v47 = vpop.f32.mrf.mxu0 }
 0x66f   : > { %v3020_v36 = vmul.f32 %v6212_v1, %v9127_v18  ;;  %v9133_v19 = vadd.f32 %v2977_v3, %v10279_v48  ;;  %v2998_v5 = vadd.f32 %v7138_v47, %v6203_v25  ;;  %v3030_v44 = vadd.f32 %v6213_v20, %v3017_v59 }
 0x670   : > { %v2989_v27 = vpop.f32.mrf.mxu0  ;;  %v3040_v56 = vmax.f32 %v3032_v15, 0.0 }
 0x671   : > { %v3033_v12 = vadd.f32 %v6213_v20, %v3020_v36  ;;  %v3018_v13 = vmul.f32 %v6212_v1, %v9133_v19  ;;  %v2990_v14 = vadd.f32 %v6203_v25, %v2989_v27  ;;  %v9140_v50 = vadd.f32 %v2998_v5, %v10280_v33 }
 0x672   : > { %v7139_v23 = vpop.f32.mrf.mxu0  ;;  %v3038_v41 = vmax.f32 %v3030_v44, 0.0 }
 0x673   : > { %v9143_v49 = vadd.f32 %v2990_v14, %v10281_v35  ;;  %v3001_v42 = vadd.f32 %v7139_v23, %v6203_v25  ;;  %v3031_v26 = vadd.f32 %v6213_v20, %v3018_v13  ;;  %v3041_v57 = vmax.f32 %v3033_v12, 0.0 }
 0x674   : > { %v2992_v63 = vpop.f32.mrf.mxu0  ;;  %v3023_v46 = vmul.f32 %v6212_v1, %v9140_v50 }
 0x675   : > { %v9146_v22 = vadd.f32 %v3001_v42, %v10282_v55  ;;  %v3021_v0 = vmul.f32 %v6212_v1, %v9143_v49  ;;  %v2993_v11 = vadd.f32 %v6203_v25, %v2992_v63  ;;  %v3039_v29 = vmax.f32 %v3031_v26, 0.0 }
 0x676   : > { %v3047_v17 = vpack.c.bf16 %v3041_v57, %v3040_v56  ;;  %v3036_v24 = vadd.f32 %v6213_v20, %v3023_v46  ;;  %v10287_v56 = vld [vmem:[#allocation11_spill] sm:$0xff]  ;;  %v10288_v46 = vld [vmem:[#allocation12_spill] sm:$0xff] }
 0x677   : > { %10283 = vst [vmem:[#allocation46_spill] sm:$0xff] %v9146_v22  ;;  %v3024_v43 = vmul.f32 %v6212_v1, %v9146_v22  ;;  %v9152_v32 = vadd.f32 %v2993_v11, %v10284_v60  ;;  %v3046_v28 = vpack.c.bf16 %v3039_v29, %v3038_v41  ;;  %v3034_v34 = vadd.f32 %v6213_v20, %v3021_v0  ;;  %v10286_v29 = vld [vmem:[#allocation10_spill] sm:$0xff] }
 0x678   : > { %v3044_v2 = vmax.f32 %v3036_v24, 0.0  ;;  %v10290_v60 = vld [vmem:[#allocation14_spill] sm:$0xff]  ;;  %v10296_v24 = vld [vmem:[#allocation20_spill] sm:$0xff] }
 0x679   : > { %10285 = vst [vmem:[#allocation45_spill] sm:$0xff] %v9152_v32  ;;  %v3037_v9 = vadd.f32 %v6213_v20, %v3024_v43  ;;  %v3022_v21 = vmul.f32 %v6212_v1, %v9152_v32  ;;  %7156 = vmatprep.mubr.bf16.mxu0 %v3046_v28  ;;  %v3042_v58 = vmax.f32 %v3034_v34, 0.0  ;;  %v10289_v43 = vld [vmem:[#allocation13_spill] sm:$0xff]  ;;  %v10291_v28 = vld [vmem:[#allocation15_spill] sm:$0xff] }
 0x67a   : > { %7157 = vmatmul.mubr.bf16.vlgmr.msra.gmra.mxu0 %v3047_v17  ;;  %v10292_v17 = vld [vmem:[#allocation16_spill] sm:$0xff]  ;;  %v10295_v34 = vld [vmem:[#allocation19_spill] sm:$0xff] }
 0x67b   : > { %v3035_v61 = vadd.f32 %v6213_v20, %v3022_v21  ;;  %v3045_v51 = vmax.f32 %v3037_v9, 0.0  ;;  %v10293_v9 = vld [vmem:[#allocation17_spill] sm:$0xff]  ;;  %v10294_v21 = vld [vmem:[#allocation18_spill] sm:$0xff] }
 0x67d   : > { %v3043_v39 = vmax.f32 %v3035_v61, 0.0  ;;  %v3049_v53 = vpack.c.bf16 %v3045_v51, %v3044_v2  ;;  %v10297_v61 = vld [vmem:[#allocation21_spill] sm:$0xff]  ;;  %v10298_v51 = vld [vmem:[#allocation22_spill] sm:$0xff] }
 0x67e   : > { %v10301_v2 = vld [vmem:[#allocation25_spill] sm:$0xff] }
 0x67f   : > { %v3048_v7 = vpack.c.bf16 %v3043_v39, %v3042_v58  ;;  %v10299_v58 = vld [vmem:[#allocation23_spill] sm:$0xff]  ;;  %v10300_v39 = vld [vmem:[#allocation24_spill] sm:$0xff] }
 0x681   : > { %7160 = vmatprep.mubr.bf16.mxu0 %v3048_v7  ;;  %v10302_v7 = vld [vmem:[#allocation26_spill] sm:$0xff] }
 0x682   : > { %7161 = vmatmul.mubr.bf16.gmra.mxu0 %v3049_v53  ;;  %v10303_v53 = vld [vmem:[#allocation27_spill] sm:$0xff] }
 0x73a   : > { %v7158_v52 = vpop.f32.mrf.mxu0 }
 0x73b   : > { %v3187_v59 = vmul.f32 %v7158_v52, %v6238_v45  ;;  %v10304_v52 = vld [vmem:[#allocation28_spill] sm:$0xff] }
 0x73c   : > { %v3149_v25 = vpop.f32.mrf.mxu0 }
 0x73d   : > { %v3200_v14 = vadd.f32 %v6239_v37, %v3187_v59  ;;  %v3185_v23 = vmul.f32 %v6238_v45, %v3149_v25  ;;  %v10305_v25 = vld [vmem:[#allocation29_spill] sm:$0xff]  ;;  %v10318_v59 = vld [vmem:[#allocation42_spill] sm:$0xff] }
 0x73e   : > { %v7159_v40 = vpop.f32.mrf.mxu0 }
 0x73f   : > { %v3188_v1 = vmul.f32 %v7159_v40, %v6238_v45  ;;  %v3208_v26 = vmax.f32 %v3200_v14, 0.0  ;;  %v3198_v57 = vadd.f32 %v6239_v37, %v3185_v23  ;;  %v10306_v40 = vld [vmem:[#allocation30_spill] sm:$0xff] }
 0x740   : > { %v3152_v31 = vpop.f32.mrf.mxu0 }
 0x741   : > { %v3201_v5 = vadd.f32 %v6239_v37, %v3188_v1  ;;  %v3186_v20 = vmul.f32 %v6238_v45, %v3152_v31  ;;  %v3206_v11 = vmax.f32 %v3198_v57, 0.0  ;;  %v10307_v31 = vld [vmem:[#allocation31_spill] sm:$0xff]  ;;  %v10314_v1 = vld [vmem:[#allocation38_spill] sm:$0xff] }
 0x742   : > { %v7162_v6 = vpop.f32.mrf.mxu0 }
 0x743   : > { %v3191_v30 = vmul.f32 %v7162_v6, %v6238_v45  ;;  %v3209_v35 = vmax.f32 %v3201_v5, 0.0  ;;  %v3199_v42 = vadd.f32 %v6239_v37, %v3186_v20  ;;  %v10309_v6 = vld [vmem:[#allocation33_spill] sm:$0xff]  ;;  %v7889_v5 = vld [vmem:[%s10175_s3 + $0xe8] sm:$0xff]   ;;  %v7890_v20 = vld [vmem:[%s10175_s3 + $0xe0] sm:$0xff]  }
 0x744   : > { %v3165_v4 = vpop.f32.mrf.mxu0 }
 0x745   : > { %v3189_v62 = vmul.f32 %v6238_v45, %v3165_v4  ;;  %v3204_v38 = vadd.f32 %v6239_v37, %v3191_v30  ;;  %v3207_v55 = vmax.f32 %v3199_v42, 0.0  ;;  %v3215_v0 = vpack.c.bf16 %v3209_v35, %v3208_v26  ;;  %v10310_v30 = vld [vmem:[#allocation34_spill] sm:$0xff]  ;;  %v10311_v4 = vld [vmem:[#allocation35_spill] sm:$0xff]  ;;  %v6277_v42 = vld [vmem:[%s10174_s2 + $0x17] ss:$0 sm:$0xff] }
 0x746   : > { %v7163_v10 = vpop.f32.mrf.mxu0  ;;  %v7894_v35 = vld [vmem:[%s10175_s3 + $0xc0] sm:$0xff]  }
 0x747   : > { %v3192_v3 = vmul.f32 %v7163_v10, %v6238_v45  ;;  %v3202_v16 = vadd.f32 %v6239_v37, %v3189_v62  ;;  %v3212_v27 = vmax.f32 %v3204_v38, 0.0  ;;  %v3214_v41 = vpack.c.bf16 %v3207_v55, %v3206_v11  ;;  %v10312_v62 = vld [vmem:[#allocation36_spill] sm:$0xff]  ;;  %v10315_v10 = vld [vmem:[#allocation39_spill] sm:$0xff]  ;;  %v6278_v11 = vld [vmem:[%s10174_s2 + $0x18] ss:$0 sm:$0xff] }
 0x748   : > { %v3168_v47 = vpop.f32.mrf.mxu0  ;;  %v10316_v38 = vld [vmem:[#allocation40_spill] sm:$0xff] }
 0x749   : > { %v3205_v36 = vadd.f32 %v6239_v37, %v3192_v3  ;;  %v3190_v48 = vmul.f32 %v6238_v45, %v3168_v47  ;;  %v3210_v44 = vmax.f32 %v3202_v16, 0.0  ;;  %v10308_v45 = vld [vmem:[#allocation32_spill] sm:$0xff]  ;;  %v10317_v3 = vld [vmem:[#allocation41_spill] sm:$0xff]  ;;  %v10319_v47 = vld [vmem:[#allocation43_spill] sm:$0xff] }
 0x74a   : > { %v10320_v16 = vld [vmem:[#allocation44_spill] sm:$0xff] }
 0x74b   : > { %v3213_v12 = vmax.f32 %v3205_v36, 0.0  ;;  %v3203_v13 = vadd.f32 %v6239_v37, %v3190_v48  ;;  %v10313_v37 = vld [vmem:[#allocation37_spill] sm:$0xff]  ;;  %v7888_v48 = vld [vmem:[%s10175_s3 + $0xf0] sm:$0xff]  }
 0x74c   : > { %v7887_v36 = vld [vmem:[%s10175_s3 + $0xf8] sm:$0xff]   ;;  %v6276_v55 = vld [vmem:[%s10174_s2 + $0x15] ss:$0 sm:$0xff] }
 0x74d   : > { %v3211_v15 = vmax.f32 %v3203_v13, 0.0  ;;  %v3217_v33 = vpack.c.bf16 %v3213_v12, %v3212_v27  ;;  %7244 = vmatprep.subr.bf16.mxu0 %v7887_v36  ;;  %v7891_v27 = vld [vmem:[%s10175_s3 + $0xd8] sm:$0xff]   ;;  %v7892_v13 = vld [vmem:[%s10175_s3 + $0xd0] sm:$0xff]  }
 0x74e   : > { %7245 = vmatpush3.bf16.msra.mxu0 %v7887_v36  ;;  %v6279_v36 = vld [vmem:[%s10174_s2 + $0x19] ss:$0 sm:$0xff] }
 0x74f   : > { %7164 = vmatprep.subr.bf16.mxu1 %v3217_v33  ;;  %v3216_v63 = vpack.c.bf16 %v3211_v15, %v3210_v44  ;;  %7246 = vmatprep.subr.bf16.mxu0 %v7888_v48  ;;  %v7893_v44 = vld [vmem:[%s10175_s3 + $0xc8] sm:$0xff]  }
 0x750   : > { %7165 = vmatpush3.bf16.msra.mxu1 %v3217_v33 }
 0x751   : > { %7166 = vmatprep.subr.bf16.mxu1 %v3216_v63 }
 0x752   : > { %7247 = vmatpush3.bf16.msra.mxu0 %v7888_v48 }
 0x753   : > { %7248 = vmatprep.subr.bf16.mxu0 %v7889_v5 }
 0x754   : > { %7167 = vmatpush3.bf16.msra.mxu1 %v3216_v63 }
 0x755   : > { %7168 = vmatprep.subr.bf16.mxu1 %v3215_v0 }
 0x756   : > { %7249 = vmatpush3.bf16.msra.mxu0 %v7889_v5 }
 0x757   : > { %7250 = vmatprep.subr.bf16.mxu0 %v7890_v20 }
 0x758   : > { %7169 = vmatpush3.bf16.msra.mxu1 %v3215_v0 }
 0x759   : > { %7170 = vmatprep.subr.bf16.mxu1 %v3214_v41 }
 0x75a   : > { %7251 = vmatpush3.bf16.msra.mxu0 %v7890_v20 }
 0x75b   : > { %7252 = vmatprep.subr.bf16.mxu0 %v7891_v27 }
 0x75c   : > { %7171 = vmatpush3.bf16.msra.mxu1 %v3214_v41 }
 0x75e   : > { %7253 = vmatpush3.bf16.msra.mxu0 %v7891_v27 }
 0x75f   : > { %7173 = vmatmul.mubr.msk.bf16.vlgmr.msra.gmra.mxu1 %vm2241_vm0, %v10286_v29  ;;  %7254 = vmatprep.subr.bf16.mxu0 %v7892_v13 }
 0x760   : > { %7176 = vmatprep.mubr.msk.bf16.mxu1 %vm2241_vm0, %v10287_v56 }
 0x762   : > { %7255 = vmatpush3.bf16.msra.mxu0 %v7892_v13 }
 0x763   : > { %7256 = vmatprep.subr.bf16.mxu0 %v7893_v44 }
 0x766   : > { %7257 = vmatpush3.bf16.msra.mxu0 %v7893_v44 }
 0x767   : > { %7177 = vmatmul.mubr.msk.bf16.gmra.mxu1 %vm2241_vm0, %v10288_v46  ;;  %7258 = vmatprep.subr.bf16.mxu0 %v7894_v35 }
 0x768   : > { %7180 = vmatprep.mubr.msk.bf16.mxu1 %vm2241_vm0, %v10289_v43 }
 0x76a   : > { %7259 = vmatpush3.bf16.msra.mxu0 %v7894_v35 }
 0x76f   : > { %7181 = vmatmul.mubr.msk.bf16.gmra.mxu1 %vm2241_vm0, %v10290_v60 }
 0x770   : > { %7184 = vmatprep.mubr.msk.bf16.mxu1 %vm2241_vm0, %v10291_v28 }
 0x777   : > { %7185 = vmatmul.mubr.msk.bf16.gmra.mxu1 %vm2241_vm0, %v10292_v17 }
 0x778   : > { %7188 = vmatprep.mubr.msk.bf16.mxu1 %vm2241_vm0, %v10293_v9 }
 0x77f   : > { %7189 = vmatmul.mubr.msk.bf16.gmra.mxu1 %vm2241_vm0, %v10294_v21 }
 0x780   : > { %7192 = vmatprep.mubr.msk.bf16.mxu1 %vm2241_vm0, %v10295_v34 }
 0x787   : > { %7193 = vmatmul.mubr.msk.bf16.gmra.mxu1 %vm2241_vm0, %v10296_v24 }
 0x788   : > { %7196 = vmatprep.mubr.msk.bf16.mxu1 %vm2241_vm0, %v10297_v61 }
 0x78f   : > { %7197 = vmatmul.mubr.msk.bf16.gmra.mxu1 %vm2241_vm0, %v10298_v51 }
 0x790   : > { %7200 = vmatprep.mubr.msk.bf16.mxu1 %vm2241_vm0, %v10299_v58 }
 0x797   : > { %7201 = vmatmul.mubr.msk.bf16.gmra.mxu1 %vm2241_vm0, %v10300_v39 }
 0x798   : > { %7204 = vmatprep.mubr.msk.bf16.mxu1 %vm2241_vm0, %v10301_v2  ;;  %v9267_v2 = vld [vmem:[%s10175_s3 + $0x238] sm:$0xff]  }
 0x799   : > { %7268 = vmatprep.subr.bf16.mxu0 %v9267_v2 }
 0x79f   : > { %7205 = vmatmul.mubr.msk.bf16.gmra.mxu1 %vm2241_vm0, %v10302_v7 }
 0x7a0   : > { %7208 = vmatprep.mubr.msk.bf16.mxu1 %vm2241_vm0, %v10303_v53 }
 0x7a7   : > { %7209 = vmatmul.mubr.msk.bf16.gmra.mxu1 %vm2241_vm0, %v10304_v52 }
 0x7a8   : > { %7212 = vmatprep.mubr.msk.bf16.mxu1 %vm2241_vm0, %v10305_v25 }
 0x7af   : > { %7213 = vmatmul.mubr.msk.bf16.gmra.mxu1 %vm2241_vm0, %v10306_v40 }
 0x7b0   : > { %7216 = vmatprep.mubr.msk.bf16.mxu1 %vm2241_vm0, %v10307_v31 }
 0x7b7   : > { %7217 = vmatmul.mubr.msk.bf16.gmra.mxu1 %vm2241_vm0, %v10308_v45 }
 0x7b8   : > { %7220 = vmatprep.mubr.msk.bf16.mxu1 %vm2241_vm0, %v10309_v6 }
 0x7bf   : > { %7221 = vmatmul.mubr.msk.bf16.gmra.mxu1 %vm2241_vm0, %v10310_v30 }
 0x7c0   : > { %7224 = vmatprep.mubr.msk.bf16.mxu1 %vm2241_vm0, %v10311_v4 }
 0x7c7   : > { %7225 = vmatmul.mubr.msk.bf16.gmra.mxu1 %vm2241_vm0, %v10312_v62 }
 0x7c8   : > { %7228 = vmatprep.mubr.msk.bf16.mxu1 %vm2241_vm0, %v10313_v37 }
 0x7cf   : > { %7229 = vmatmul.mubr.msk.bf16.gmra.mxu1 %vm2241_vm0, %v10314_v1 }
 0x7d0   : > { %7232 = vmatprep.mubr.msk.bf16.mxu1 %vm2241_vm0, %v10315_v10 }
 0x7d7   : > { %7233 = vmatmul.mubr.msk.bf16.gmra.mxu1 %vm2241_vm0, %v10316_v38 }
 0x7d8   : > { %7236 = vmatprep.mubr.msk.bf16.mxu1 %vm2241_vm0, %v10317_v3 }
 0x7df   : > { %7237 = vmatmul.mubr.msk.bf16.gmra.mxu1 %vm2241_vm0, %v10318_v59 }
 0x7e0   : > { %7240 = vmatprep.mubr.msk.bf16.mxu1 %vm2241_vm0, %v10319_v47 }
 0x7e7   : > { %7241 = vmatmul.mubr.msk.bf16.gmra.mxu1 %vm2241_vm0, %v10320_v16 }
 0x81f   : > { %v7174_v12 = vpop.f32.mrf.mxu1 }
 0x820   : > { %v3551_v57 = vmul.f32 %v7174_v12, %v6277_v42 }
 0x821   : > { %v3252_v14 = vpop.f32.mrf.mxu1 }
 0x822   : > { %v3549_v41 = vmul.f32 %v6277_v42, %v3252_v14  ;;  %v3559_v56 = vadd.f32 %v6276_v55, %v3551_v57 }
 0x823   : > { %v7175_v23 = vpop.f32.mrf.mxu1 }
 0x824   : > { %v3552_v46 = vmul.f32 %v7175_v23, %v6277_v42  ;;  %v3557_v28 = vadd.f32 %v6276_v55, %v3549_v41 }
 0x825   : > { %v3255_v15 = vpop.f32.mrf.mxu1 }
 0x826   : > { %v3550_v17 = vmul.f32 %v6277_v42, %v3255_v15  ;;  %v3560_v24 = vadd.f32 %v6276_v55, %v3552_v46 }
 0x827   : > { %v7178_v33 = vpop.f32.mrf.mxu1 }
 0x828   : > { %v3555_v61 = vmul.f32 %v7178_v33, %v6277_v42  ;;  %v3558_v7 = vadd.f32 %v6276_v55, %v3550_v17 }
 0x829   : > { %v3268_v63 = vpop.f32.mrf.mxu1 }
 0x82a   : > { %v3553_v53 = vmul.f32 %v6277_v42, %v3268_v63  ;;  %v3563_v31 = vadd.f32 %v6276_v55, %v3555_v61 }
 0x82b   : > { %v7179_v26 = vpop.f32.mrf.mxu1 }
 0x82c   : > { %v3556_v45 = vmul.f32 %v7179_v26, %v6277_v42  ;;  %v3561_v62 = vadd.f32 %v6276_v55, %v3553_v53 }
 0x82d   : > { %v3271_v0 = vpop.f32.mrf.mxu1 }
 0x82e   : > { %v3554_v37 = vmul.f32 %v6277_v42, %v3271_v0  ;;  %v3564_v3 = vadd.f32 %v6276_v55, %v3556_v45 }
 0x82f   : > { %v7182_v29 = vpop.f32.mrf.mxu1 }
 0x830   : > { %v3572_v43 = vmul.f32 %v7182_v29, %v6278_v11  ;;  %v3562_v48 = vadd.f32 %v6276_v55, %v3554_v37 }
 0x831   : > { %v3284_v60 = vpop.f32.mrf.mxu1 }
 0x832   : > { %v3580_v9 = vadd.f32 %v3572_v43, %v3559_v56  ;;  %v3570_v21 = vmul.f32 %v6278_v11, %v3284_v60 }
 0x833   : > { %v7183_v34 = vpop.f32.mrf.mxu1 }
 0x834   : > { %v3578_v51 = vadd.f32 %v3570_v21, %v3557_v28  ;;  %v3573_v58 = vmul.f32 %v7183_v34, %v6278_v11  ;;  %v6280_v28 = vld [vmem:[%s10174_s2 + $0x1a] ss:$0 sm:$0xff] }
 0x835   : > { %v3287_v39 = vpop.f32.mrf.mxu1 }
 0x836   : > { %v3581_v52 = vadd.f32 %v3573_v58, %v3560_v24  ;;  %v3571_v25 = vmul.f32 %v6278_v11, %v3287_v39 }
 0x837   : > { %v7186_v40 = vpop.f32.mrf.mxu1 }
 0x838   : > { %v3579_v6 = vadd.f32 %v3571_v25, %v3558_v7  ;;  %v3576_v30 = vmul.f32 %v7186_v40, %v6278_v11 }
 0x839   : > { %v3300_v4 = vpop.f32.mrf.mxu1 }
 0x83a   : > { %v3584_v1 = vadd.f32 %v3576_v30, %v3563_v31  ;;  %v3574_v10 = vmul.f32 %v6278_v11, %v3300_v4 }
 0x83b   : > { %v7187_v38 = vpop.f32.mrf.mxu1 }
 0x83c   : > { %v3582_v59 = vadd.f32 %v3574_v10, %v3561_v62  ;;  %v3577_v47 = vmul.f32 %v7187_v38, %v6278_v11 }
 0x83d   : > { %v3303_v16 = vpop.f32.mrf.mxu1 }
 0x83e   : > { %v3585_v5 = vadd.f32 %v3577_v47, %v3564_v3  ;;  %v3575_v20 = vmul.f32 %v6278_v11, %v3303_v16 }
 0x83f   : > { %v7190_v27 = vpop.f32.mrf.mxu1 }
 0x840   : > { %v3583_v12 = vadd.f32 %v3575_v20, %v3562_v48  ;;  %v3593_v13 = vmul.f32 %v7190_v27, %v6279_v36 }
 0x841   : > { %v3316_v14 = vpop.f32.mrf.mxu1 }
 0x842   : > { %v3601_v23 = vadd.f32 %v3593_v13, %v3580_v9  ;;  %v3591_v44 = vmul.f32 %v6279_v36, %v3316_v14 }
 0x843   : > { %v7191_v15 = vpop.f32.mrf.mxu1 }
 0x844   : > { %v3599_v33 = vadd.f32 %v3591_v44, %v3578_v51  ;;  %v3594_v35 = vmul.f32 %v7191_v15, %v6279_v36 }
 0x845   : > { %v3319_v42 = vpop.f32.mrf.mxu1 }
 0x846   : > { %v3602_v63 = vadd.f32 %v3594_v35, %v3581_v52  ;;  %v3592_v26 = vmul.f32 %v6279_v36, %v3319_v42 }
 0x847   : > { %v7194_v57 = vpop.f32.mrf.mxu1 }
 0x848   : > { %v3600_v0 = vadd.f32 %v3592_v26, %v3579_v6  ;;  %v3597_v41 = vmul.f32 %v7194_v57, %v6279_v36 }
 0x849   : > { %v3332_v29 = vpop.f32.mrf.mxu1 }
 0x84a   : > { %v3605_v56 = vadd.f32 %v3597_v41, %v3584_v1  ;;  %v3595_v55 = vmul.f32 %v6279_v36, %v3332_v29 }
 0x84b   : > { %v7195_v46 = vpop.f32.mrf.mxu1 }
 0x84c   : > { %v3603_v11 = vadd.f32 %v3595_v55, %v3582_v59  ;;  %v3598_v43 = vmul.f32 %v7195_v46, %v6279_v36 }
 0x84d   : > { %v3335_v60 = vpop.f32.mrf.mxu1 }
 0x84e   : > { %v3606_v17 = vadd.f32 %v3598_v43, %v3585_v5  ;;  %v3596_v9 = vmul.f32 %v6279_v36, %v3335_v60 }
 0x84f   : > { %v7198_v21 = vpop.f32.mrf.mxu1 }
 0x850   : > { %v3604_v34 = vadd.f32 %v3596_v9, %v3583_v12  ;;  %v3614_v24 = vmul.f32 %v7198_v21, %v6280_v28 }
 0x851   : > { %v3348_v61 = vpop.f32.mrf.mxu1 }
 0x852   : > { %v3622_v51 = vadd.f32 %v3614_v24, %v3601_v23  ;;  %v3612_v58 = vmul.f32 %v6280_v28, %v3348_v61 }
 0x853   : > { %v7199_v39 = vpop.f32.mrf.mxu1 }
 0x854   : > { %v3620_v7 = vadd.f32 %v3612_v58, %v3599_v33  ;;  %v3615_v53 = vmul.f32 %v7199_v39, %v6280_v28  ;;  %v6282_v58 = vld [vmem:[%s10174_s2 + $0x1c] ss:$0 sm:$0xff] }
 0x855   : > { %v3351_v52 = vpop.f32.mrf.mxu1 }
 0x856   : > { %v3623_v25 = vadd.f32 %v3615_v53, %v3602_v63  ;;  %v3613_v40 = vmul.f32 %v6280_v28, %v3351_v52 }
 0x857   : > { %v7202_v31 = vpop.f32.mrf.mxu1 }
 0x858   : > { %v3621_v45 = vadd.f32 %v3613_v40, %v3600_v0  ;;  %v3618_v6 = vmul.f32 %v7202_v31, %v6280_v28 }
 0x859   : > { %v3364_v30 = vpop.f32.mrf.mxu1 }
 0x85a   : > { %v3626_v4 = vadd.f32 %v3618_v6, %v3605_v56  ;;  %v3616_v62 = vmul.f32 %v6280_v28, %v3364_v30  ;;  %v6283_v30 = vld [vmem:[%s10174_s2 + $0x1d] ss:$0 sm:$0xff] }
 0x85b   : > { %v7203_v37 = vpop.f32.mrf.mxu1 }
 0x85c   : > { %v3624_v1 = vadd.f32 %v3616_v62, %v3603_v11  ;;  %v3619_v10 = vmul.f32 %v7203_v37, %v6280_v28 }
 0x85d   : > { %v3367_v38 = vpop.f32.mrf.mxu1 }
 0x85e   : > { %v3627_v3 = vadd.f32 %v3619_v10, %v3606_v17  ;;  %v3617_v59 = vmul.f32 %v6280_v28, %v3367_v38  ;;  %v6281_v28 = vld [vmem:[%s10174_s2 + $0x1b] ss:$0 sm:$0xff] }
 0x85f   : > { %v7206_v47 = vpop.f32.mrf.mxu1 }
 0x860   : > { %v3625_v16 = vadd.f32 %v3617_v59, %v3604_v34  ;;  %v3635_v9 = vmul.f32 %v7206_v47, %v6281_v28 }
 0x861   : > { %v3380_v36 = vpop.f32.mrf.mxu1 }
 0x862   : > { %v3633_v34 = vmul.f32 %v6281_v28, %v3380_v36  ;;  %v3643_v40 = vadd.f32 %v3635_v9, %v3622_v51 }
 0x863   : > { %v7207_v48 = vpop.f32.mrf.mxu1 }
 0x864   : > { %v3636_v24 = vmul.f32 %v7207_v48, %v6281_v28  ;;  %v3641_v37 = vadd.f32 %v3633_v34, %v3620_v7 }
 0x865   : > { %v3383_v5 = vpop.f32.mrf.mxu1 }
 0x866   : > { %v3634_v61 = vmul.f32 %v6281_v28, %v3383_v5  ;;  %v3644_v10 = vadd.f32 %v3636_v24, %v3623_v25 }
 0x867   : > { %v7210_v20 = vpop.f32.mrf.mxu1 }
 0x868   : > { %v3639_v53 = vmul.f32 %v7210_v20, %v6281_v28  ;;  %v3642_v47 = vadd.f32 %v3634_v61, %v3621_v45  ;;  %v6284_v20 = vld [vmem:[%s10174_s2 + $0x1e] ss:$0 sm:$0xff]  ;;  %v9309_v45 = vld [vmem:[%s10174_s2 + $0x1f] ss:$0 sm:$0xff] }
 0x869   : > { %v3396_v27 = vpop.f32.mrf.mxu1 }
 0x86a   : > { %v3637_v52 = vmul.f32 %v6281_v28, %v3396_v27  ;;  %v3647_v27 = vadd.f32 %v3639_v53, %v3626_v4 }
 0x86b   : > { %v7211_v12 = vpop.f32.mrf.mxu1 }
 0x86c   : > { %v3640_v31 = vmul.f32 %v7211_v12, %v6281_v28  ;;  %v3645_v12 = vadd.f32 %v3637_v52, %v3624_v1 }
 0x86d   : > { %v3399_v13 = vpop.f32.mrf.mxu1 }
 0x86e   : > { %v3638_v6 = vmul.f32 %v6281_v28, %v3399_v13  ;;  %v3648_v9 = vadd.f32 %v3640_v31, %v3627_v3 }
 0x86f   : > { %v7214_v14 = vpop.f32.mrf.mxu1 }
 0x870   : > { %v3656_v38 = vmul.f32 %v7214_v14, %v6282_v58  ;;  %v3646_v32 = vadd.f32 %v3638_v6, %v3625_v16 }
 0x871   : > { %v3412_v23 = vpop.f32.mrf.mxu1 }
 0x872   : > { %v3654_v36 = vmul.f32 %v6282_v58, %v3412_v23  ;;  %v3664_v14 = vadd.f32 %v3656_v38, %v3643_v40 }
 0x873   : > { %v7215_v44 = vpop.f32.mrf.mxu1 }
 0x874   : > { %v3657_v59 = vmul.f32 %v7215_v44, %v6282_v58 }
 0x875   : > { %v3415_v15 = vpop.f32.mrf.mxu1 }
 0x876   : > { %v3655_v48 = vmul.f32 %v6282_v58, %v3415_v15  ;;  %v3665_v23 = vadd.f32 %v3657_v59, %v3644_v10 }
 0x877   : > { %v7218_v33 = vpop.f32.mrf.mxu1 }
 0x878   : > { %v3660_v5 = vmul.f32 %v7218_v33, %v6282_v58  ;;  %v3662_v33 = vadd.f32 %v3654_v36, %v3641_v37  ;;  %v3663_v34 = vadd.f32 %v3655_v48, %v3642_v47 }
 0x879   : > { %v9276_v35 = vpop.f32.mrf.mxu1 }
 0x87a   : > { %v3668_v4 = vadd.f32 %v3660_v5, %v3647_v27 }
 0x87b   : > { %v9278_v42 = vpop.f32.mrf.mxu1 }
 0x87c   : > { %v3661_v24 = vmul.f32 %v9278_v42, %v6282_v58 }
 0x87d   : > { %v9280_v63 = vpop.f32.mrf.mxu1 }
 0x87e   : > { %v3669_v59 = vadd.f32 %v3661_v24, %v3648_v9  ;;  %v7902_v24 = vld [vmem:[%s10175_s3 + $0x200] sm:$0xff]  }
 0x87f   : > { %v7222_v26 = vpop.f32.mrf.mxu1 }
 0x880   : > { %v3677_v13 = vmul.f32 %v7222_v26, %v6283_v30 }
 0x881   : > { %v3444_v57 = vpop.f32.mrf.mxu1 }
 0x882   : > { %v3675_v22 = vmul.f32 %v6283_v30, %v3444_v57 }
 0x883   : > { %v7223_v0 = vpop.f32.mrf.mxu1 }
 0x884   : > { %v3678_v28 = vmul.f32 %v7223_v0, %v6283_v30  ;;  %v3685_v0 = vadd.f32 %v3677_v13, %v3664_v14  ;;  %v3683_v61 = vadd.f32 %v3675_v22, %v3662_v33 }
 0x885   : > { %v3447_v41 = vpop.f32.mrf.mxu1 }
 0x886   : > { %v3676_v7 = vmul.f32 %v6283_v30, %v3447_v41  ;;  %v3686_v3 = vadd.f32 %v3678_v28, %v3665_v23  ;;  %v3658_v41 = vmul.f32 %v6282_v58, %v9276_v35 }
 0x887   : > { %v9282_v29 = vpop.f32.mrf.mxu1 }
 0x888   : > { %v3684_v53 = vadd.f32 %v3676_v7, %v3663_v34  ;;  %v3681_v6 = vmul.f32 %v9282_v29, %v6283_v30 }
 0x889   : > { %v9284_v56 = vpop.f32.mrf.mxu1 }
 0x88a   : > { %v3679_v47 = vmul.f32 %v6283_v30, %v9284_v56  ;;  %v3689_v28 = vadd.f32 %v3681_v6, %v3668_v4 }
 0x88b   : > { %v9286_v55 = vpop.f32.mrf.mxu1 }
 0x88d   : > { %v9288_v46 = vpop.f32.mrf.mxu1 }
 0x88e   : > { %v3680_v36 = vmul.f32 %v6283_v30, %v9288_v46 }
 0x88f   : > { %v7230_v11 = vpop.f32.mrf.mxu1 }
 0x890   : > { %v3698_v44 = vmul.f32 %v7230_v11, %v6284_v20 }
 0x891   : > { %v3476_v43 = vpop.f32.mrf.mxu1 }
 0x892   : > { %v3696_v1 = vmul.f32 %v6284_v20, %v3476_v43  ;;  %v3706_v40 = vadd.f32 %v3698_v44, %v3685_v0  ;;  %v3659_v43 = vmul.f32 %v6282_v58, %v9280_v63 }
 0x893   : > { %v7231_v60 = vpop.f32.mrf.mxu1 }
 0x894   : > { %v3699_v15 = vmul.f32 %v7231_v60, %v6284_v20  ;;  %v3704_v37 = vadd.f32 %v3696_v1, %v3683_v61  ;;  %v3667_v13 = vadd.f32 %v3659_v43, %v3646_v32  ;;  %v7897_v1 = vld [vmem:[%s10175_s3 + $0x228] sm:$0xff]   ;;  %v6302_v61 = vld [vmem:[%s10174_s2 + $0x16] ss:$0 sm:$0xff] }
 0x895   : > { %v3479_v17 = vpop.f32.mrf.mxu1 }
 0x896   : > { %v3697_v16 = vmul.f32 %v6284_v20, %v3479_v17  ;;  %v3707_v11 = vadd.f32 %v3699_v15, %v3686_v3  ;;  %v3682_v17 = vmul.f32 %v9286_v55, %v6283_v30  ;;  %v3666_v55 = vadd.f32 %v3658_v41, %v3645_v12  ;;  %v7901_v41 = vld [vmem:[%s10175_s3 + $0x208] sm:$0xff]  }
 0x897   : > { %v9293_v21 = vpop.f32.mrf.mxu1  ;;  %v3688_v46 = vadd.f32 %v3680_v36, %v3667_v13 }
 0x898   : > { %v3705_v35 = vadd.f32 %v3697_v16, %v3684_v53  ;;  %v3702_v48 = vmul.f32 %v9293_v21, %v6284_v20  ;;  %v3690_v14 = vadd.f32 %v3682_v17, %v3669_v59  ;;  %v3687_v44 = vadd.f32 %v3679_v47, %v3666_v55  ;;  %v7896_v21 = vld [vmem:[%s10175_s3 + $0x230] sm:$0xff]   ;;  %v6311_v17 = vld [vmem:[%s10174_s2 + $0x3e] ss:$0 sm:$0xff] }
 0x899   : > { %v9298_v39 = vpop.f32.mrf.mxu1 }
 0x89a   : > { %v3700_v7 = vmul.f32 %v6284_v20, %v9298_v39 }
 0x89b   : > { %v7235_v62 = vpop.f32.mrf.mxu1 }
 0x89c   : > { %v3703_v63 = vmul.f32 %v7235_v62, %v6284_v20  ;;  %v3710_v62 = vadd.f32 %v3702_v48, %v3689_v28  ;;  %v3708_v39 = vadd.f32 %v3700_v7, %v3687_v44 }
 0x89d   : > { %v3495_v51 = vpop.f32.mrf.mxu1 }
 0x89e   : > { %v3701_v23 = vmul.f32 %v6284_v20, %v3495_v51  ;;  %v3711_v15 = vadd.f32 %v3703_v63, %v3690_v14 }
 0x89f   : > { %v7238_v25 = vpop.f32.mrf.mxu1 }
 0x8a0   : > { %v3719_v57 = vmul.f32 %v7238_v25, %v9309_v45  ;;  %v3709_v20 = vadd.f32 %v3701_v23, %v3688_v46 }
 0x8a1   : > { %v3508_v26 = vpop.f32.mrf.mxu1 }
 0x8a2   : > { %v3717_v60 = vmul.f32 %v9309_v45, %v3508_v26  ;;  %v3727_v38 = vadd.f32 %v3719_v57, %v3706_v40  ;;  %v7900_v57 = vld [vmem:[%s10175_s3 + $0x210] sm:$0xff]  }
 0x8a3   : > { %v7239_v52 = vpop.f32.mrf.mxu1 }
 0x8a4   : > { %v3720_v31 = vmul.f32 %v7239_v52, %v9309_v45  ;;  %v3725_v58 = vadd.f32 %v3717_v60, %v3704_v37 }
 0x8a5   : > { %v3511_v10 = vpop.f32.mrf.mxu1 }
 0x8a6   : > { %v3728_v42 = vadd.f32 %v3720_v31, %v3707_v11  ;;  %v3718_v22 = vmul.f32 %v9309_v45, %v3511_v10 }
 0x8a7   : > { %v7242_v5 = vpop.f32.mrf.mxu1 }
 0x8a8   : > { %v3734_v29 = vpack.c.bf16 %v3728_v42, %v3727_v38  ;;  %v3726_v27 = vadd.f32 %v3718_v22, %v3705_v35  ;;  %v3723_v9 = vmul.f32 %v7242_v5, %v9309_v45 }
 0x8a9   : > { %v3524_v25 = vpop.f32.mrf.mxu1 }
 0x8aa   : > { %v3733_v56 = vpack.c.bf16 %v3726_v27, %v3725_v58  ;;  %v3721_v32 = vmul.f32 %v9309_v45, %v3524_v25  ;;  %v3731_v51 = vadd.f32 %v3723_v9, %v3710_v62  ;;  %v10321_v25 = vld [vmem:[#allocation46_spill] sm:$0xff]  ;;  %v10322_v62 = vld [vmem:[#allocation45_spill] sm:$0xff] }
 0x8ab   : > { %v7243_v30 = vpop.f32.mrf.mxu1 }
 0x8ac   : > { %v3724_v12 = vmul.f32 %v7243_v30, %v9309_v45  ;;  %7260 = vmatprep.mubr.bf16.mxu0 %v3733_v56  ;;  %v3729_v26 = vadd.f32 %v3721_v32, %v3708_v39 }
 0x8ad   : > { %v3527_v33 = vpop.f32.mrf.mxu1  ;;  %7261 = vmatmul.mubr.bf16.vlgmr.msra.gmra.mxu0 %v3734_v29 }
 0x8ae   : > { %v3732_v34 = vadd.f32 %v3724_v12, %v3711_v15  ;;  %v3722_v4 = vmul.f32 %v9309_v45, %v3527_v33  ;;  %7269 = vmatpush3.bf16.msra.mxu0 %v9267_v2  ;;  %v7898_v45 = vld [vmem:[%s10175_s3 + $0x220] sm:$0xff]   ;;  %v7899_v2 = vld [vmem:[%s10175_s3 + $0x218] sm:$0xff]  }
 0x8af   : > { %7270 = vmatprep.subr.bf16.mxu0 %v7896_v21 }
 0x8b0   : > { %v3736_v0 = vpack.c.bf16 %v3732_v34, %v3731_v51  ;;  %v3730_v3 = vadd.f32 %v3722_v4, %v3709_v20 }
 0x8b2   : > { %v3735_v16 = vpack.c.bf16 %v3730_v3, %v3729_v26  ;;  %7271 = vmatpush3.bf16.msra.mxu0 %v7896_v21  ;;  %v4048_v3 = vld [vmem:[%s10179_s7] sm:$0xff] }
 0x8b3   : > { %7272 = vmatprep.subr.bf16.mxu0 %v7897_v1 }
 0x8b4   : > { %7264 = vmatprep.mubr.bf16.mxu0 %v3735_v16  ;;  %v7964_v16 = vmov 0.0  }
 0x8b5   : > { %7265 = vmatmul.mubr.bf16.gmra.mxu0 %v3736_v0  ;;  %7362 = vmatprep.subr.bf16.mxu1 %v7964_v16 }
 0x8b6   : > { %7273 = vmatpush3.bf16.msra.mxu0 %v7897_v1  ;;  %7378 = vmatprep.mubr.msk.bf16.mxu1 %vm7965_vm1, %v7964_v16 }
 0x8b7   : > { %7274 = vmatprep.subr.bf16.mxu0 %v7898_v45 }
 0x8ba   : > { %7275 = vmatpush3.bf16.msra.mxu0 %v7898_v45 }
 0x8bb   : > { %7276 = vmatprep.subr.bf16.mxu0 %v7899_v2 }
 0x8be   : > { %7277 = vmatpush3.bf16.msra.mxu0 %v7899_v2 }
 0x8bf   : > { %7278 = vmatprep.subr.bf16.mxu0 %v7900_v57 }
 0x8c2   : > { %7279 = vmatpush3.bf16.msra.mxu0 %v7900_v57 }
 0x8c3   : > { %7280 = vmatprep.subr.bf16.mxu0 %v7901_v41 }
 0x8c6   : > { %7281 = vmatpush3.bf16.msra.mxu0 %v7901_v41 }
 0x8c7   : > { %7282 = vmatprep.subr.bf16.mxu0 %v7902_v24 }
 0x8ca   : > { %7283 = vmatpush3.bf16.msra.mxu0 %v7902_v24 }
 0x96d   : > { %v7262_v53 = vpop.f32.mrf.mxu0 }
 0x96e   : > { %v3850_v52 = vadd.f32 %v7262_v53, %v6302_v61 }
 0x96f   : > { %v3841_v40 = vpop.f32.mrf.mxu0 }
 0x970   : > { %v3842_v11 = vadd.f32 %v6302_v61, %v3841_v40  ;;  %v3874_v31 = vadd.f32 %v3850_v52, %v9118_v8  ;;  %v6312_v8 = vld [vmem:[%s10174_s2 + $0x3f] ss:$0 sm:$0xff]  ;;  %v4049_v40 = vld [vmem:[%s10179_s7 + $0x8] sm:$0xff] }
 0x971   : > { %v7263_v60 = vpop.f32.mrf.mxu0 }
 0x972   : > { %v3872_v43 = vadd.f32 %v3842_v11, %v9121_v54  ;;  %v3853_v6 = vadd.f32 %v7263_v60, %v6302_v61  ;;  %v3887_v22 = vmul.f32 %v6311_v17, %v3874_v31  ;;  %v7903_v11 = vld [vmem:[%s10175_s3 + $0x138] sm:$0xff]   ;;  %v7904_v60 = vld [vmem:[%s10175_s3 + $0x130] sm:$0xff]   ;;  %v7905_v31 = vld [vmem:[%s10175_s3 + $0x128] sm:$0xff]  }
 0x973   : > { %v3844_v37 = vpop.f32.mrf.mxu0 }
 0x974   : > { %v3875_v10 = vadd.f32 %v3853_v6, %v9127_v18  ;;  %v3845_v35 = vadd.f32 %v6302_v61, %v3844_v37  ;;  %v3885_v38 = vmul.f32 %v6311_v17, %v3872_v43  ;;  %v3900_v27 = vadd.f32 %v6312_v8, %v3887_v22  ;;  %v7906_v43 = vld [vmem:[%s10175_s3 + $0x120] sm:$0xff]   ;;  %v7907_v6 = vld [vmem:[%s10175_s3 + $0x118] sm:$0xff]   ;;  %v7909_v37 = vld [vmem:[%s10175_s3 + $0x108] sm:$0xff]  }
 0x975   : > { %v7266_v42 = vpop.f32.mrf.mxu0 }
 0x976   : > { %v3888_v59 = vmul.f32 %v6311_v17, %v3875_v10  ;;  %v3873_v47 = vadd.f32 %v3845_v35, %v9133_v19  ;;  %v3866_v36 = vadd.f32 %v7266_v42, %v6302_v61  ;;  %v3898_v29 = vadd.f32 %v6312_v8, %v3885_v38  ;;  %v7910_v10 = vld [vmem:[%s10175_s3 + $0x100] sm:$0xff]  }
 0x977   : > { %v3857_v54 = vpop.f32.mrf.mxu0  ;;  %v3908_v46 = vmax.f32 %v3900_v27, 0.0  ;;  %v6339_v35 = vld [vmem:[%s10174_s2 + $0x20] ss:$0 sm:$0xff]  ;;  %v6340_v42 = vld [vmem:[%s10174_s2 + $0x21] ss:$0 sm:$0xff] }
 0x978   : > { %v3901_v48 = vadd.f32 %v6312_v8, %v3888_v59  ;;  %v3886_v5 = vmul.f32 %v6311_v17, %v3873_v47  ;;  %v3858_v63 = vadd.f32 %v6302_v61, %v3857_v54  ;;  %v3878_v18 = vadd.f32 %v3866_v36, %v9140_v50 }
 0x979   : > { %v7267_v58 = vpop.f32.mrf.mxu0  ;;  %v3906_v56 = vmax.f32 %v3898_v29, 0.0  ;;  %v6365_v29 = vld [vmem:[%s10174_s2 + $0x22] ss:$0 sm:$0xff] }
 0x97a   : > { %v3876_v55 = vadd.f32 %v3858_v63, %v9143_v49  ;;  %v3869_v13 = vadd.f32 %v7267_v58, %v6302_v61  ;;  %v3899_v7 = vadd.f32 %v6312_v8, %v3886_v5  ;;  %v3909_v19 = vmax.f32 %v3901_v48, 0.0  ;;  %v9427_v63 = vld [vmem:[%s10180_s8] sm:$0xff] }
 0x97b   : > { %v3860_v28 = vpop.f32.mrf.mxu0  ;;  %v3891_v30 = vmul.f32 %v6311_v17, %v3878_v18 }
 0x97c   : > { %v3879_v14 = vadd.f32 %v3869_v13, %v10321_v25  ;;  %v3889_v23 = vmul.f32 %v6311_v17, %v3876_v55  ;;  %v3861_v9 = vadd.f32 %v6302_v61, %v3860_v28  ;;  %v3907_v44 = vmax.f32 %v3899_v7, 0.0  ;;  %v6366_v55 = vld [vmem:[%s10174_s2 + $0x23] ss:$0 sm:$0xff] }
 0x97d   : > { %v3915_v12 = vpack.c.bf16 %v3909_v19, %v3908_v46  ;;  %v3904_v33 = vadd.f32 %v6312_v8, %v3891_v30  ;;  %v9460_v46 = vld [vmem:[%s10180_s8 + $0x20] sm:$0xff]  ;;  %v9469_v30 = vld [vmem:[%s10180_s8 + $0x28] sm:$0xff] }
 0x97e   : > { %v3892_v21 = vmul.f32 %v6311_v17, %v3879_v14  ;;  %v3877_v15 = vadd.f32 %v3861_v9, %v10322_v62  ;;  %v3914_v32 = vpack.c.bf16 %v3907_v44, %v3906_v56  ;;  %v3902_v49 = vadd.f32 %v6312_v8, %v3889_v23  ;;  %v9440_v9 = vld [vmem:[%s10180_s8 + $0x8] sm:$0xff]  ;;  %v9445_v56 = vld [vmem:[%s10180_s8 + $0x10] sm:$0xff]  ;;  %v9455_v44 = vld [vmem:[%s10180_s8 + $0x18] sm:$0xff] }
 0x97f   : > { %v3912_v1 = vmax.f32 %v3904_v33, 0.0  ;;  %v9483_v62 = vld [vmem:[%s10180_s8 + $0x38] sm:$0xff]  ;;  %v9530_v33 = vld [vmem:[%s10180_s8 + $0x70] sm:$0xff] }
 0x980   : > { %v3905_v50 = vadd.f32 %v6312_v8, %v3892_v21  ;;  %v3890_v39 = vmul.f32 %v6311_v17, %v3877_v15  ;;  %7284 = vmatprep.mubr.bf16.mxu0 %v3914_v32  ;;  %v3910_v34 = vmax.f32 %v3902_v49, 0.0  ;;  %v7908_v17 = vld [vmem:[%s10175_s3 + $0x110] sm:$0xff]   ;;  %v9488_v15 = vld [vmem:[%s10180_s8 + $0x40] sm:$0xff]  ;;  %v9497_v32 = vld [vmem:[%s10180_s8 + $0x48] sm:$0xff] }
 0x981   : > { %7285 = vmatmul.mubr.bf16.vlgmr.msra.gmra.mxu0 %v3915_v12  ;;  %v9474_v21 = vld [vmem:[%s10180_s8 + $0x30] sm:$0xff]  ;;  %v9525_v49 = vld [vmem:[%s10180_s8 + $0x68] sm:$0xff] }
 0x982   : > { %v3903_v20 = vadd.f32 %v6312_v8, %v3890_v39  ;;  %v3913_v51 = vmax.f32 %v3905_v50, 0.0  ;;  %v9502_v12 = vld [vmem:[%s10180_s8 + $0x50] sm:$0xff]  ;;  %v9511_v50 = vld [vmem:[%s10180_s8 + $0x58] sm:$0xff]  ;;  %v9516_v39 = vld [vmem:[%s10180_s8 + $0x60] sm:$0xff] }
 0x984   : > { %v3911_v4 = vmax.f32 %v3903_v20, 0.0  ;;  %v3917_v0 = vpack.c.bf16 %v3913_v51, %v3912_v1  ;;  %v9539_v20 = vld [vmem:[%s10180_s8 + $0x78] sm:$0xff]  ;;  %v9544_v51 = vld [vmem:[%s10180_s8 + $0x80] sm:$0xff]  ;;  %v7912_v1 = vld [vmem:[%s10175_s3 + $0x170] sm:$0xff]  }
 0x986   : > { %v3916_v26 = vpack.c.bf16 %v3911_v4, %v3910_v34  ;;  %v9553_v34 = vld [vmem:[%s10180_s8 + $0x88] sm:$0xff]  ;;  %v7911_v4 = vld [vmem:[%s10175_s3 + $0x178] sm:$0xff]  }
 0x987   : > { %7363 = vmatpush3.bf16.msra.mxu1 %v7911_v4 }
 0x988   : > { %7288 = vmatprep.mubr.bf16.mxu0 %v3916_v26  ;;  %7364 = vmatprep.subr.bf16.mxu1 %v7964_v16  ;;  %v7913_v26 = vld [vmem:[%s10175_s3 + $0x168] sm:$0xff]  }
 0x989   : > { %7289 = vmatmul.mubr.bf16.gmra.mxu0 %v3917_v0  ;;  %v7914_v0 = vld [vmem:[%s10175_s3 + $0x160] sm:$0xff]  }
 0x98a   : > { %7308 = vmatprep.mubr.msk.f32.mxu0 %vm2241_vm0, %v4048_v3  ;;  %v7915_v3 = vld [vmem:[%s10175_s3 + $0x158] sm:$0xff]  }
 0x98b   : > { %7365 = vmatpush3.bf16.msra.mxu1 %v7912_v1 }
 0x98c   : > { %7366 = vmatprep.subr.bf16.mxu1 %v7964_v16 }
 0x98f   : > { %7367 = vmatpush3.bf16.msra.mxu1 %v7913_v26 }
 0x990   : > { %7368 = vmatprep.subr.bf16.mxu1 %v7964_v16 }
 0x993   : > { %7369 = vmatpush3.bf16.msra.mxu1 %v7914_v0 }
 0x994   : > { %7370 = vmatprep.subr.bf16.mxu1 %v7964_v16 }
 0x997   : > { %7371 = vmatpush3.bf16.msra.mxu1 %v7915_v3 }
 0x998   : > { %7372 = vmatprep.subr.bf16.mxu1 %v7964_v16 }
 0xa41   : > { %v7286_v45 = vpop.f32.mrf.mxu0 }
 0xa43   : > { %v4017_v2 = vpop.f32.mrf.mxu0 }
 0xa45   : > { %v7287_v57 = vpop.f32.mrf.mxu0 }
 0xa47   : > { %v4020_v41 = vpop.f32.mrf.mxu0 }
 0xa49   : > { %v7290_v24 = vpop.f32.mrf.mxu0 }
 0xa4b   : > { %v4033_v61 = vpop.f32.mrf.mxu0 }
 0xa4d   : > { %v7291_v53 = vpop.f32.mrf.mxu0 }
 0xa4e   : > { %7292 = vmatprep.subr.mxu0 %v7291_v53 }
 0xa4f   : > { %7293 = vmatpush3.msra.mxu0 %v7291_v53  ;;  %v4036_v52 = vpop.f32.mrf.mxu0  ;;  %v7922_v53 = vld [vmem:[%s10175_s3 + $0x1a0] sm:$0xff]  }
 0xa50   : > { %7294 = vmatprep.subr.mxu0 %v7290_v24 }
 0xa51   : > { %7295 = vmatpush3.msra.mxu0 %v7290_v24  ;;  %v7920_v24 = vld [vmem:[%s10175_s3 + $0x1b0] sm:$0xff]  }
 0xa52   : > { %7296 = vmatprep.subr.mxu0 %v4036_v52 }
 0xa53   : > { %7297 = vmatpush3.msra.mxu0 %v4036_v52 }
 0xa54   : > { %7298 = vmatprep.subr.mxu0 %v4033_v61 }
 0xa55   : > { %7299 = vmatpush3.msra.mxu0 %v4033_v61  ;;  %v7921_v61 = vld [vmem:[%s10175_s3 + $0x1a8] sm:$0xff]  }
 0xa56   : > { %7300 = vmatprep.subr.mxu0 %v7287_v57 }
 0xa57   : > { %7301 = vmatpush3.msra.mxu0 %v7287_v57  ;;  %v7918_v57 = vld [vmem:[%s10175_s3 + $0x140] sm:$0xff]  }
 0xa58   : > { %7302 = vmatprep.subr.mxu0 %v7286_v45 }
 0xa59   : > { %7303 = vmatpush3.msra.mxu0 %v7286_v45  ;;  %v7916_v45 = vld [vmem:[%s10175_s3 + $0x150] sm:$0xff]  }
 0xa5a   : > { %7304 = vmatprep.subr.mxu0 %v4020_v41  ;;  %7373 = vmatpush3.bf16.msra.mxu1 %v7916_v45  ;;  %v6392_v45 = vld [vmem:[%s10174_s2 + $0x2c] ss:$0 sm:$0xff] }
 0xa5b   : > { %7305 = vmatpush3.msra.mxu0 %v4020_v41  ;;  %7374 = vmatprep.subr.bf16.mxu1 %v7964_v16  ;;  %v7919_v41 = vld [vmem:[%s10175_s3 + $0x1b8] sm:$0xff]  }
 0xa5c   : > { %7306 = vmatprep.subr.mxu0 %v4017_v2 }
 0xa5d   : > { %7307 = vmatpush3.msra.mxu0 %v4017_v2  ;;  %v7917_v2 = vld [vmem:[%s10175_s3 + $0x148] sm:$0xff]  }
 0xa5e   : > { %7309 = vmatmul.mubr.msk.f32.vlgmr.msra.gmra.mxu0 %vm2241_vm0, %v4049_v40  ;;  %7311 = vmatprep.subr.bf16.mxu0 %v7964_v16 }
 0xa5f   : > { %7312 = vmatpush3.bf16.msra.mxu0 %v7903_v11  ;;  %7327 = vmatprep.mubr.msk.bf16.mxu0 %vm7965_vm1, %v7964_v16 }
 0xa60   : > { %7313 = vmatprep.subr.bf16.mxu0 %v7964_v16  ;;  %7375 = vmatpush3.bf16.msra.mxu1 %v7917_v2 }
 0xa61   : > { %7376 = vmatprep.subr.bf16.mxu1 %v7964_v16 }
 0xa63   : > { %7314 = vmatpush3.bf16.msra.mxu0 %v7904_v60 }
 0xa64   : > { %7315 = vmatprep.subr.bf16.mxu0 %v7964_v16  ;;  %7377 = vmatpush3.bf16.msra.mxu1 %v7918_v57 }
 0xa67   : > { %7316 = vmatpush3.bf16.msra.mxu0 %v7905_v31 }
 0xa68   : > { %7317 = vmatprep.subr.bf16.mxu0 %v7964_v16 }
 0xa6b   : > { %7318 = vmatpush3.bf16.msra.mxu0 %v7906_v43 }
 0xa6c   : > { %7319 = vmatprep.subr.bf16.mxu0 %v7964_v16 }
 0xa6f   : > { %7320 = vmatpush3.bf16.msra.mxu0 %v7907_v6 }
 0xa70   : > { %7321 = vmatprep.subr.bf16.mxu0 %v7964_v16 }
 0xa73   : > { %7322 = vmatpush3.bf16.msra.mxu0 %v7908_v17  ;;  %v6386_v17 = vld [vmem:[%s10174_s2 + $0x26] ss:$0 sm:$0xff] }
 0xa74   : > { %7323 = vmatprep.subr.bf16.mxu0 %v7964_v16 }
 0xa77   : > { %7324 = vmatpush3.bf16.msra.mxu0 %v7909_v37 }
 0xa78   : > { %7325 = vmatprep.subr.bf16.mxu0 %v7964_v16 }
 0xa7b   : > { %7326 = vmatpush3.bf16.msra.mxu0 %v7910_v10  ;;  %v6387_v10 = vld [vmem:[%s10174_s2 + $0x27] ss:$0 sm:$0xff] }
 0xb1e   : > { %v9415_v38 = vpop.f32.mrf.mxu0 }
 0xb1f   : > { %v4137_v22 = vmul.f32 %v9415_v38, %v6339_v35 }
 0xb20   : > { %v9421_v59 = vpop.f32.mrf.mxu0 }
 0xb21   : > { %v4144_v47 = vadd.f32 %v6340_v42, %v4137_v22  ;;  %v4136_v36 = vmul.f32 %v6339_v35, %v9421_v59 }
 0xb23   : > { %v4143_v8 = vadd.f32 %v6340_v42, %v4136_v36  ;;  %v4146_v54 = vmax.f32 %v4144_v47, 0.0  ;;  %v6385_v47 = vld [vmem:[%s10174_s2 + $0x24] ss:$0 sm:$0xff]  ;;  %v6388_v36 = vld [vmem:[%s10174_s2 + $0x28] ss:$0 sm:$0xff] }
 0xb25   : > { %v4145_v48 = vmax.f32 %v4143_v8, 0.0 }
 0xb27   : > { %v4147_v5 = vpack.c.bf16 %v4146_v54, %v4145_v48 }
 0xb29   : > { %7328 = vmatmul.mubr.bf16.vlgmr.msra.gmra.mxu0 %v4147_v5  ;;  %v6389_v5 = vld [vmem:[%s10174_s2 + $0x29] ss:$0 sm:$0xff] }
 0xb2a   : > { %7335 = vmatprep.mubr.msk.f32.mxu0 %vm4288_vm2, %v9427_v63 }
 0xbe9   : > { %v4247_v58 = vpop.f32.mrf.mxu0 }
 0xbea   : > { %v4259_v18 = vmul.f32 %v6365_v29, %v4247_v58 }
 0xbeb   : > { %v7329_v27 = vpop.f32.mrf.mxu0 }
 0xbec   : > { %v4266_v19 = vadd.f32 %v6366_v55, %v4259_v18 }
 0xbed   : > { %v4250_v13 = vpop.f32.mrf.mxu0 }
 0xbee   : > { %v4260_v28 = vmul.f32 %v6365_v29, %v4250_v13  ;;  %v4268_v23 = vmax.f32 %v4266_v19, 0.0  ;;  %v6390_v13 = vld [vmem:[%s10174_s2 + $0x2a] ss:$0 sm:$0xff] }
 0xbef   : > { %v7330_v7 = vpop.f32.mrf.mxu0 }
 0xbf0   : > { %v4267_v25 = vadd.f32 %v6366_v55, %v4260_v28 }
 0xbf2   : > { %v4269_v14 = vmax.f32 %v4267_v25, 0.0 }
 0xbf4   : > { %7331 = vmatprep.subr.mxu0 %v4269_v14 }
 0xbf5   : > { %7332 = vmatpush3.msra.mxu0 %v4269_v14 }
 0xbf6   : > { %7333 = vmatprep.subr.mxu0 %v4268_v23 }
 0xbf7   : > { %7334 = vmatpush3.msra.mxu0 %v4268_v23  ;;  %v6391_v23 = vld [vmem:[%s10174_s2 + $0x2b] ss:$0 sm:$0xff] }
 0xbf8   : > { %7336 = vmatmul.mubr.msk.f32.vlgmr.msra.gmra.mxu0 %vm4288_vm2, %v9440_v9  ;;  %7382 = vmatprep.subr.bf16.mxu0 %v7964_v16 }
 0xbf9   : > { %7338 = vmatprep.mubr.msk.f32.mxu0 %vm4288_vm2, %v9445_v56  ;;  %7383 = vmatpush3.bf16.msra.mxu0 %v7919_v41 }
 0xbfa   : > { %7384 = vmatprep.subr.bf16.mxu0 %v7964_v16 }
 0xbfc   : > { %7339 = vmatmul.mubr.msk.f32.gmra.mxu0 %vm4288_vm2, %v9455_v44 }
 0xbfd   : > { %7341 = vmatprep.mubr.msk.f32.mxu0 %vm4288_vm2, %v9460_v46  ;;  %7385 = vmatpush3.bf16.msra.mxu0 %v7920_v24 }
 0xbfe   : > { %7386 = vmatprep.subr.bf16.mxu0 %v7964_v16 }
 0xc00   : > { %7342 = vmatmul.mubr.msk.f32.gmra.mxu0 %vm4288_vm2, %v9469_v30 }
 0xc01   : > { %7344 = vmatprep.mubr.msk.f32.mxu0 %vm4288_vm2, %v9474_v21  ;;  %7387 = vmatpush3.bf16.msra.mxu0 %v7921_v61 }
 0xc02   : > { %7388 = vmatprep.subr.bf16.mxu0 %v7964_v16 }
 0xc04   : > { %7345 = vmatmul.mubr.msk.f32.gmra.mxu0 %vm4288_vm2, %v9483_v62 }
 0xc05   : > { %7347 = vmatprep.mubr.msk.f32.mxu0 %vm4288_vm2, %v9488_v15  ;;  %7389 = vmatpush3.bf16.msra.mxu0 %v7922_v53 }
 0xc06   : > { %7390 = vmatprep.subr.bf16.mxu0 %v7964_v16 }
 0xc08   : > { %7348 = vmatmul.mubr.msk.f32.gmra.mxu0 %vm4288_vm2, %v9497_v32 }
 0xc09   : > { %7350 = vmatprep.mubr.msk.f32.mxu0 %vm4288_vm2, %v9502_v12 }
 0xc0c   : > { %7351 = vmatmul.mubr.msk.f32.gmra.mxu0 %vm4288_vm2, %v9511_v50 }
 0xc0d   : > { %7353 = vmatprep.mubr.msk.f32.mxu0 %vm4288_vm2, %v9516_v39 }
 0xc10   : > { %7354 = vmatmul.mubr.msk.f32.gmra.mxu0 %vm4288_vm2, %v9525_v49 }
 0xc11   : > { %7356 = vmatprep.mubr.msk.f32.mxu0 %vm4288_vm2, %v9530_v33 }
 0xc14   : > { %7357 = vmatmul.mubr.msk.f32.gmra.mxu0 %vm4288_vm2, %v9539_v20 }
 0xc15   : > { %7359 = vmatprep.mubr.msk.f32.mxu0 %vm4288_vm2, %v9544_v51 }
 0xc18   : > { %7360 = vmatmul.mubr.msk.f32.gmra.mxu0 %vm4288_vm2, %v9553_v34 }
 0xc19   : > { %7398 = vmatprep.mubr.msk.bf16.mxu0 %vm7965_vm1, %v7964_v16 }
 0xcb8   : > { %v7337_v52 = vpop.f32.mrf.mxu0 }
 0xcb9   : > { %v4509_v42 = vmul.f32 %v7337_v52, %v6386_v17  ;;  %v6393_v52 = vld [vmem:[%s10174_s2 + $0x2d] ss:$0 sm:$0xff] }
 0xcba   : > { %v4409_v40 = vpop.f32.mrf.mxu0 }
 0xcbb   : > { %v4508_v22 = vmul.f32 %v6386_v17, %v4409_v40  ;;  %v4511_v29 = vadd.f32 %v6385_v47, %v4509_v42 }
 0xcbc   : > { %v7340_v11 = vpop.f32.mrf.mxu0 }
 0xcbd   : > { %v4518_v54 = vmul.f32 %v7340_v11, %v6387_v10  ;;  %v4510_v27 = vadd.f32 %v6385_v47, %v4508_v22 }
 0xcbe   : > { %v4419_v60 = vpop.f32.mrf.mxu0 }
 0xcbf   : > { %v4517_v48 = vmul.f32 %v6387_v10, %v4419_v60  ;;  %v4520_v7 = vadd.f32 %v4518_v54, %v4511_v29 }
 0xcc0   : > { %v7343_v31 = vpop.f32.mrf.mxu0 }
 0xcc1   : > { %v4527_v18 = vmul.f32 %v7343_v31, %v6388_v36  ;;  %v4519_v19 = vadd.f32 %v4517_v48, %v4510_v27 }
 0xcc2   : > { %v4429_v43 = vpop.f32.mrf.mxu0 }
 0xcc3   : > { %v4526_v55 = vmul.f32 %v6388_v36, %v4429_v43  ;;  %v4529_v1 = vadd.f32 %v4527_v18, %v4520_v7  ;;  %v7923_v18 = vld [vmem:[%s10175_s3 + $0x198] sm:$0xff]  }
 0xcc4   : > { %v7346_v6 = vpop.f32.mrf.mxu0  ;;  %7391 = vmatpush3.bf16.msra.mxu0 %v7923_v18  ;;  %v6470_v18 = vld [vmem:[%s10174_s2 + $0x38] ss:$0 sm:$0xff] }
 0xcc5   : > { %v4536_v25 = vmul.f32 %v7346_v6, %v6389_v5  ;;  %v4528_v26 = vadd.f32 %v4526_v55, %v4519_v19  ;;  %v6394_v6 = vld [vmem:[%s10174_s2 + $0x2e] ss:$0 sm:$0xff]  ;;  %7392 = vmatprep.subr.bf16.mxu0 %v7964_v16  ;;  %v7924_v55 = vld [vmem:[%s10175_s3 + $0x190] sm:$0xff]  }
 0xcc6   : > { %v4439_v37 = vpop.f32.mrf.mxu0 }
 0xcc7   : > { %v4535_v14 = vmul.f32 %v6389_v5, %v4439_v37  ;;  %v4538_v57 = vadd.f32 %v4536_v25, %v4529_v1  ;;  %v6420_v25 = vld [vmem:[%s10174_s2 + $0x2f] ss:$0 sm:$0xff] }
 0xcc8   : > { %v7349_v35 = vpop.f32.mrf.mxu0  ;;  %7393 = vmatpush3.bf16.msra.mxu0 %v7924_v55 }
 0xcc9   : > { %v4545_v0 = vmul.f32 %v7349_v35, %v6390_v13  ;;  %v4537_v41 = vadd.f32 %v4535_v14, %v4528_v26  ;;  %7394 = vmatprep.subr.bf16.mxu0 %v7964_v16 }
 0xcca   : > { %v4449_v8 = vpop.f32.mrf.mxu0 }
 0xccb   : > { %v4544_v3 = vmul.f32 %v6390_v13, %v4449_v8  ;;  %v4547_v40 = vadd.f32 %v4545_v0, %v4538_v57  ;;  %v7925_v13 = vld [vmem:[%s10175_s3 + $0x188] sm:$0xff]   ;;  %v6421_v0 = vld [vmem:[%s10174_s2 + $0x30] ss:$0 sm:$0xff] }
 0xccc   : > { %v7352_v58 = vpop.f32.mrf.mxu0  ;;  %7395 = vmatpush3.bf16.msra.mxu0 %v7925_v13 }
 0xccd   : > { %v4554_v24 = vmul.f32 %v7352_v58, %v6391_v23  ;;  %v4546_v11 = vadd.f32 %v4544_v3, %v4537_v41  ;;  %7396 = vmatprep.subr.bf16.mxu0 %v7964_v16 }
 0xcce   : > { %v4459_v28 = vpop.f32.mrf.mxu0 }
 0xccf   : > { %v4553_v61 = vmul.f32 %v6391_v23, %v4459_v28  ;;  %v4556_v17 = vadd.f32 %v4554_v24, %v4547_v40  ;;  %v6411_v28 = vld [vmem:[%s10174_s2 + $0x25] ss:$0 sm:$0xff] }
 0xcd0   : > { %v7355_v4 = vpop.f32.mrf.mxu0 }
 0xcd1   : > { %v4563_v60 = vmul.f32 %v7355_v4, %v6392_v45  ;;  %v4555_v37 = vadd.f32 %v4553_v61, %v4546_v11 }
 0xcd2   : > { %v4469_v2 = vpop.f32.mrf.mxu0 }
 0xcd3   : > { %v4562_v31 = vmul.f32 %v6392_v45, %v4469_v2  ;;  %v4565_v22 = vadd.f32 %v4563_v60, %v4556_v17 }
 0xcd4   : > { %v7358_v53 = vpop.f32.mrf.mxu0 }
 0xcd5   : > { %v4572_v10 = vmul.f32 %v7358_v53, %v6393_v52  ;;  %v4564_v47 = vadd.f32 %v4562_v31, %v4555_v37 }
 0xcd6   : > { %v4479_v43 = vpop.f32.mrf.mxu0 }
 0xcd7   : > { %v4571_v35 = vmul.f32 %v6393_v52, %v4479_v43  ;;  %v4574_v54 = vadd.f32 %v4572_v10, %v4565_v22  ;;  %v6446_v52 = vld [vmem:[%s10174_s2 + $0x31] ss:$0 sm:$0xff] }
 0xcd8   : > { %v7361_v42 = vpop.f32.mrf.mxu0 }
 0xcd9   : > { %v4581_v36 = vmul.f32 %v7361_v42, %v6394_v6  ;;  %v4573_v48 = vadd.f32 %v4571_v35, %v4564_v47  ;;  %v6467_v42 = vld [vmem:[%s10174_s2 + $0x35] ss:$0 sm:$0xff]  ;;  %v6468_v47 = vld [vmem:[%s10174_s2 + $0x36] ss:$0 sm:$0xff] }
 0xcda   : > { %v4489_v8 = vpop.f32.mrf.mxu0 }
 0xcdb   : > { %v4580_v5 = vmul.f32 %v6394_v6, %v4489_v8  ;;  %v4583_v58 = vadd.f32 %v4581_v36, %v4574_v54 }
 0xcdd   : > { %v4582_v29 = vadd.f32 %v4580_v5, %v4573_v48  ;;  %v6466_v48 = vld [vmem:[%s10174_s2 + $0x33] ss:$0 sm:$0xff]  ;;  %v6469_v5 = vld [vmem:[%s10174_s2 + $0x37] ss:$0 sm:$0xff] }
 0xcdf   : > { %v4584_v27 = vpack.c.bf16 %v4583_v58, %v4582_v29 }
 0xce1   : > { %7379 = vmatmul.mubr.bf16.vlgmr.msra.gmra.mxu1 %v4584_v27 }
 0xce2   : > { %7406 = vmatprep.mubr.msk.f32.mxu1 %vm4288_vm2, %v9427_v63  ;;  %v7926_v63 = vld [vmem:[%s10175_s3 + $0x180] sm:$0xff]  }
 0xce3   : > { %7397 = vmatpush3.bf16.msra.mxu0 %v7926_v63 }
 0xce4   : > { %7433 = vmatprep.subr.bf16.mxu0 %v7964_v16 }
 0xda1   : > { %v4689_v7 = vpop.f32.mrf.mxu1 }
 0xda2   : > { %v4690_v19 = vadd.f32 %v6411_v28, %v4689_v7 }
 0xda3   : > { %v7380_v14 = vpop.f32.mrf.mxu1 }
 0xda4   : > { %v9661_v23 = vadd.f32 %v4690_v19, %v9421_v59  ;;  %v6471_v19 = vld [vmem:[%s10174_s2 + $0x39] ss:$0 sm:$0xff] }
 0xda5   : > { %v4692_v4 = vpop.f32.mrf.mxu1 }
 0xda6   : > { %v4703_v1 = vmul.f32 %v6420_v25, %v9661_v23  ;;  %v4693_v26 = vadd.f32 %v6411_v28, %v4692_v4 }
 0xda7   : > { %v7381_v3 = vpop.f32.mrf.mxu1 }
 0xda8   : > { %v9668_v45 = vadd.f32 %v9415_v38, %v4693_v26  ;;  %v4710_v2 = vadd.f32 %v6421_v0, %v4703_v1  ;;  %v6447_v38 = vld [vmem:[%s10174_s2 + $0x32] ss:$0 sm:$0xff] }
 0xdaa   : > { %v4704_v57 = vmul.f32 %v6420_v25, %v9668_v45  ;;  %v4712_v24 = vmax.f32 %v4710_v2, 0.0 }
 0xdac   : > { %v4711_v41 = vadd.f32 %v6421_v0, %v4704_v57  ;;  %v6472_v0 = vld [vmem:[%s10174_s2 + $0x3a] ss:$0 sm:$0xff] }
 0xdae   : > { %v4713_v61 = vmax.f32 %v4711_v41, 0.0 }
 0xdb0   : > { %v4714_v59 = vpack.c.bf16 %v4713_v61, %v4712_v24  ;;  %v6473_v61 = vld [vmem:[%s10174_s2 + $0x3b] ss:$0 sm:$0xff] }
 0xdb2   : > { %7399 = vmatmul.mubr.bf16.vlgmr.msra.gmra.mxu0 %v4714_v59 }
 0xdb3   : > { %7449 = vmatprep.mubr.msk.bf16.mxu0 %vm7965_vm1, %v7964_v16 }
 0xe72   : > { %v4814_v53 = vpop.f32.mrf.mxu0 }
 0xe73   : > { %v4826_v11 = vmul.f32 %v6446_v52, %v4814_v53 }
 0xe74   : > { %v7400_v40 = vpop.f32.mrf.mxu0 }
 0xe75   : > { %v4833_v6 = vadd.f32 %v6447_v38, %v4826_v11 }
 0xe76   : > { %v4817_v60 = vpop.f32.mrf.mxu0 }
 0xe77   : > { %v4827_v31 = vmul.f32 %v6446_v52, %v4817_v60  ;;  %v4835_v10 = vmax.f32 %v4833_v6, 0.0  ;;  %v6474_v60 = vld [vmem:[%s10174_s2 + $0x3c] ss:$0 sm:$0xff] }
 0xe78   : > { %v7401_v43 = vpop.f32.mrf.mxu0 }
 0xe79   : > { %v4834_v17 = vadd.f32 %v6447_v38, %v4827_v31 }
 0xe7b   : > { %v4836_v37 = vmax.f32 %v4834_v17, 0.0 }
 0xe7d   : > { %7402 = vmatprep.subr.mxu1 %v4836_v37 }
 0xe7e   : > { %7403 = vmatpush3.msra.mxu1 %v4836_v37 }
 0xe7f   : > { %7404 = vmatprep.subr.mxu1 %v4835_v10 }
 0xe80   : > { %7405 = vmatpush3.msra.mxu1 %v4835_v10  ;;  %v6475_v10 = vld [vmem:[%s10174_s2 + $0x3d] ss:$0 sm:$0xff] }
 0xe81   : > { %7407 = vmatmul.mubr.msk.f32.vlgmr.msra.gmra.mxu1 %vm4288_vm2, %v9440_v9  ;;  %7453 = vmatprep.subr.mxu1 %v7964_v16  ;;  %v7927_v9 = vld [vmem:[%s10175_s3 + $0x1f8] sm:$0xff]  }
 0xe82   : > { %7409 = vmatprep.mubr.msk.f32.mxu1 %vm4288_vm2, %v9445_v56  ;;  %7434 = vmatpush3.bf16.msra.mxu0 %v7927_v9  ;;  %v7928_v56 = vld [vmem:[%s10175_s3 + $0x1f0] sm:$0xff]  }
 0xe83   : > { %7435 = vmatprep.subr.bf16.mxu0 %v7964_v16 }
 0xe85   : > { %7410 = vmatmul.mubr.msk.f32.gmra.mxu1 %vm4288_vm2, %v9455_v44  ;;  %v7929_v44 = vld [vmem:[%s10175_s3 + $0x1e8] sm:$0xff]  }
 0xe86   : > { %7412 = vmatprep.mubr.msk.f32.mxu1 %vm4288_vm2, %v9460_v46  ;;  %7436 = vmatpush3.bf16.msra.mxu0 %v7928_v56  ;;  %v7930_v46 = vld [vmem:[%s10175_s3 + $0x1e0] sm:$0xff]  }
 0xe87   : > { %7437 = vmatprep.subr.bf16.mxu0 %v7964_v16 }
 0xe89   : > { %7413 = vmatmul.mubr.msk.f32.gmra.mxu1 %vm4288_vm2, %v9469_v30  ;;  %v7931_v30 = vld [vmem:[%s10175_s3 + $0x1d8] sm:$0xff]  }
 0xe8a   : > { %7415 = vmatprep.mubr.msk.f32.mxu1 %vm4288_vm2, %v9474_v21  ;;  %7438 = vmatpush3.bf16.msra.mxu0 %v7929_v44  ;;  %v7932_v21 = vld [vmem:[%s10175_s3 + $0x1d0] sm:$0xff]  }
 0xe8b   : > { %7439 = vmatprep.subr.bf16.mxu0 %v7964_v16 }
 0xe8d   : > { %7416 = vmatmul.mubr.msk.f32.gmra.mxu1 %vm4288_vm2, %v9483_v62  ;;  %v7933_v62 = vld [vmem:[%s10175_s3 + $0x1c8] sm:$0xff]  }
 0xe8e   : > { %7418 = vmatprep.mubr.msk.f32.mxu1 %vm4288_vm2, %v9488_v15  ;;  %7440 = vmatpush3.bf16.msra.mxu0 %v7930_v46  ;;  %v7934_v15 = vld [vmem:[%s10175_s3 + $0x1c0] sm:$0xff]  }
 0xe8f   : > { %7441 = vmatprep.subr.bf16.mxu0 %v7964_v16 }
 0xe91   : > { %7419 = vmatmul.mubr.msk.f32.gmra.mxu1 %vm4288_vm2, %v9497_v32  ;;  %v5236_v32 = vld [vmem:[%s10176_s4 + $0x78] sm:$0xff] }
 0xe92   : > { %7421 = vmatprep.mubr.msk.f32.mxu1 %vm4288_vm2, %v9502_v12  ;;  %7442 = vmatpush3.bf16.msra.mxu0 %v7931_v30  ;;  %v5235_v12 = vld [vmem:[%s10176_s4 + $0x70] sm:$0xff] }
 0xe93   : > { %7443 = vmatprep.subr.bf16.mxu0 %v7964_v16  ;;  %7454 = vmatpush3.msra.mxu1 %v5236_v32 }
 0xe94   : > { %7455 = vmatprep.subr.mxu1 %v7964_v16 }
 0xe95   : > { %7422 = vmatmul.mubr.msk.f32.gmra.mxu1 %vm4288_vm2, %v9511_v50  ;;  %v5234_v50 = vld [vmem:[%s10176_s4 + $0x68] sm:$0xff] }
 0xe96   : > { %7424 = vmatprep.mubr.msk.f32.mxu1 %vm4288_vm2, %v9516_v39  ;;  %7444 = vmatpush3.bf16.msra.mxu0 %v7932_v21 }
 0xe97   : > { %7445 = vmatprep.subr.bf16.mxu0 %v7964_v16  ;;  %7456 = vmatpush3.msra.mxu1 %v5235_v12 }
 0xe98   : > { %7457 = vmatprep.subr.mxu1 %v7964_v16 }
 0xe99   : > { %7425 = vmatmul.mubr.msk.f32.gmra.mxu1 %vm4288_vm2, %v9525_v49 }
 0xe9a   : > { %7427 = vmatprep.mubr.msk.f32.mxu1 %vm4288_vm2, %v9530_v33  ;;  %7446 = vmatpush3.bf16.msra.mxu0 %v7933_v62 }
 0xe9b   : > { %7447 = vmatprep.subr.bf16.mxu0 %v7964_v16  ;;  %7458 = vmatpush3.msra.mxu1 %v5234_v50 }
 0xe9c   : > { %7459 = vmatprep.subr.mxu1 %v7964_v16 }
 0xe9d   : > { %7428 = vmatmul.mubr.msk.f32.gmra.mxu1 %vm4288_vm2, %v9539_v20 }
 0xe9e   : > { %7430 = vmatprep.mubr.msk.f32.mxu1 %vm4288_vm2, %v9544_v51  ;;  %7448 = vmatpush3.bf16.msra.mxu0 %v7934_v15 }
 0xe9f   : > { %7488 = vmatprep.subr.mxu0 %v7964_v16 }
 0xea1   : > { %7431 = vmatmul.mubr.msk.f32.gmra.mxu1 %vm4288_vm2, %v9553_v34 }
 0xea2   : > { %7485 = vmatprep.mubr.msk.f32.mxu1 %vm7965_vm1, %v7964_v16 }
 0xf41   : > { %v7408_v39 = vpop.f32.mrf.mxu1 }
 0xf42   : > { %v5003_v8 = vmul.f32 %v7408_v39, %v6467_v42 }
 0xf43   : > { %v4903_v49 = vpop.f32.mrf.mxu1 }
 0xf44   : > { %v5002_v54 = vmul.f32 %v6467_v42, %v4903_v49  ;;  %v5005_v13 = vadd.f32 %v6466_v48, %v5003_v8  ;;  %v5230_v42 = vld [vmem:[%s10176_s4 + $0x48] sm:$0xff] }
 0xf45   : > { %v7411_v33 = vpop.f32.mrf.mxu1  ;;  %v5226_v8 = vld [vmem:[%s10176_s4 + $0x28] sm:$0xff] }
 0xf46   : > { %v5012_v29 = vmul.f32 %v7411_v33, %v6468_v47  ;;  %v5004_v63 = vadd.f32 %v6466_v48, %v5002_v54  ;;  %v5225_v54 = vld [vmem:[%s10176_s4 + $0x20] sm:$0xff]  ;;  %v5224_v48 = vld [vmem:[%s10176_s4 + $0x18] sm:$0xff] }
 0xf47   : > { %v4913_v20 = vpop.f32.mrf.mxu1 }
 0xf48   : > { %v5011_v27 = vmul.f32 %v6468_v47, %v4913_v20  ;;  %v5014_v14 = vadd.f32 %v5012_v29, %v5005_v13  ;;  %v5228_v47 = vld [vmem:[%s10176_s4 + $0x38] sm:$0xff]  ;;  %v5221_v29 = vld [vmem:[%s10176_s4] sm:$0xff] }
 0xf49   : > { %v7414_v51 = vpop.f32.mrf.mxu1  ;;  %v6515_v13 = vld [vmem:[%s10176_s4 + $0xe0] sm:$0xff] }
 0xf4a   : > { %v5021_v28 = vmul.f32 %v7414_v51, %v6469_v5  ;;  %v5013_v4 = vadd.f32 %v5011_v27, %v5004_v63  ;;  %v5233_v51 = vld [vmem:[%s10176_s4 + $0x60] sm:$0xff]  ;;  %v6518_v27 = vld [vmem:[%s10176_s4 + $0xf8] sm:$0xff] }
 0xf4b   : > { %v4923_v34 = vpop.f32.mrf.mxu1  ;;  %7460 = vmatpush3.msra.mxu1 %v5233_v51  ;;  %v6514_v63 = vld [vmem:[%s10176_s4 + $0xd8] sm:$0xff]  ;;  %v6526_v51 = vld [vmem:[%s10176_s4 + $0x130] sm:$0xff] }
 0xf4c   : > { %v5020_v7 = vmul.f32 %v6469_v5, %v4923_v34  ;;  %v5023_v2 = vadd.f32 %v5021_v28, %v5014_v14  ;;  %7461 = vmatprep.subr.mxu1 %v7964_v16  ;;  %v5232_v34 = vld [vmem:[%s10176_s4 + $0x58] sm:$0xff]  ;;  %v5223_v5 = vld [vmem:[%s10176_s4 + $0x10] sm:$0xff] }
 0xf4d   : > { %v7417_v35 = vpop.f32.mrf.mxu1  ;;  %7462 = vmatpush3.msra.mxu1 %v5232_v34  ;;  %v6513_v28 = vld [vmem:[%s10176_s4 + $0xd0] sm:$0xff]  ;;  %v6525_v34 = vld [vmem:[%s10176_s4 + $0x128] sm:$0xff] }
 0xf4e   : > { %v5030_v1 = vmul.f32 %v7417_v35, %v6470_v18  ;;  %v5022_v57 = vadd.f32 %v5020_v7, %v5013_v4  ;;  %7463 = vmatprep.subr.mxu1 %v7964_v16  ;;  %v5231_v35 = vld [vmem:[%s10176_s4 + $0x50] sm:$0xff]  ;;  %v6512_v7 = vld [vmem:[%s10176_s4 + $0xc8] sm:$0xff] }
 0xf4f   : > { %v4933_v22 = vpop.f32.mrf.mxu1  ;;  %7464 = vmatpush3.msra.mxu1 %v5231_v35  ;;  %v6509_v14 = vld [vmem:[%s10176_s4 + $0xb0] sm:$0xff]  ;;  %v6508_v4 = vld [vmem:[%s10176_s4 + $0xa8] sm:$0xff] }
 0xf50   : > { %v5029_v26 = vmul.f32 %v6470_v18, %v4933_v22  ;;  %v5032_v53 = vadd.f32 %v5030_v1, %v5023_v2  ;;  %7465 = vmatprep.subr.mxu1 %v7964_v16  ;;  %v5229_v22 = vld [vmem:[%s10176_s4 + $0x40] sm:$0xff]  ;;  %v6517_v18 = vld [vmem:[%s10176_s4 + $0xf0] sm:$0xff] }
 0xf51   : > { %v7420_v36 = vpop.f32.mrf.mxu1  ;;  %7466 = vmatpush3.msra.mxu1 %v5230_v42  ;;  %v6507_v1 = vld [vmem:[%s10176_s4 + $0xa0] sm:$0xff]  ;;  %v6492_v2 = vld [vmem:[%s10174_s2 + $0x34] ss:$0 sm:$0xff] }
 0xf52   : > { %v5039_v41 = vmul.f32 %v7420_v36, %v6471_v19  ;;  %v5031_v52 = vadd.f32 %v5029_v26, %v5022_v57  ;;  %7467 = vmatprep.subr.mxu1 %v7964_v16  ;;  %v5227_v36 = vld [vmem:[%s10176_s4 + $0x30] sm:$0xff]  ;;  %v6506_v26 = vld [vmem:[%s10176_s4 + $0x98] sm:$0xff]  ;;  %v6524_v42 = vld [vmem:[%s10176_s4 + $0x120] sm:$0xff] }
 0xf53   : > { %v4943_v58 = vpop.f32.mrf.mxu1  ;;  %7468 = vmatpush3.msra.mxu1 %v5229_v22  ;;  %v6523_v22 = vld [vmem:[%s10176_s4 + $0x118] sm:$0xff] }
 0xf54   : > { %v5038_v24 = vmul.f32 %v6471_v19, %v4943_v58  ;;  %v5041_v31 = vadd.f32 %v5039_v41, %v5032_v53  ;;  %7469 = vmatprep.subr.mxu1 %v7964_v16  ;;  %v5222_v58 = vld [vmem:[%s10176_s4 + $0x8] sm:$0xff]  ;;  %v6511_v19 = vld [vmem:[%s10176_s4 + $0xc0] sm:$0xff] }
 0xf55   : > { %v7423_v55 = vpop.f32.mrf.mxu1  ;;  %7470 = vmatpush3.msra.mxu1 %v5228_v47 }
 0xf56   : > { %v5048_v40 = vmul.f32 %v7423_v55, %v6472_v0  ;;  %v5040_v43 = vadd.f32 %v5038_v24, %v5031_v52  ;;  %7471 = vmatprep.subr.mxu1 %v7964_v16  ;;  %v6516_v55 = vld [vmem:[%s10176_s4 + $0xe8] sm:$0xff] }
 0xf57   : > { %v4953_v25 = vpop.f32.mrf.mxu1  ;;  %7472 = vmatpush3.msra.mxu1 %v5227_v36  ;;  %v6522_v36 = vld [vmem:[%s10176_s4 + $0x110] sm:$0xff] }
 0xf58   : > { %v5047_v11 = vmul.f32 %v6472_v0, %v4953_v25  ;;  %v5050_v9 = vadd.f32 %v5048_v40, %v5041_v31  ;;  %7473 = vmatprep.subr.mxu1 %v7964_v16  ;;  %v6510_v25 = vld [vmem:[%s10176_s4 + $0xb8] sm:$0xff]  ;;  %v6505_v0 = vld [vmem:[%s10176_s4 + $0x90] sm:$0xff] }
 0xf59   : > { %v7426_v3 = vpop.f32.mrf.mxu1  ;;  %7474 = vmatpush3.msra.mxu1 %v5226_v8  ;;  %v6521_v8 = vld [vmem:[%s10176_s4 + $0x108] sm:$0xff] }
 0xf5a   : > { %v5057_v6 = vmul.f32 %v7426_v3, %v6473_v61  ;;  %v5049_v56 = vadd.f32 %v5047_v11, %v5040_v43  ;;  %7475 = vmatprep.subr.mxu1 %v7964_v16  ;;  %v6504_v3 = vld [vmem:[%s10176_s4 + $0x88] sm:$0xff] }
 0xf5b   : > { %v4963_v59 = vpop.f32.mrf.mxu1  ;;  %7476 = vmatpush3.msra.mxu1 %v5225_v54 }
 0xf5c   : > { %v5056_v17 = vmul.f32 %v6473_v61, %v4963_v59  ;;  %v5059_v21 = vadd.f32 %v5057_v6, %v5050_v9  ;;  %7477 = vmatprep.subr.mxu1 %v7964_v16  ;;  %v6501_v59 = vld [vmem:[%s10174_s2 + $0x40] ss:$0 sm:$0xff] }
 0xf5d   : > { %v7429_v38 = vpop.f32.mrf.mxu1  ;;  %7478 = vmatpush3.msra.mxu1 %v5224_v48  ;;  %v6520_v48 = vld [vmem:[%s10176_s4 + $0x100] sm:$0xff] }
 0xf5e   : > { %v5066_v44 = vmul.f32 %v7429_v38, %v6474_v60  ;;  %v5058_v62 = vadd.f32 %v5056_v17, %v5049_v56  ;;  %7479 = vmatprep.subr.mxu1 %v7964_v16 }
 0xf5f   : > { %v4973_v37 = vpop.f32.mrf.mxu1  ;;  %7480 = vmatpush3.msra.mxu1 %v5223_v5 }
 0xf60   : > { %v5065_v46 = vmul.f32 %v6474_v60, %v4973_v37  ;;  %v5068_v12 = vadd.f32 %v5066_v44, %v5059_v21  ;;  %7481 = vmatprep.subr.mxu1 %v7964_v16  ;;  %v6502_v60 = vld [vmem:[%s10174_s2 + $0x41] ss:$0 sm:$0xff]  ;;  %v6533_v21 = vld [vmem:[%s10176_s4 + $0x168] sm:$0xff] }
 0xf61   : > { %v7432_v30 = vpop.f32.mrf.mxu1  ;;  %7482 = vmatpush3.msra.mxu1 %v5222_v58  ;;  %v6503_v58 = vld [vmem:[%s10176_s4 + $0x80] sm:$0xff] }
 0xf62   : > { %v5075_v15 = vmul.f32 %v7432_v30, %v6475_v10  ;;  %v5067_v50 = vadd.f32 %v5065_v46, %v5058_v62  ;;  %7483 = vmatprep.subr.mxu1 %v7964_v16  ;;  %v6534_v46 = vld [vmem:[%s10176_s4 + $0x170] sm:$0xff]  ;;  %v6532_v62 = vld [vmem:[%s10176_s4 + $0x160] sm:$0xff] }
 0xf63   : > { %v4983_v32 = vpop.f32.mrf.mxu1  ;;  %7484 = vmatpush3.msra.mxu1 %v5221_v29 }
 0xf64   : > { %v5074_v39 = vmul.f32 %v6475_v10, %v4983_v32  ;;  %v5077_v49 = vadd.f32 %v5075_v15, %v5068_v12  ;;  %7523 = vmatprep.subr.mxu1 %v7964_v16  ;;  %v6531_v32 = vld [vmem:[%s10176_s4 + $0x158] sm:$0xff]  ;;  %v6530_v12 = vld [vmem:[%s10176_s4 + $0x150] sm:$0xff] }
 0xf66   : > { %v5076_v33 = vadd.f32 %v5074_v39, %v5067_v50  ;;  %v6529_v39 = vld [vmem:[%s10176_s4 + $0x148] sm:$0xff] }
 0xf68   : > { %v5078_v20 = vpack.c.bf16 %v5077_v49, %v5076_v33  ;;  %v6528_v49 = vld [vmem:[%s10176_s4 + $0x140] sm:$0xff] }
 0xf6a   : > { %7450 = vmatmul.mubr.bf16.vlgmr.msra.gmra.mxu0 %v5078_v20  ;;  %v6527_v20 = vld [vmem:[%s10176_s4 + $0x138] sm:$0xff] }
 0xf6b   : > { %7520 = vmatprep.mubr.msk.f32.mxu0 %vm7965_vm1, %v7964_v16  ;;  %7489 = vmatpush3.msra.mxu0 %v6518_v27 }
 0xf6c   : > { %7490 = vmatprep.subr.mxu0 %v7964_v16 }
 0xf6d   : > { %7491 = vmatpush3.msra.mxu0 %v6517_v18  ;;  %v6551_v18 = vld [vmem:[%s10176_s4 + $0x1f8] sm:$0xff] }
 0xf6e   : > { %7492 = vmatprep.subr.mxu0 %v7964_v16 }
 0xf6f   : > { %7493 = vmatpush3.msra.mxu0 %v6516_v55 }
 0xf70   : > { %7494 = vmatprep.subr.mxu0 %v7964_v16 }
 0xf71   : > { %7495 = vmatpush3.msra.mxu0 %v6515_v13  ;;  %v6550_v13 = vld [vmem:[%s10176_s4 + $0x1f0] sm:$0xff] }
 0xf72   : > { %7496 = vmatprep.subr.mxu0 %v7964_v16 }
 0xf73   : > { %7497 = vmatpush3.msra.mxu0 %v6514_v63  ;;  %v6549_v63 = vld [vmem:[%s10176_s4 + $0x1e8] sm:$0xff] }
 0xf74   : > { %7498 = vmatprep.subr.mxu0 %v7964_v16 }
 0xf75   : > { %7499 = vmatpush3.msra.mxu0 %v6513_v28  ;;  %v6548_v28 = vld [vmem:[%s10176_s4 + $0x1e0] sm:$0xff] }
 0xf76   : > { %7500 = vmatprep.subr.mxu0 %v7964_v16 }
 0xf77   : > { %7501 = vmatpush3.msra.mxu0 %v6512_v7  ;;  %v6547_v7 = vld [vmem:[%s10176_s4 + $0x1d8] sm:$0xff] }
 0xf78   : > { %7502 = vmatprep.subr.mxu0 %v7964_v16 }
 0xf79   : > { %7503 = vmatpush3.msra.mxu0 %v6511_v19  ;;  %v6546_v19 = vld [vmem:[%s10176_s4 + $0x1d0] sm:$0xff] }
 0xf7a   : > { %7504 = vmatprep.subr.mxu0 %v7964_v16 }
 0xf7b   : > { %7505 = vmatpush3.msra.mxu0 %v6510_v25  ;;  %v6545_v25 = vld [vmem:[%s10176_s4 + $0x1c8] sm:$0xff] }
 0xf7c   : > { %7506 = vmatprep.subr.mxu0 %v7964_v16 }
 0xf7d   : > { %7507 = vmatpush3.msra.mxu0 %v6509_v14  ;;  %v6544_v14 = vld [vmem:[%s10176_s4 + $0x1c0] sm:$0xff] }
 0xf7e   : > { %7508 = vmatprep.subr.mxu0 %v7964_v16 }
 0xf7f   : > { %7509 = vmatpush3.msra.mxu0 %v6508_v4  ;;  %v6543_v4 = vld [vmem:[%s10176_s4 + $0x1b8] sm:$0xff] }
 0xf80   : > { %7510 = vmatprep.subr.mxu0 %v7964_v16 }
 0xf81   : > { %7511 = vmatpush3.msra.mxu0 %v6507_v1  ;;  %v6542_v1 = vld [vmem:[%s10176_s4 + $0x1b0] sm:$0xff] }
 0xf82   : > { %7512 = vmatprep.subr.mxu0 %v7964_v16 }
 0xf83   : > { %7513 = vmatpush3.msra.mxu0 %v6506_v26  ;;  %v6541_v26 = vld [vmem:[%s10176_s4 + $0x1a8] sm:$0xff] }
 0xf84   : > { %7514 = vmatprep.subr.mxu0 %v7964_v16 }
 0xf85   : > { %7515 = vmatpush3.msra.mxu0 %v6505_v0  ;;  %v6540_v0 = vld [vmem:[%s10176_s4 + $0x1a0] sm:$0xff] }
 0xf86   : > { %7516 = vmatprep.subr.mxu0 %v7964_v16 }
 0xf87   : > { %7517 = vmatpush3.msra.mxu0 %v6504_v3  ;;  %v6539_v3 = vld [vmem:[%s10176_s4 + $0x198] sm:$0xff] }
 0xf88   : > { %7518 = vmatprep.subr.mxu0 %v7964_v16 }
 0xf89   : > { %7519 = vmatpush3.msra.mxu0 %v6503_v58 }
 0xf8a   : > { %7558 = vmatprep.subr.mxu0 %v7964_v16 }
0x102a   : > { %v5183_v57 = vpop.f32.mrf.mxu0 }
0x102b   : > { %v5184_v41 = vadd.f32 %v6492_v2, %v5183_v57  ;;  %v6537_v57 = vld [vmem:[%s10176_s4 + $0x188] sm:$0xff] }
0x102c   : > { %v7451_v24 = vpop.f32.mrf.mxu0 }
0x102d   : > { %v5190_v61 = vadd.f32 %v5184_v41, %v9661_v23  ;;  %v6536_v41 = vld [vmem:[%s10176_s4 + $0x180] sm:$0xff] }
0x102e   : > { %v5186_v53 = vpop.f32.mrf.mxu0 }
0x102f   : > { %v5187_v52 = vadd.f32 %v6492_v2, %v5186_v53  ;;  %v5197_v11 = vmul.f32 %v6501_v59, %v5190_v61  ;;  %v6538_v2 = vld [vmem:[%s10176_s4 + $0x190] sm:$0xff] }
0x1030   : > { %v7452_v40 = vpop.f32.mrf.mxu0 }
0x1031   : > { %v5191_v38 = vadd.f32 %v5187_v52, %v9668_v45  ;;  %v9915_v43 = vadd.f32 %v6502_v60, %v5197_v11  ;;  %v6535_v45 = vld [vmem:[%s10176_s4 + $0x178] sm:$0xff] }
0x1033   : > { %v5198_v31 = vmul.f32 %v6501_v59, %v5191_v38 }
0x1035   : > { %v9917_v6 = vadd.f32 %v6502_v60, %v5198_v31 }
0x1037   : > { %v5206_v23 = vmax.f32 %v9915_v43, %v9917_v6  ;;  %v5213_v30 = vadd.f32 %v9917_v6, %v9915_v43 }
0x1039   : > { %v5207_v17 = vrot.slane %v5206_v23, 4  ;;  %v5214_v15 = vrot.slane %v5213_v30, 4 }
0x103b   : > { %v5208_v37 = vmax.f32 %v5206_v23, %v5207_v17  ;;  %v5215_v50 = vadd.f32 %v5214_v15, %v5213_v30  ;;  %v5589_v30 = vlaneseq }
0x103d   : > { %v5209_v10 = vrot.slane %v5208_v37, 2  ;;  %v5216_v33 = vrot.slane %v5215_v50, 2 }
0x103f   : > { %v5210_v9 = vmax.f32 %v5208_v37, %v5209_v10  ;;  %v5217_v35 = vadd.f32 %v5216_v33, %v5215_v50 }
0x1041   : > { %v5211_v56 = vrot.slane %v5210_v9, 1  ;;  %v5218_v47 = vrot.slane %v5217_v35, 1 }
0x1043   : > { %v5212_v44 = vmax.f32 %v5210_v9, %v5211_v56  ;;  %v5219_v54 = vadd.f32 %v5218_v47, %v5217_v35  ;;  %v6577_v47 = vld [vmem:[%s10176_s4 + $0x278] sm:$0xff] }
0x1045   : > { %7486 = vmatmul.mubr.f32.vlgmr.msra.gmra.mxu1 %v5212_v44  ;;  %v5220_v5 = vmul.f32 0.0625, %v5219_v54  ;;  %v6574_v54 = vld [vmem:[%s10176_s4 + $0x260] sm:$0xff] }
0x1046   : > { %7524 = vmatpush3.msra.mxu1 %v6535_v45  ;;  %7555 = vmatprep.mubr.msk.f32.mxu1 %vm7965_vm1, %v7964_v16 }
0x1047   : > { %7525 = vmatprep.subr.mxu1 %v7964_v16 }
0x1048   : > { %7526 = vmatpush3.msra.mxu1 %v6534_v46 }
0x1049   : > { %7527 = vmatprep.subr.mxu1 %v7964_v16 }
0x104a   : > { %7528 = vmatpush3.msra.mxu1 %v6533_v21  ;;  %v10057_v21 = vshrl.u32 %v5589_v30, 7 }
0x104b   : > { %7529 = vmatprep.subr.mxu1 %v7964_v16 }
0x104c   : > { %7530 = vmatpush3.msra.mxu1 %v6532_v62  ;;  %v5591_v62 = vsub.s32 0, %v10057_v21 }
0x104d   : > { %7531 = vmatprep.subr.mxu1 %v7964_v16 }
0x104e   : > { %7532 = vmatpush3.msra.mxu1 %v6531_v32 }
0x104f   : > { %7533 = vmatprep.subr.mxu1 %v7964_v16 }
0x1050   : > { %7534 = vmatpush3.msra.mxu1 %v6530_v12  ;;  %v6554_v12 = vld [vmem:[%s10174_s2 + $0x42] ss:$0 sm:$0xff] }
0x1051   : > { %7535 = vmatprep.subr.mxu1 %v7964_v16 }
0x1052   : > { %7536 = vmatpush3.msra.mxu1 %v6529_v39 }
0x1053   : > { %7537 = vmatprep.subr.mxu1 %v7964_v16 }
0x1054   : > { %7538 = vmatpush3.msra.mxu1 %v6528_v49 }
0x1055   : > { %7539 = vmatprep.subr.mxu1 %v7964_v16 }
0x1056   : > { %7540 = vmatpush3.msra.mxu1 %v6527_v20  ;;  %v5611_v20 = vld [vmem:[%s10181_s9] sm:$0xff] }
0x1057   : > { %7541 = vmatprep.subr.mxu1 %v7964_v16 }
0x1058   : > { %7542 = vmatpush3.msra.mxu1 %v6526_v51 }
0x1059   : > { %7543 = vmatprep.subr.mxu1 %v7964_v16 }
0x105a   : > { %7544 = vmatpush3.msra.mxu1 %v6525_v34  ;;  %v5612_v34 = vld [vmem:[%s10181_s9 + $0x8] sm:$0xff] }
0x105b   : > { %7545 = vmatprep.subr.mxu1 %v7964_v16 }
0x105c   : > { %7546 = vmatpush3.msra.mxu1 %v6524_v42 }
0x105d   : > { %7547 = vmatprep.subr.mxu1 %v7964_v16 }
0x105e   : > { %7548 = vmatpush3.msra.mxu1 %v6523_v22  ;;  %v5614_v22 = vld [vmem:[%s10181_s9 + $0x18] sm:$0xff] }
0x105f   : > { %7549 = vmatprep.subr.mxu1 %v7964_v16 }
0x1060   : > { %7550 = vmatpush3.msra.mxu1 %v6522_v36  ;;  %v6576_v36 = vld [vmem:[%s10176_s4 + $0x270] sm:$0xff] }
0x1061   : > { %7551 = vmatprep.subr.mxu1 %v7964_v16 }
0x1062   : > { %7552 = vmatpush3.msra.mxu1 %v6521_v8  ;;  %v6575_v8 = vld [vmem:[%s10176_s4 + $0x268] sm:$0xff] }
0x1063   : > { %7553 = vmatprep.subr.mxu1 %v7964_v16 }
0x1064   : > { %7554 = vmatpush3.msra.mxu1 %v6520_v48  ;;  %v6573_v48 = vld [vmem:[%s10176_s4 + $0x258] sm:$0xff] }
0x1065   : > { %7556 = vmatmul.mubr.f32.vlgmr.msra.gmra.mxu1 %v5220_v5 }
0x1066   : > { %7604 = vmatprep.mubr.msk.f32.mxu1 %vm4288_vm2, %v5611_v20 }
0x1105   : > { %v5303_v29 = vpop.f32.mrf.mxu1 }
0x1106   : > { %v5307_v27 = vmax.f32 %v5303_v29, 0.0  ;;  %v6559_v29 = vld [vmem:[%s10174_s2 + $0x43] ss:$0 sm:$0xff] }
0x1107   : > { %v7487_v55 = vpop.f32.mrf.mxu1 }
0x1108   : > { %7521 = vmatmul.mubr.f32.vlgmr.msra.gmra.mxu0 %v5307_v27 }
0x1109   : > { %7559 = vmatpush3.msra.mxu0 %v6551_v18  ;;  %7590 = vmatprep.mubr.msk.f32.mxu0 %vm7965_vm1, %v7964_v16 }
0x110a   : > { %7560 = vmatprep.subr.mxu0 %v7964_v16 }
0x110b   : > { %7561 = vmatpush3.msra.mxu0 %v6550_v13 }
0x110c   : > { %7562 = vmatprep.subr.mxu0 %v7964_v16 }
0x110d   : > { %7563 = vmatpush3.msra.mxu0 %v6549_v63 }
0x110e   : > { %7564 = vmatprep.subr.mxu0 %v7964_v16 }
0x110f   : > { %7565 = vmatpush3.msra.mxu0 %v6548_v28 }
0x1110   : > { %7566 = vmatprep.subr.mxu0 %v7964_v16 }
0x1111   : > { %7567 = vmatpush3.msra.mxu0 %v6547_v7 }
0x1112   : > { %7568 = vmatprep.subr.mxu0 %v7964_v16 }
0x1113   : > { %7569 = vmatpush3.msra.mxu0 %v6546_v19 }
0x1114   : > { %7570 = vmatprep.subr.mxu0 %v7964_v16 }
0x1115   : > { %7571 = vmatpush3.msra.mxu0 %v6545_v25 }
0x1116   : > { %7572 = vmatprep.subr.mxu0 %v7964_v16 }
0x1117   : > { %7573 = vmatpush3.msra.mxu0 %v6544_v14 }
0x1118   : > { %7574 = vmatprep.subr.mxu0 %v7964_v16 }
0x1119   : > { %7575 = vmatpush3.msra.mxu0 %v6543_v4 }
0x111a   : > { %7576 = vmatprep.subr.mxu0 %v7964_v16 }
0x111b   : > { %7577 = vmatpush3.msra.mxu0 %v6542_v1 }
0x111c   : > { %7578 = vmatprep.subr.mxu0 %v7964_v16 }
0x111d   : > { %7579 = vmatpush3.msra.mxu0 %v6541_v26  ;;  %v6572_v26 = vld [vmem:[%s10176_s4 + $0x250] sm:$0xff] }
0x111e   : > { %7580 = vmatprep.subr.mxu0 %v7964_v16 }
0x111f   : > { %7581 = vmatpush3.msra.mxu0 %v6540_v0  ;;  %v6571_v0 = vld [vmem:[%s10176_s4 + $0x248] sm:$0xff] }
0x1120   : > { %7582 = vmatprep.subr.mxu0 %v7964_v16 }
0x1121   : > { %7583 = vmatpush3.msra.mxu0 %v6539_v3 }
0x1122   : > { %7584 = vmatprep.subr.mxu0 %v7964_v16 }
0x1123   : > { %7585 = vmatpush3.msra.mxu0 %v6538_v2  ;;  %v6570_v2 = vld [vmem:[%s10176_s4 + $0x240] sm:$0xff] }
0x1124   : > { %7586 = vmatprep.subr.mxu0 %v7964_v16 }
0x1125   : > { %v5484_v24 = vpop.f32.mrf.mxu1  ;;  %7587 = vmatpush3.msra.mxu0 %v6537_v57 }
0x1126   : > { %v5488_v61 = vmax.f32 %v5484_v24, 0.0  ;;  %7588 = vmatprep.subr.mxu0 %v7964_v16  ;;  %v6568_v24 = vld [vmem:[%s10176_s4 + $0x230] sm:$0xff] }
0x1127   : > { %v7557_v59 = vpop.f32.mrf.mxu1  ;;  %7589 = vmatpush3.msra.mxu0 %v6536_v41  ;;  %v6569_v41 = vld [vmem:[%s10176_s4 + $0x238] sm:$0xff] }
0x1128   : > { %7591 = vmatmul.mubr.f32.vlgmr.msra.gmra.mxu0 %v5488_v61  ;;  %v6567_v61 = vld [vmem:[%s10176_s4 + $0x228] sm:$0xff]  ;;  %v6566_v59 = vld [vmem:[%s10176_s4 + $0x220] sm:$0xff] }
0x11c8   : > { %v5391_v53 = vpop.f32.mrf.mxu0 }
0x11c9   : > { %v6519_v40 = vmul.f32 -1.442695, %v5391_v53  ;;  %v6565_v53 = vld [vmem:[%s10176_s4 + $0x218] sm:$0xff] }
0x11ca   : > { %v7522_v52 = vpop.f32.mrf.mxu0 }
0x11cb   : > { %7935 = vpow2.f32 %v6519_v40  ;;  %v6564_v52 = vld [vmem:[%s10176_s4 + $0x210] sm:$0xff]  ;;  %v6563_v40 = vld [vmem:[%s10176_s4 + $0x208] sm:$0xff] }
0x11d8   : > { %v7936_v31 = vpop.eup %7935 }
0x11d9   : > { %v5398_v23 = vadd.f32 1.0, %v7936_v31 }
0x11e8   : > { %v5572_v11 = vpop.f32.mrf.mxu0 }
0x11e9   : > { %v6552_v38 = vmul.f32 -1.442695, %v5572_v11  ;;  %v6562_v11 = vld [vmem:[%s10176_s4 + $0x200] sm:$0xff] }
0x11ea   : > { %v7592_v60 = vpop.f32.mrf.mxu0 }
0x11eb   : > { %7937 = vpow2.f32 %v6552_v38 }
0x11ec   : > { %7939 = vrcp.f32 %v5398_v23 }
0x11f8   : > { %v7938_v17 = vpop.eup %7937 }
0x11f9   : > { %v5579_v37 = vadd.f32 1.0, %v7938_v17  ;;  %v7940_v10 = vpop.eup %7939 }
0x11fb   : > { %7941 = vrcp.f32 %v5579_v37 }
0x1208   : > { %v7942_v9 = vpop.eup %7941 }
0x1209   : > { %v5582_v56 = vadd.f32 %v7942_v9, %v7940_v10 }
0x120b   : > { %v6553_v44 = vmul.f32 -1.442695, %v5582_v56 }
0x120d   : > { %7943 = vpow2.f32 %v6553_v44 }
0x121a   : > { %v7944_v45 = vpop.eup %7943 }
0x121b   : > { %v5586_v46 = vadd.f32 1.0, %v7944_v45 }
0x121d   : > { %7945 = vrcp.f32 %v5586_v46 }
0x122a   : > { %v7946_v15 = vpop.eup %7945 }
0x122b   : > { %v5592_v32 = vrot.slane %v7946_v15, %v5591_v62 }
0x122d   : > { %v10066_v50 = vmul.f32 %v5592_v32, %v9917_v6  ;;  %v10069_v39 = vmul.f32 %v5592_v32, %v9915_v43  ;;  %v5613_v43 = vld [vmem:[%s10181_s9 + $0x10] sm:$0xff] }
0x122e   : > { %7597 = vmatprep.mubr.msk.f32.mxu0 %vm4288_vm2, %v5613_v43 }
0x122f   : > { %v5601_v49 = vadd.f32 %v6554_v12, %v10066_v50  ;;  %v5600_v33 = vadd.f32 %v6554_v12, %v10069_v39 }
0x1231   : > { %5604 = vmax.xlane.f32.xlu0 %v5601_v49  ;;  %5602 = vmax.xlane.f32.xlu1 %v5600_v33 }
0x1235   : > { %5608 = vadd.xlane.f32.xlu0 %v10066_v50  ;;  %5606 = vadd.xlane.f32.xlu1 %v10069_v39 }
0x12ba   : > { %v5605_v6 = vpop.xlane.xlu0 %5604  ;;  %v5603_v51 = vpop.xlane.xlu1 %5602 }
0x12bb   : > { %7600 = vmatprep.subr.mxu1 %v5605_v6 }
0x12bc   : > { %7601 = vmatpush3.msra.mxu1 %v5605_v6 }
0x12bd   : > { %7602 = vmatprep.subr.mxu1 %v5603_v51 }
0x12be   : > { %v5609_v35 = vpop.xlane.xlu0 %5608  ;;  %7603 = vmatpush3.msra.mxu1 %v5603_v51  ;;  %v5607_v42 = vpop.xlane.xlu1 %5606 }
0x12bf   : > { %7593 = vmatprep.subr.mxu0 %v5609_v35  ;;  %7605 = vmatmul.mubr.msk.f32.vlgmr.msra.gmra.mxu1 %vm4288_vm2, %v5612_v34 }
0x12c0   : > { %7594 = vmatpush3.msra.mxu0 %v5609_v35  ;;  %7607 = vmatprep.subr.mxu1 %v7964_v16 }
0x12c1   : > { %7595 = vmatprep.subr.mxu0 %v5607_v42  ;;  %7639 = vmatprep.mubr.msk.f32.mxu1 %vm7965_vm1, %v7964_v16 }
0x12c2   : > { %7596 = vmatpush3.msra.mxu0 %v5607_v42  ;;  %7608 = vmatpush3.msra.mxu1 %v6577_v47 }
0x12c3   : > { %7598 = vmatmul.mubr.msk.f32.vlgmr.msra.gmra.mxu0 %vm4288_vm2, %v5614_v22  ;;  %7609 = vmatprep.subr.mxu1 %v7964_v16 }
0x12c4   : > { %7610 = vmatpush3.msra.mxu1 %v6576_v36 }
0x12c5   : > { %7611 = vmatprep.subr.mxu1 %v7964_v16 }
0x12c6   : > { %7612 = vmatpush3.msra.mxu1 %v6575_v8 }
0x12c7   : > { %7613 = vmatprep.subr.mxu1 %v7964_v16 }
0x12c8   : > { %7614 = vmatpush3.msra.mxu1 %v6574_v54 }
0x12c9   : > { %7615 = vmatprep.subr.mxu1 %v7964_v16 }
0x12ca   : > { %7616 = vmatpush3.msra.mxu1 %v6573_v48 }
0x12cb   : > { %7617 = vmatprep.subr.mxu1 %v7964_v16 }
0x12cc   : > { %7618 = vmatpush3.msra.mxu1 %v6572_v26 }
0x12cd   : > { %7619 = vmatprep.subr.mxu1 %v7964_v16 }
0x12ce   : > { %7620 = vmatpush3.msra.mxu1 %v6571_v0 }
0x12cf   : > { %7621 = vmatprep.subr.mxu1 %v7964_v16 }
0x12d0   : > { %7622 = vmatpush3.msra.mxu1 %v6570_v2 }
0x12d1   : > { %7623 = vmatprep.subr.mxu1 %v7964_v16 }
0x12d2   : > { %7624 = vmatpush3.msra.mxu1 %v6569_v41 }
0x12d3   : > { %7625 = vmatprep.subr.mxu1 %v7964_v16 }
0x12d4   : > { %7626 = vmatpush3.msra.mxu1 %v6568_v24 }
0x12d5   : > { %7627 = vmatprep.subr.mxu1 %v7964_v16 }
0x12d6   : > { %7628 = vmatpush3.msra.mxu1 %v6567_v61 }
0x12d7   : > { %7629 = vmatprep.subr.mxu1 %v7964_v16 }
0x12d8   : > { %7630 = vmatpush3.msra.mxu1 %v6566_v59 }
0x12d9   : > { %7631 = vmatprep.subr.mxu1 %v7964_v16 }
0x12da   : > { %7632 = vmatpush3.msra.mxu1 %v6565_v53 }
0x12db   : > { %7633 = vmatprep.subr.mxu1 %v7964_v16 }
0x12dc   : > { %7634 = vmatpush3.msra.mxu1 %v6564_v52 }
0x12dd   : > { %7635 = vmatprep.subr.mxu1 %v7964_v16 }
0x12de   : > { %7636 = vmatpush3.msra.mxu1 %v6563_v40 }
0x12df   : > { %7637 = vmatprep.subr.mxu1 %v7964_v16 }
0x12e0   : > { %7638 = vmatpush3.msra.mxu1 %v6562_v11 }
0x137f   : > { %v7606_v5 = vpop.f32.mrf.mxu1 }
0x1381   : > { %v5768_v55 = vpop.f32.mrf.mxu1 }
0x1383   : > { %v7599_v58 = vpop.f32.mrf.mxu0 }
0x1384   : > { %v5774_v27 = vadd.f32 %v7606_v5, %v7599_v58 }
0x1385   : > { %v5687_v18 = vpop.f32.mrf.mxu0 }
0x1386   : > { %v5782_v13 = vadd.f32 %v6559_v29, %v5774_v27  ;;  %v5769_v63 = vadd.f32 %v5768_v55, %v5687_v18 }
0x1388   : > { %v6561_v28 = vmul.f32 -1.442695, %v5782_v13  ;;  %v5781_v7 = vadd.f32 %v6559_v29, %v5769_v63 }
0x138a   : > { %7947 = vpow2.f32 %v6561_v28  ;;  %v6560_v19 = vmul.f32 -1.442695, %v5781_v7 }
0x138c   : > { %7949 = vpow2.f32 %v6560_v19 }
0x1397   : > { %v7948_v25 = vpop.eup %7947 }
0x1398   : > { %v5790_v14 = vadd.f32 1.0, %v7948_v25 }
0x1399   : > { %v7950_v4 = vpop.eup %7949 }
0x139a   : > { %7951 = vrcp.f32 %v5790_v14  ;;  %v5789_v1 = vadd.f32 1.0, %v7950_v4 }
0x139c   : > { %7953 = vrcp.f32 %v5789_v1 }
0x13a7   : > { %v7952_v3 = vpop.eup %7951 }
0x13a8   : > { %5802 = vperm.xlu1 %7654, %v7952_v3  }
0x13a9   : > { %v7954_v57 = vpop.eup %7953 }
0x13aa   : > { %5797 = vperm.xlu0 %7653, %v7954_v57  }
0x1423   : > { %v5803_v38 = vpop.permute.xlu1 %5802 }
0x1424   : > { %v5806_v60 = vmul.f32 %v5803_v38, %v10066_v50 }
0x1425   : > { %v5798_v31 = vpop.permute.xlu0 %5797 }
0x1426   : > { %v5805_v23 = vmul.f32 %v5798_v31, %v10069_v39  ;;  %v5808_v17 = vmax.f32 %v5806_v60, 0.0 }
0x1428   : > { %v5807_v37 = vmax.f32 %v5805_v23, 0.0 }
0x142a   : > { %v5809_v10 = vadd.f32 %v5808_v17, %v5807_v37 }
0x142c   : > { %v5810_v9 = vrot.slane %v5809_v10, 4 }
0x142e   : > { %v5811_v56 = vadd.f32 %v5810_v9, %v5809_v10 }
0x1430   : > { %v5812_v44 = vrot.slane %v5811_v56, 2 }
0x1432   : > { %v5813_v16 = vadd.f32 %v5812_v44, %v5811_v56 }
0x1434   : > { %v5814_v45 = vrot.slane %v5813_v16, 1 }
0x1436   : > { %v5815_v46 = vadd.f32 %v5814_v45, %v5813_v16 }
0x1438   : > { %v5816_v30 = vmul.f32 0.0625, %v5815_v46 }
0x143a   : > { %7640 = vmatmul.mubr.f32.vlgmr.msra.gmra.mxu1 %v5816_v30 }
0x14fa   : > { %v5900_v15 = vpop.f32.mrf.mxu1 }
0x14fb   : > { %v5907_v32 = vrot.slane %v5900_v15, %v5591_v62 }
0x14fc   : > { %v7641_v12 = vpop.f32.mrf.mxu1 }
0x14fd   : > { %5908 = vst [vmem:[%s362_s22] sm:$0xff] %v5907_v32 }
0x14fe PF: > { %s20_s13 = sadd.s32 1, %s7961_s13  }
0x14ff   : > { %p17_p5 = scmp.ge.s32.totalorder %s20_s13, 4  }
0x1501   :  { %19 = sbr.rel (!%p17_p5) target bundleno = 1 (0x1), region = 102 }

</bundles_post_ra>
